<compile_context>
chip_gen: v7x
topology: tpu7x:2x2x1
jax: 0.10.0
libtpu: 0.0.40
codegen_flags: <defaults>
</compile_context>

<pallas_src>
import functools
import numpy as np
import jax
import jax.numpy as jnp
from jax.experimental import pallas as pl
from jax.experimental.pallas import tpu as pltpu


def _round_up(x, m):
    return (x + m - 1) // m * m


def _cdiv(a, b):
    return (a + b - 1) // b


# ----------------------------- Pallas kernel ------------------------------- #
def _fused_conv_kernel(xa_ref, xb_ref, w_ref, b_ref, o_ref, acc_ref, *,
                       Q, tl, negative_slope, apply_act):
    """One (batch, group, time-tile, contraction-chunk) step of a fused Conv1d.

    xa_ref : (tc, tl)         bf16  phase-split input, current time tile
    xb_ref : (tc, 128)        bf16  next 128 input columns (tap overhang)
    w_ref  : (Q, coutp, tc)   bf16  per-tap weight slabs for this chunk
    b_ref  : (coutp, 1)       f32   bias
    o_ref  : (coutp, tl)      bf16  lane-dense output tile
    acc_ref: (coutp, tl)      f32   accumulator (lives across the c axis)
    """
    c = pl.program_id(3)

    @pl.when(c == 0)
    def _():
        acc_ref[...] = jnp.zeros_like(acc_ref)

    xwin = jnp.concatenate([xa_ref[...], xb_ref[...]], axis=-1)  # (tc, tl+128)
    acc = acc_ref[...]
    for q in range(Q):                   # static unroll; Q <= 15 for MelGAN
        acc = acc + jnp.dot(w_ref[q], xwin[:, q:q + tl],
                            preferred_element_type=jnp.float32)
    acc_ref[...] = acc

    @pl.when(c == pl.num_programs(3) - 1)
    def _():
        y = acc_ref[...] + b_ref[...]
        if apply_act:                    # static per layer: LeakyReLU
            y = jnp.where(y >= 0.0, y, y * negative_slope)
        o_ref[...] = y.astype(o_ref.dtype)


def pallas_fused_conv1d(x_ph, w2, bias, *, tl, tc, Q, negative_slope,
                        apply_act):
    """x_ph (B,G,C2p,T_ph) bf16, w2 (G,Q,coutp,C2p) bf16, bias (G,coutp,1) f32
    -> (B, G, coutp, n_tiles*tl) bf16, with fused bias + LeakyReLU."""
    B, G, C2p, T_ph = x_ph.shape
    _, _, coutp, _ = w2.shape
    n_tiles = (T_ph - 128) // tl
    n_c = C2p // tc
    tlb = tl // 128

    # right-sized VMEM budget: double-buffered ins/outs + f32 accumulator
    est = (2 * tc * (tl + 128) * 2 + 2 * Q * coutp * tc * 2
           + 2 * coutp * tl * 2 + coutp * tl * 4 + 2 * coutp * 4)
    vmem_limit = max(8 << 20, min(2 * est, 96 << 20))

    kernel = functools.partial(_fused_conv_kernel, Q=Q, tl=tl,
                               negative_slope=negative_slope,
                               apply_act=apply_act)
    return pl.pallas_call(
        kernel,
        out_shape=jax.ShapeDtypeStruct((B, G, coutp, n_tiles * tl),
                                       jnp.bfloat16),
        grid_spec=pltpu.PrefetchScalarGridSpec(
            num_scalar_prefetch=0,
            grid=(B, G, n_tiles, n_c),
            in_specs=[
                pl.BlockSpec((None, None, tc, tl),
                             lambda b, g, i, c: (b, g, c, i)),
                pl.BlockSpec((None, None, tc, 128),
                             lambda b, g, i, c: (b, g, c, (i + 1) * tlb)),
                pl.BlockSpec((None, Q, coutp, tc),
                             lambda b, g, i, c: (g, 0, 0, c)),
                pl.BlockSpec((None, coutp, 1),
                             lambda b, g, i, c: (g, 0, 0)),
            ],
            out_specs=pl.BlockSpec((None, None, coutp, tl),
                                   lambda b, g, i, c: (b, g, 0, i)),
            scratch_shapes=[pltpu.VMEM((coutp, tl), jnp.float32)],
        ),
        compiler_params=pltpu.CompilerParams(
            dimension_semantics=("parallel", "parallel", "parallel",
                                 "arbitrary"),
            vmem_limit_bytes=vmem_limit),
    )(x_ph, x_ph, w2, bias)


# ------------------------------ JAX glue ----------------------------------- #
def _choose_time_tile(Lout, coutp, tc, Q, outer_parallel):
    """Largest lane tile (multiple of 128, <= 2048) within ~10 MiB / step."""
    tl = min(2048, _round_up(Lout, 128))

    def footprint(t):
        return (2 * tc * (t + 128) * 2 + 2 * Q * coutp * tc * 2
                + 2 * coutp * t * 2 + coutp * t * 4)

    while tl > 128 and footprint(tl) > (10 << 20):
        tl -= 128
    # v7x megacore: keep at least 2 parallel grid steps when B*G == 1.
    while outer_parallel * _cdiv(Lout, tl) < 2 and tl > 128:
        tl -= 128
    return tl


def conv1d_layer(x, layer):
    """x: (B, Cin, T) -> (B, Cout, Lout) bf16; matches torch.nn.Conv1d."""
    B, Cin, T = x.shape
    K, stride = layer["ksize"], layer["stride"]
    padding, G = layer["padding"], layer["groups"]
    cin_g, cout_g, coutp = layer["cin_g"], layer["cout_g"], layer["coutp"]
    C2, C2p, tc, Q = layer["C2"], layer["C2p"], layer["tc"], layer["Q"]

    Tp = T + 2 * padding
    Lout = (Tp - K) // stride + 1
    tl = _choose_time_tile(Lout, coutp, tc, Q, B * G)
    n_tiles = _cdiv(Lout, tl)
    T_ph = n_tiles * tl + 128            # +128 columns of tap overhang

    # conv padding (reflect for layer 0), then zero-pad to the tiled extent
    xp = jnp.pad(x, ((0, 0), (0, 0), (padding, padding)),
                 mode=layer["pad_mode"])
    xp = jnp.pad(xp, ((0, 0), (0, 0), (0, stride * T_ph - Tp)))
    # phase split: x_ph[b,g,ci*stride+p,t] = xp[b, g*cin_g+ci, t*stride+p]
    xp = xp.reshape(B, G, cin_g, T_ph, stride).transpose(0, 1, 2, 4, 3)
    xp = xp.reshape(B, G, C2, T_ph)
    if C2p > C2:
        xp = jnp.pad(xp, ((0, 0), (0, 0), (0, C2p - C2), (0, 0)))
    xp = xp.astype(jnp.bfloat16)

    out = pallas_fused_conv1d(xp, layer["w2"], layer["bg"], tl=tl, tc=tc, Q=Q,
                              negative_slope=layer["negative_slope"],
                              apply_act=layer["apply_act"])
    # (B, G, coutp, n_tiles*tl) -> (B, Cout, Lout)
    out = out[:, :, :cout_g, :Lout]
    return out.reshape(B, G * cout_g, Lout)


def build_melgan_discriminator(key, in_channels=1, out_channels=1,
                               kernel_sizes=(5, 3), channels=16,
                               max_downsample_channels=1024, bias=True,
                               downsample_scales=(4, 4, 4, 4),
                               negative_slope=0.2):
    """Mirror of MelGANDiscriminator.__init__; pre-packs per-tap bf16 weights."""
    assert len(kernel_sizes) == 2
    assert kernel_sizes[0] % 2 == 1 and kernel_sizes[1] % 2 == 1

    def make_conv(k, cin, cout, ksz, stride, padding, groups, pad_mode, act):
        kw, kb = jax.random.split(k)
        cin_g, cout_g = cin // groups, cout // groups
        fan_in = cin_g * ksz
        bound = 1.0 / np.sqrt(fan_in)
        w = jax.random.uniform(kw, (cout, cin_g, ksz), jnp.float32,
                               -bound, bound)
        b = (jax.random.uniform(kb, (cout,), jnp.float32, -bound, bound)
             if bias else jnp.zeros((cout,), jnp.float32))

        # --- pre-pack per-tap weights ONCE (unpadded cout, bf16) ---
        Q = _cdiv(ksz, stride)                  # taps per phase
        assert Q <= 128
        C2 = cin_g * stride                     # contraction dim per tap
        if C2 > 512:                            # chunk wide contractions
            C2p, tc = _round_up(C2, 256), 256
        else:
            C2p, tc = _round_up(C2, 8), _round_up(C2, 8)
        coutp = _round_up(cout_g, 8)            # sublane quantum only, NOT 128
        wq = jnp.pad(w, ((0, 0), (0, 0), (0, Q * stride - ksz)))
        wq = wq.reshape(groups, cout_g, cin_g, Q, stride)
        w2 = wq.transpose(0, 3, 1, 2, 4).reshape(groups, Q, cout_g, C2)
        w2 = jnp.pad(w2, ((0, 0), (0, 0), (0, coutp - cout_g), (0, C2p - C2)))
        bg = jnp.pad(b.reshape(groups, cout_g, 1),
                     ((0, 0), (0, coutp - cout_g), (0, 0)))
        return dict(w=w, b=b, ksize=ksz, stride=stride, padding=padding,
                    groups=groups, pad_mode=pad_mode, apply_act=act,
                    negative_slope=negative_slope, cin_g=cin_g, cout_g=cout_g,
                    coutp=coutp, Q=Q, C2=C2, C2p=C2p, tc=tc,
                    w2=w2.astype(jnp.bfloat16), bg=bg.astype(jnp.float32))

    n_layers = 1 + len(downsample_scales) + 2
    keys = jax.random.split(key, n_layers)
    layers, ki = [], 0

    # layer 0: ReflectionPad1d + Conv1d(in, channels, prod(ks)) + LeakyReLU
    k0 = int(np.prod(kernel_sizes))
    layers.append(make_conv(keys[ki], in_channels, channels, k0, 1,
                            (k0 - 1) // 2, 1, "reflect", True)); ki += 1
    in_chs = channels
    for ds in downsample_scales:                 # grouped downsampling convs
        out_chs = min(in_chs * ds, max_downsample_channels)
        layers.append(make_conv(keys[ki], in_chs, out_chs, ds * 10 + 1, ds,
                                ds * 5, in_chs // 4, "constant", True)); ki += 1
        in_chs = out_chs
    out_chs = min(in_chs * 2, max_downsample_channels)     # penultimate conv
    layers.append(make_conv(keys[ki], in_chs, out_chs, kernel_sizes[0], 1,
                            (kernel_sizes[0] - 1) // 2, 1, "constant", True)); ki += 1
    layers.append(make_conv(keys[ki], out_chs, out_channels, kernel_sizes[1], 1,
                            (kernel_sizes[1] - 1) // 2, 1, "constant", False)); ki += 1
    return layers


def melgan_discriminator_forward(x, layers):
    """Returns the list of per-layer outputs (bf16), like the PyTorch forward."""
    outs = []
    for layer in layers:
        x = conv1d_layer(x, layer)
        outs.append(x)
    return outs


# ------------------------ pure-XLA reference check ------------------------- #
def reference_forward(x, layers):
    outs = []
    for L in layers:
        xp = jnp.pad(x, ((0, 0), (0, 0), (L["padding"], L["padding"])),
                     mode=L["pad_mode"])
        y = jax.lax.conv_general_dilated(
            xp, L["w"], window_strides=(L["stride"],), padding="VALID",
            dimension_numbers=("NCH", "OIH", "NCH"),
            feature_group_count=L["groups"])
        y = y + L["b"][None, :, None]
        if L["apply_act"]:
            y = jnp.where(y >= 0, y, y * L["negative_slope"])
        outs.append(y)
        x = y
    return outs


if __name__ == "__main__":
    key = jax.random.PRNGKey(0)
    kx, kp = jax.random.split(key)

    # Small-but-structurally-identical MelGANDiscriminator configuration:
    #   layer0: reflect-pad(7) + Conv1d(1, 8, 15)           + LeakyReLU(0.2)
    #   layer1: Conv1d(8, 32, 41, stride 4, pad 20, g=2)    + LeakyReLU(0.2)
    #   layer2: Conv1d(32, 64, 41, stride 4, pad 20, g=8)   + LeakyReLU(0.2)
    #   layer3: Conv1d(64, 64, 5, pad 2)                    + LeakyReLU(0.2)
    #   layer4: Conv1d(64, 1, 3, pad 1)
    layers = build_melgan_discriminator(
        kp, in_channels=1, out_channels=1, kernel_sizes=(5, 3), channels=8,
        max_downsample_channels=64, bias=True, downsample_scales=(4, 4),
        negative_slope=0.2)

    B, T = 2, 64
    x = jax.random.normal(kx, (B, 1, T), jnp.float32)   # (B, 1, T) noise signal

    fwd = jax.jit(functools.partial(melgan_discriminator_forward,
                                    layers=layers))
    outs = jax.block_until_ready(fwd(x))

    refs = reference_forward(x, layers)
    for o, r in zip(outs, refs):
        assert o.shape == r.shape, (o.shape, r.shape)
        # tolerance loosened vs the f32 reference: activations chain in bf16
        np.testing.assert_allclose(np.asarray(o.astype(jnp.float32)),
                                   np.asarray(r), rtol=5e-2, atol=5e-2)
    print("KERNEL_OK")
</pallas_src>

<mosaic_0001>
module attributes {stable_mosaic.version = 11 : i64} {
  func.func @_fused_conv_kernel(%arg0: i32, %arg1: i32, %arg2: i32, %arg3: i32, %arg4: memref<1x1x8x128xbf16, #tpu.memory_space<vmem>>, %arg5: memref<1x1x8x128xbf16, #tpu.memory_space<vmem>>, %arg6: memref<1x15x8x8xbf16, #tpu.memory_space<vmem>>, %arg7: memref<1x8x1xf32, #tpu.memory_space<vmem>>, %arg8: memref<1x1x8x128xbf16, #tpu.memory_space<vmem>>, %arg9: memref<8x128xf32, #tpu.memory_space<vmem>>) attributes {dimension_semantics = [#tpu.dimension_semantics<parallel>, #tpu.dimension_semantics<parallel>, #tpu.dimension_semantics<parallel>, #tpu.dimension_semantics<arbitrary>], iteration_bounds = array<i64: 2, 1, 1, 1>, scalar_prefetch = 0 : i64, scratch_operands = 1 : i64, tpu.core_type = #tpu.core_type<tc>, window_params = [{transform_indices = @transform_0, window_bounds = array<i64: 1, 1, 8, 128>}, {transform_indices = @transform_1, window_bounds = array<i64: 1, 1, 8, 128>}, {transform_indices = @transform_2, window_bounds = array<i64: 1, 15, 8, 8>}, {transform_indices = @transform_3, window_bounds = array<i64: 1, 8, 1>}, {transform_indices = @transform_4, window_bounds = array<i64: 1, 1, 8, 128>}]} {
    %c0_i32 = arith.constant 0 : i32
    %0 = arith.cmpi eq, %arg3, %c0_i32 : i32
    %1 = arith.extui %0 : i1 to i32
    %c0_i32_0 = arith.constant 0 : i32
    %2 = arith.cmpi ne, %1, %c0_i32_0 : i32
    scf.if %2 {
      %cst_74 = arith.constant 0.000000e+00 : f32
      %88 = vector.broadcast %cst_74 : f32 to vector<8x128xf32>
      %c0_75 = arith.constant 0 : index
      %c0_76 = arith.constant 0 : index
      %89 = vector.load %arg9[%c0_75, %c0_76] : memref<8x128xf32, #tpu.memory_space<vmem>>, vector<8x128xf32>
      tpu.vector_store %arg9[%c0_75, %c0_76], %88 {strides = array<i32>} : memref<8x128xf32, #tpu.memory_space<vmem>>, vector<8x128xf32>,
    } else {
    }
    %c0 = arith.constant 0 : index
    %c0_1 = arith.constant 0 : index
    %c0_2 = arith.constant 0 : index
    %c0_3 = arith.constant 0 : index
    %3 = vector.load %arg4[%c0, %c0_1, %c0_2, %c0_3] : memref<1x1x8x128xbf16, #tpu.memory_space<vmem>>, vector<1x1x8x128xbf16>
    %4 = vector.shape_cast %3 : vector<1x1x8x128xbf16> to vector<8x128xbf16>
    %c0_4 = arith.constant 0 : index
    %c0_5 = arith.constant 0 : index
    %c0_6 = arith.constant 0 : index
    %c0_7 = arith.constant 0 : index
    %5 = vector.load %arg5[%c0_4, %c0_5, %c0_6, %c0_7] : memref<1x1x8x128xbf16, #tpu.memory_space<vmem>>, vector<1x1x8x128xbf16>
    %6 = vector.shape_cast %5 : vector<1x1x8x128xbf16> to vector<8x128xbf16>
    %7 = tpu.concatenate %4, %6 in 1 : vector<8x128xbf16>, vector<8x128xbf16> -> vector<8x256xbf16>
    %c0_8 = arith.constant 0 : index
    %c0_9 = arith.constant 0 : index
    %8 = vector.load %arg9[%c0_8, %c0_9] : memref<8x128xf32, #tpu.memory_space<vmem>>, vector<8x128xf32>
    %c0_10 = arith.constant 0 : index
    %c0_11 = arith.constant 0 : index
    %c0_12 = arith.constant 0 : index
    %c0_13 = arith.constant 0 : index
    %9 = vector.load %arg6[%c0_10, %c0_11, %c0_12, %c0_13] : memref<1x15x8x8xbf16, #tpu.memory_space<vmem>>, vector<1x1x8x8xbf16>
    %10 = vector.shape_cast %9 : vector<1x1x8x8xbf16> to vector<8x8xbf16>
    %11 = vector.extract_strided_slice %7 {offsets = [0, 0], sizes = [8, 128], strides = [1, 1]} : vector<8x256xbf16> to vector<8x128xbf16>
    %cst = arith.constant dense<0.000000e+00> : vector<8x128xf32>
    %12 = tpu.matmul %10, %11, %cst {dimension_numbers = #tpu.dot_dimension_numbers<[1], [0], [0], [1], [0, 0, 1, 1], [], []>} : vector<8x8xbf16>, vector<8x128xbf16>, vector<8x128xf32> -> vector<8x128xf32>
    %13 = arith.addf %8, %12 : vector<8x128xf32>
    %c0_14 = arith.constant 0 : index
    %c1 = arith.constant 1 : index
    %c0_15 = arith.constant 0 : index
    %c0_16 = arith.constant 0 : index
    %14 = vector.load %arg6[%c0_14, %c1, %c0_15, %c0_16] : memref<1x15x8x8xbf16, #tpu.memory_space<vmem>>, vector<1x1x8x8xbf16>
    %15 = vector.shape_cast %14 : vector<1x1x8x8xbf16> to vector<8x8xbf16>
    %16 = vector.extract_strided_slice %7 {offsets = [0, 1], sizes = [8, 128], strides = [1, 1]} : vector<8x256xbf16> to vector<8x128xbf16>
    %cst_17 = arith.constant dense<0.000000e+00> : vector<8x128xf32>
    %17 = tpu.matmul %15, %16, %cst_17 {dimension_numbers = #tpu.dot_dimension_numbers<[1], [0], [0], [1], [0, 0, 1, 1], [], []>} : vector<8x8xbf16>, vector<8x128xbf16>, vector<8x128xf32> -> vector<8x128xf32>
    %18 = arith.addf %13, %17 : vector<8x128xf32>
    %c0_18 = arith.constant 0 : index
    %c2 = arith.constant 2 : index
    %c0_19 = arith.constant 0 : index
    %c0_20 = arith.constant 0 : index
    %19 = vector.load %arg6[%c0_18, %c2, %c0_19, %c0_20] : memref<1x15x8x8xbf16, #tpu.memory_space<vmem>>, vector<1x1x8x8xbf16>
    %20 = vector.shape_cast %19 : vector<1x1x8x8xbf16> to vector<8x8xbf16>
    %21 = vector.extract_strided_slice %7 {offsets = [0, 2], sizes = [8, 128], strides = [1, 1]} : vector<8x256xbf16> to vector<8x128xbf16>
    %cst_21 = arith.constant dense<0.000000e+00> : vector<8x128xf32>
    %22 = tpu.matmul %20, %21, %cst_21 {dimension_numbers = #tpu.dot_dimension_numbers<[1], [0], [0], [1], [0, 0, 1, 1], [], []>} : vector<8x8xbf16>, vector<8x128xbf16>, vector<8x128xf32> -> vector<8x128xf32>
    %23 = arith.addf %18, %22 : vector<8x128xf32>
    %c0_22 = arith.constant 0 : index
    %c3 = arith.constant 3 : index
    %c0_23 = arith.constant 0 : index
    %c0_24 = arith.constant 0 : index
    %24 = vector.load %arg6[%c0_22, %c3, %c0_23, %c0_24] : memref<1x15x8x8xbf16, #tpu.memory_space<vmem>>, vector<1x1x8x8xbf16>
    %25 = vector.shape_cast %24 : vector<1x1x8x8xbf16> to vector<8x8xbf16>
    %26 = vector.extract_strided_slice %7 {offsets = [0, 3], sizes = [8, 128], strides = [1, 1]} : vector<8x256xbf16> to vector<8x128xbf16>
    %cst_25 = arith.constant dense<0.000000e+00> : vector<8x128xf32>
    %27 = tpu.matmul %25, %26, %cst_25 {dimension_numbers = #tpu.dot_dimension_numbers<[1], [0], [0], [1], [0, 0, 1, 1], [], []>} : vector<8x8xbf16>, vector<8x128xbf16>, vector<8x128xf32> -> vector<8x128xf32>
    %28 = arith.addf %23, %27 : vector<8x128xf32>
    %c0_26 = arith.constant 0 : index
    %c4 = arith.constant 4 : index
    %c0_27 = arith.constant 0 : index
    %c0_28 = arith.constant 0 : index
    %29 = vector.load %arg6[%c0_26, %c4, %c0_27, %c0_28] : memref<1x15x8x8xbf16, #tpu.memory_space<vmem>>, vector<1x1x8x8xbf16>
    %30 = vector.shape_cast %29 : vector<1x1x8x8xbf16> to vector<8x8xbf16>
    %31 = vector.extract_strided_slice %7 {offsets = [0, 4], sizes = [8, 128], strides = [1, 1]} : vector<8x256xbf16> to vector<8x128xbf16>
    %cst_29 = arith.constant dense<0.000000e+00> : vector<8x128xf32>
    %32 = tpu.matmul %30, %31, %cst_29 {dimension_numbers = #tpu.dot_dimension_numbers<[1], [0], [0], [1], [0, 0, 1, 1], [], []>} : vector<8x8xbf16>, vector<8x128xbf16>, vector<8x128xf32> -> vector<8x128xf32>
    %33 = arith.addf %28, %32 : vector<8x128xf32>
    %c0_30 = arith.constant 0 : index
    %c5 = arith.constant 5 : index
    %c0_31 = arith.constant 0 : index
    %c0_32 = arith.constant 0 : index
    %34 = vector.load %arg6[%c0_30, %c5, %c0_31, %c0_32] : memref<1x15x8x8xbf16, #tpu.memory_space<vmem>>, vector<1x1x8x8xbf16>
    %35 = vector.shape_cast %34 : vector<1x1x8x8xbf16> to vector<8x8xbf16>
    %36 = vector.extract_strided_slice %7 {offsets = [0, 5], sizes = [8, 128], strides = [1, 1]} : vector<8x256xbf16> to vector<8x128xbf16>
    %cst_33 = arith.constant dense<0.000000e+00> : vector<8x128xf32>
    %37 = tpu.matmul %35, %36, %cst_33 {dimension_numbers = #tpu.dot_dimension_numbers<[1], [0], [0], [1], [0, 0, 1, 1], [], []>} : vector<8x8xbf16>, vector<8x128xbf16>, vector<8x128xf32> -> vector<8x128xf32>
    %38 = arith.addf %33, %37 : vector<8x128xf32>
    %c0_34 = arith.constant 0 : index
    %c6 = arith.constant 6 : index
    %c0_35 = arith.constant 0 : index
    %c0_36 = arith.constant 0 : index
    %39 = vector.load %arg6[%c0_34, %c6, %c0_35, %c0_36] : memref<1x15x8x8xbf16, #tpu.memory_space<vmem>>, vector<1x1x8x8xbf16>
    %40 = vector.shape_cast %39 : vector<1x1x8x8xbf16> to vector<8x8xbf16>
    %41 = vector.extract_strided_slice %7 {offsets = [0, 6], sizes = [8, 128], strides = [1, 1]} : vector<8x256xbf16> to vector<8x128xbf16>
    %cst_37 = arith.constant dense<0.000000e+00> : vector<8x128xf32>
    %42 = tpu.matmul %40, %41, %cst_37 {dimension_numbers = #tpu.dot_dimension_numbers<[1], [0], [0], [1], [0, 0, 1, 1], [], []>} : vector<8x8xbf16>, vector<8x128xbf16>, vector<8x128xf32> -> vector<8x128xf32>
    %43 = arith.addf %38, %42 : vector<8x128xf32>
    %c0_38 = arith.constant 0 : index
    %c7 = arith.constant 7 : index
    %c0_39 = arith.constant 0 : index
    %c0_40 = arith.constant 0 : index
    %44 = vector.load %arg6[%c0_38, %c7, %c0_39, %c0_40] : memref<1x15x8x8xbf16, #tpu.memory_space<vmem>>, vector<1x1x8x8xbf16>
    %45 = vector.shape_cast %44 : vector<1x1x8x8xbf16> to vector<8x8xbf16>
    %46 = vector.extract_strided_slice %7 {offsets = [0, 7], sizes = [8, 128], strides = [1, 1]} : vector<8x256xbf16> to vector<8x128xbf16>
    %cst_41 = arith.constant dense<0.000000e+00> : vector<8x128xf32>
    %47 = tpu.matmul %45, %46, %cst_41 {dimension_numbers = #tpu.dot_dimension_numbers<[1], [0], [0], [1], [0, 0, 1, 1], [], []>} : vector<8x8xbf16>, vector<8x128xbf16>, vector<8x128xf32> -> vector<8x128xf32>
    %48 = arith.addf %43, %47 : vector<8x128xf32>
    %c0_42 = arith.constant 0 : index
    %c8 = arith.constant 8 : index
    %c0_43 = arith.constant 0 : index
    %c0_44 = arith.constant 0 : index
    %49 = vector.load %arg6[%c0_42, %c8, %c0_43, %c0_44] : memref<1x15x8x8xbf16, #tpu.memory_space<vmem>>, vector<1x1x8x8xbf16>
    %50 = vector.shape_cast %49 : vector<1x1x8x8xbf16> to vector<8x8xbf16>
    %51 = vector.extract_strided_slice %7 {offsets = [0, 8], sizes = [8, 128], strides = [1, 1]} : vector<8x256xbf16> to vector<8x128xbf16>
    %cst_45 = arith.constant dense<0.000000e+00> : vector<8x128xf32>
    %52 = tpu.matmul %50, %51, %cst_45 {dimension_numbers = #tpu.dot_dimension_numbers<[1], [0], [0], [1], [0, 0, 1, 1], [], []>} : vector<8x8xbf16>, vector<8x128xbf16>, vector<8x128xf32> -> vector<8x128xf32>
    %53 = arith.addf %48, %52 : vector<8x128xf32>
    %c0_46 = arith.constant 0 : index
    %c9 = arith.constant 9 : index
    %c0_47 = arith.constant 0 : index
    %c0_48 = arith.constant 0 : index
    %54 = vector.load %arg6[%c0_46, %c9, %c0_47, %c0_48] : memref<1x15x8x8xbf16, #tpu.memory_space<vmem>>, vector<1x1x8x8xbf16>
    %55 = vector.shape_cast %54 : vector<1x1x8x8xbf16> to vector<8x8xbf16>
    %56 = vector.extract_strided_slice %7 {offsets = [0, 9], sizes = [8, 128], strides = [1, 1]} : vector<8x256xbf16> to vector<8x128xbf16>
    %cst_49 = arith.constant dense<0.000000e+00> : vector<8x128xf32>
    %57 = tpu.matmul %55, %56, %cst_49 {dimension_numbers = #tpu.dot_dimension_numbers<[1], [0], [0], [1], [0, 0, 1, 1], [], []>} : vector<8x8xbf16>, vector<8x128xbf16>, vector<8x128xf32> -> vector<8x128xf32>
    %58 = arith.addf %53, %57 : vector<8x128xf32>
    %c0_50 = arith.constant 0 : index
    %c10 = arith.constant 10 : index
    %c0_51 = arith.constant 0 : index
    %c0_52 = arith.constant 0 : index
    %59 = vector.load %arg6[%c0_50, %c10, %c0_51, %c0_52] : memref<1x15x8x8xbf16, #tpu.memory_space<vmem>>, vector<1x1x8x8xbf16>
    %60 = vector.shape_cast %59 : vector<1x1x8x8xbf16> to vector<8x8xbf16>
    %61 = vector.extract_strided_slice %7 {offsets = [0, 10], sizes = [8, 128], strides = [1, 1]} : vector<8x256xbf16> to vector<8x128xbf16>
    %cst_53 = arith.constant dense<0.000000e+00> : vector<8x128xf32>
    %62 = tpu.matmul %60, %61, %cst_53 {dimension_numbers = #tpu.dot_dimension_numbers<[1], [0], [0], [1], [0, 0, 1, 1], [], []>} : vector<8x8xbf16>, vector<8x128xbf16>, vector<8x128xf32> -> vector<8x128xf32>
    %63 = arith.addf %58, %62 : vector<8x128xf32>
    %c0_54 = arith.constant 0 : index
    %c11 = arith.constant 11 : index
    %c0_55 = arith.constant 0 : index
    %c0_56 = arith.constant 0 : index
    %64 = vector.load %arg6[%c0_54, %c11, %c0_55, %c0_56] : memref<1x15x8x8xbf16, #tpu.memory_space<vmem>>, vector<1x1x8x8xbf16>
    %65 = vector.shape_cast %64 : vector<1x1x8x8xbf16> to vector<8x8xbf16>
    %66 = vector.extract_strided_slice %7 {offsets = [0, 11], sizes = [8, 128], strides = [1, 1]} : vector<8x256xbf16> to vector<8x128xbf16>
    %cst_57 = arith.constant dense<0.000000e+00> : vector<8x128xf32>
    %67 = tpu.matmul %65, %66, %cst_57 {dimension_numbers = #tpu.dot_dimension_numbers<[1], [0], [0], [1], [0, 0, 1, 1], [], []>} : vector<8x8xbf16>, vector<8x128xbf16>, vector<8x128xf32> -> vector<8x128xf32>
    %68 = arith.addf %63, %67 : vector<8x128xf32>
    %c0_58 = arith.constant 0 : index
    %c12 = arith.constant 12 : index
    %c0_59 = arith.constant 0 : index
    %c0_60 = arith.constant 0 : index
    %69 = vector.load %arg6[%c0_58, %c12, %c0_59, %c0_60] : memref<1x15x8x8xbf16, #tpu.memory_space<vmem>>, vector<1x1x8x8xbf16>
    %70 = vector.shape_cast %69 : vector<1x1x8x8xbf16> to vector<8x8xbf16>
    %71 = vector.extract_strided_slice %7 {offsets = [0, 12], sizes = [8, 128], strides = [1, 1]} : vector<8x256xbf16> to vector<8x128xbf16>
    %cst_61 = arith.constant dense<0.000000e+00> : vector<8x128xf32>
    %72 = tpu.matmul %70, %71, %cst_61 {dimension_numbers = #tpu.dot_dimension_numbers<[1], [0], [0], [1], [0, 0, 1, 1], [], []>} : vector<8x8xbf16>, vector<8x128xbf16>, vector<8x128xf32> -> vector<8x128xf32>
    %73 = arith.addf %68, %72 : vector<8x128xf32>
    %c0_62 = arith.constant 0 : index
    %c13 = arith.constant 13 : index
    %c0_63 = arith.constant 0 : index
    %c0_64 = arith.constant 0 : index
    %74 = vector.load %arg6[%c0_62, %c13, %c0_63, %c0_64] : memref<1x15x8x8xbf16, #tpu.memory_space<vmem>>, vector<1x1x8x8xbf16>
    %75 = vector.shape_cast %74 : vector<1x1x8x8xbf16> to vector<8x8xbf16>
    %76 = vector.extract_strided_slice %7 {offsets = [0, 13], sizes = [8, 128], strides = [1, 1]} : vector<8x256xbf16> to vector<8x128xbf16>
    %cst_65 = arith.constant dense<0.000000e+00> : vector<8x128xf32>
    %77 = tpu.matmul %75, %76, %cst_65 {dimension_numbers = #tpu.dot_dimension_numbers<[1], [0], [0], [1], [0, 0, 1, 1], [], []>} : vector<8x8xbf16>, vector<8x128xbf16>, vector<8x128xf32> -> vector<8x128xf32>
    %78 = arith.addf %73, %77 : vector<8x128xf32>
    %c0_66 = arith.constant 0 : index
    %c14 = arith.constant 14 : index
    %c0_67 = arith.constant 0 : index
    %c0_68 = arith.constant 0 : index
    %79 = vector.load %arg6[%c0_66, %c14, %c0_67, %c0_68] : memref<1x15x8x8xbf16, #tpu.memory_space<vmem>>, vector<1x1x8x8xbf16>
    %80 = vector.shape_cast %79 : vector<1x1x8x8xbf16> to vector<8x8xbf16>
    %81 = vector.extract_strided_slice %7 {offsets = [0, 14], sizes = [8, 128], strides = [1, 1]} : vector<8x256xbf16> to vector<8x128xbf16>
    %cst_69 = arith.constant dense<0.000000e+00> : vector<8x128xf32>
    %82 = tpu.matmul %80, %81, %cst_69 {dimension_numbers = #tpu.dot_dimension_numbers<[1], [0], [0], [1], [0, 0, 1, 1], [], []>} : vector<8x8xbf16>, vector<8x128xbf16>, vector<8x128xf32> -> vector<8x128xf32>
    %83 = arith.addf %78, %82 : vector<8x128xf32>
    %c0_70 = arith.constant 0 : index
    %c0_71 = arith.constant 0 : index
    %84 = vector.load %arg9[%c0_70, %c0_71] : memref<8x128xf32, #tpu.memory_space<vmem>>, vector<8x128xf32>
    tpu.vector_store %arg9[%c0_70, %c0_71], %83 {strides = array<i32>} : memref<8x128xf32, #tpu.memory_space<vmem>>, vector<8x128xf32>,
    %c0_i32_72 = arith.constant 0 : i32
    %85 = arith.cmpi eq, %arg3, %c0_i32_72 : i32
    %86 = arith.extui %85 : i1 to i32
    %c0_i32_73 = arith.constant 0 : i32
    %87 = arith.cmpi ne, %86, %c0_i32_73 : i32
    scf.if %87 {
      %c0_74 = arith.constant 0 : index
      %c0_75 = arith.constant 0 : index
      %88 = vector.load %arg9[%c0_74, %c0_75] : memref<8x128xf32, #tpu.memory_space<vmem>>, vector<8x128xf32>
      %c0_76 = arith.constant 0 : index
      %c0_77 = arith.constant 0 : index
      %c0_78 = arith.constant 0 : index
      %89 = vector.load %arg7[%c0_76, %c0_77, %c0_78] : memref<1x8x1xf32, #tpu.memory_space<vmem>>, vector<1x8x1xf32>
      %90 = vector.shape_cast %89 : vector<1x8x1xf32> to vector<8x1xf32>
      %91 = vector.broadcast %90 : vector<8x1xf32> to vector<8x128xf32>
      %92 = arith.addf %88, %91 : vector<8x128xf32>
      %cst_79 = arith.constant 0.000000e+00 : f32
      %93 = vector.broadcast %cst_79 : f32 to vector<8x128xf32>
      %94 = arith.cmpf oge, %92, %93 : vector<8x128xf32>
      %cst_80 = arith.constant 2.000000e-01 : f32
      %95 = vector.broadcast %cst_80 : f32 to vector<8x128xf32>
      %96 = arith.mulf %92, %95 : vector<8x128xf32>
      %97 = arith.select %94, %92, %96 : vector<8x128xi1>, vector<8x128xf32>
      %98 = arith.truncf %97 : vector<8x128xf32> to vector<8x128xbf16>
      %c0_81 = arith.constant 0 : index
      %c0_82 = arith.constant 0 : index
      %c0_83 = arith.constant 0 : index
      %c0_84 = arith.constant 0 : index
      %99 = vector.load %arg8[%c0_81, %c0_82, %c0_83, %c0_84] : memref<1x1x8x128xbf16, #tpu.memory_space<vmem>>, vector<1x1x8x128xbf16>
      %100 = vector.shape_cast %99 : vector<1x1x8x128xbf16> to vector<8x128xbf16>
      %101 = vector.shape_cast %98 : vector<8x128xbf16> to vector<1x1x8x128xbf16>
      tpu.vector_store %arg8[%c0_81, %c0_82, %c0_83, %c0_84], %101 {strides = array<i32>} : memref<1x1x8x128xbf16, #tpu.memory_space<vmem>>, vector<1x1x8x128xbf16>,
    } else {
    }
    return
  }
  func.func @transform_0(%arg0: i32, %arg1: i32, %arg2: i32, %arg3: i32) -> (i32, i32, i32, i32) {
    %c0_i32 = arith.constant 0 : i32
    return %arg0, %arg1, %arg3, %arg2 : i32, i32, i32, i32
  }
  func.func @transform_1(%arg0: i32, %arg1: i32, %arg2: i32, %arg3: i32) -> (i32, i32, i32, i32) {
    %c1_i32 = arith.constant 1 : i32
    %0 = arith.addi %arg2, %c1_i32 : i32
    %c1_i32_0 = arith.constant 1 : i32
    %1 = arith.muli %0, %c1_i32_0 : i32
    %c0_i32 = arith.constant 0 : i32
    return %arg0, %arg1, %arg3, %1 : i32, i32, i32, i32
  }
  func.func @transform_2(%arg0: i32, %arg1: i32, %arg2: i32, %arg3: i32) -> (i32, i32, i32, i32) {
    %c0_i32 = arith.constant 0 : i32
    %c0_i32_0 = arith.constant 0 : i32
    %c0_i32_1 = arith.constant 0 : i32
    return %arg1, %c0_i32, %c0_i32_0, %arg3 : i32, i32, i32, i32
  }
  func.func @transform_3(%arg0: i32, %arg1: i32, %arg2: i32, %arg3: i32) -> (i32, i32, i32) {
    %c0_i32 = arith.constant 0 : i32
    %c0_i32_0 = arith.constant 0 : i32
    %c0_i32_1 = arith.constant 0 : i32
    return %arg1, %c0_i32, %c0_i32_0 : i32, i32, i32
  }
  func.func @transform_4(%arg0: i32, %arg1: i32, %arg2: i32, %arg3: i32) -> (i32, i32, i32, i32) {
    %c0_i32 = arith.constant 0 : i32
    %c0_i32_0 = arith.constant 0 : i32
    return %arg0, %arg1, %c0_i32, %arg2 : i32, i32, i32, i32
  }
}

module attributes {stable_mosaic.version = 11 : i64} {
  func.func @_fused_conv_kernel(%arg0: i32, %arg1: i32, %arg2: i32, %arg3: i32, %arg4: memref<1x1x16x128xbf16, #tpu.memory_space<vmem>>, %arg5: memref<1x1x16x128xbf16, #tpu.memory_space<vmem>>, %arg6: memref<1x11x16x16xbf16, #tpu.memory_space<vmem>>, %arg7: memref<1x16x1xf32, #tpu.memory_space<vmem>>, %arg8: memref<1x1x16x128xbf16, #tpu.memory_space<vmem>>, %arg9: memref<16x128xf32, #tpu.memory_space<vmem>>) attributes {dimension_semantics = [#tpu.dimension_semantics<parallel>, #tpu.dimension_semantics<parallel>, #tpu.dimension_semantics<parallel>, #tpu.dimension_semantics<arbitrary>], iteration_bounds = array<i64: 2, 2, 1, 1>, scalar_prefetch = 0 : i64, scratch_operands = 1 : i64, tpu.core_type = #tpu.core_type<tc>, window_params = [{transform_indices = @transform_0, window_bounds = array<i64: 1, 1, 16, 128>}, {transform_indices = @transform_1, window_bounds = array<i64: 1, 1, 16, 128>}, {transform_indices = @transform_2, window_bounds = array<i64: 1, 11, 16, 16>}, {transform_indices = @transform_3, window_bounds = array<i64: 1, 16, 1>}, {transform_indices = @transform_4, window_bounds = array<i64: 1, 1, 16, 128>}]} {
    %c0_i32 = arith.constant 0 : i32
    %0 = arith.cmpi eq, %arg3, %c0_i32 : i32
    %1 = arith.extui %0 : i1 to i32
    %c0_i32_0 = arith.constant 0 : i32
    %2 = arith.cmpi ne, %1, %c0_i32_0 : i32
    scf.if %2 {
      %cst_58 = arith.constant 0.000000e+00 : f32
      %68 = vector.broadcast %cst_58 : f32 to vector<16x128xf32>
      %c0_59 = arith.constant 0 : index
      %c0_60 = arith.constant 0 : index
      %69 = vector.load %arg9[%c0_59, %c0_60] : memref<16x128xf32, #tpu.memory_space<vmem>>, vector<16x128xf32>
      tpu.vector_store %arg9[%c0_59, %c0_60], %68 {strides = array<i32>} : memref<16x128xf32, #tpu.memory_space<vmem>>, vector<16x128xf32>,
    } else {
    }
    %c0 = arith.constant 0 : index
    %c0_1 = arith.constant 0 : index
    %c0_2 = arith.constant 0 : index
    %c0_3 = arith.constant 0 : index
    %3 = vector.load %arg4[%c0, %c0_1, %c0_2, %c0_3] : memref<1x1x16x128xbf16, #tpu.memory_space<vmem>>, vector<1x1x16x128xbf16>
    %4 = vector.shape_cast %3 : vector<1x1x16x128xbf16> to vector<16x128xbf16>
    %c0_4 = arith.constant 0 : index
    %c0_5 = arith.constant 0 : index
    %c0_6 = arith.constant 0 : index
    %c0_7 = arith.constant 0 : index
    %5 = vector.load %arg5[%c0_4, %c0_5, %c0_6, %c0_7] : memref<1x1x16x128xbf16, #tpu.memory_space<vmem>>, vector<1x1x16x128xbf16>
    %6 = vector.shape_cast %5 : vector<1x1x16x128xbf16> to vector<16x128xbf16>
    %7 = tpu.concatenate %4, %6 in 1 : vector<16x128xbf16>, vector<16x128xbf16> -> vector<16x256xbf16>
    %c0_8 = arith.constant 0 : index
    %c0_9 = arith.constant 0 : index
    %8 = vector.load %arg9[%c0_8, %c0_9] : memref<16x128xf32, #tpu.memory_space<vmem>>, vector<16x128xf32>
    %c0_10 = arith.constant 0 : index
    %c0_11 = arith.constant 0 : index
    %c0_12 = arith.constant 0 : index
    %c0_13 = arith.constant 0 : index
    %9 = vector.load %arg6[%c0_10, %c0_11, %c0_12, %c0_13] : memref<1x11x16x16xbf16, #tpu.memory_space<vmem>>, vector<1x1x16x16xbf16>
    %10 = vector.shape_cast %9 : vector<1x1x16x16xbf16> to vector<16x16xbf16>
    %11 = vector.extract_strided_slice %7 {offsets = [0, 0], sizes = [16, 128], strides = [1, 1]} : vector<16x256xbf16> to vector<16x128xbf16>
    %cst = arith.constant dense<0.000000e+00> : vector<16x128xf32>
    %12 = tpu.matmul %10, %11, %cst {dimension_numbers = #tpu.dot_dimension_numbers<[1], [0], [0], [1], [0, 0, 1, 1], [], []>} : vector<16x16xbf16>, vector<16x128xbf16>, vector<16x128xf32> -> vector<16x128xf32>
    %13 = arith.addf %8, %12 : vector<16x128xf32>
    %c0_14 = arith.constant 0 : index
    %c1 = arith.constant 1 : index
    %c0_15 = arith.constant 0 : index
    %c0_16 = arith.constant 0 : index
    %14 = vector.load %arg6[%c0_14, %c1, %c0_15, %c0_16] : memref<1x11x16x16xbf16, #tpu.memory_space<vmem>>, vector<1x1x16x16xbf16>
    %15 = vector.shape_cast %14 : vector<1x1x16x16xbf16> to vector<16x16xbf16>
    %16 = vector.extract_strided_slice %7 {offsets = [0, 1], sizes = [16, 128], strides = [1, 1]} : vector<16x256xbf16> to vector<16x128xbf16>
    %cst_17 = arith.constant dense<0.000000e+00> : vector<16x128xf32>
    %17 = tpu.matmul %15, %16, %cst_17 {dimension_numbers = #tpu.dot_dimension_numbers<[1], [0], [0], [1], [0, 0, 1, 1], [], []>} : vector<16x16xbf16>, vector<16x128xbf16>, vector<16x128xf32> -> vector<16x128xf32>
    %18 = arith.addf %13, %17 : vector<16x128xf32>
    %c0_18 = arith.constant 0 : index
    %c2 = arith.constant 2 : index
    %c0_19 = arith.constant 0 : index
    %c0_20 = arith.constant 0 : index
    %19 = vector.load %arg6[%c0_18, %c2, %c0_19, %c0_20] : memref<1x11x16x16xbf16, #tpu.memory_space<vmem>>, vector<1x1x16x16xbf16>
    %20 = vector.shape_cast %19 : vector<1x1x16x16xbf16> to vector<16x16xbf16>
    %21 = vector.extract_strided_slice %7 {offsets = [0, 2], sizes = [16, 128], strides = [1, 1]} : vector<16x256xbf16> to vector<16x128xbf16>
    %cst_21 = arith.constant dense<0.000000e+00> : vector<16x128xf32>
    %22 = tpu.matmul %20, %21, %cst_21 {dimension_numbers = #tpu.dot_dimension_numbers<[1], [0], [0], [1], [0, 0, 1, 1], [], []>} : vector<16x16xbf16>, vector<16x128xbf16>, vector<16x128xf32> -> vector<16x128xf32>
    %23 = arith.addf %18, %22 : vector<16x128xf32>
    %c0_22 = arith.constant 0 : index
    %c3 = arith.constant 3 : index
    %c0_23 = arith.constant 0 : index
    %c0_24 = arith.constant 0 : index
    %24 = vector.load %arg6[%c0_22, %c3, %c0_23, %c0_24] : memref<1x11x16x16xbf16, #tpu.memory_space<vmem>>, vector<1x1x16x16xbf16>
    %25 = vector.shape_cast %24 : vector<1x1x16x16xbf16> to vector<16x16xbf16>
    %26 = vector.extract_strided_slice %7 {offsets = [0, 3], sizes = [16, 128], strides = [1, 1]} : vector<16x256xbf16> to vector<16x128xbf16>
    %cst_25 = arith.constant dense<0.000000e+00> : vector<16x128xf32>
    %27 = tpu.matmul %25, %26, %cst_25 {dimension_numbers = #tpu.dot_dimension_numbers<[1], [0], [0], [1], [0, 0, 1, 1], [], []>} : vector<16x16xbf16>, vector<16x128xbf16>, vector<16x128xf32> -> vector<16x128xf32>
    %28 = arith.addf %23, %27 : vector<16x128xf32>
    %c0_26 = arith.constant 0 : index
    %c4 = arith.constant 4 : index
    %c0_27 = arith.constant 0 : index
    %c0_28 = arith.constant 0 : index
    %29 = vector.load %arg6[%c0_26, %c4, %c0_27, %c0_28] : memref<1x11x16x16xbf16, #tpu.memory_space<vmem>>, vector<1x1x16x16xbf16>
    %30 = vector.shape_cast %29 : vector<1x1x16x16xbf16> to vector<16x16xbf16>
    %31 = vector.extract_strided_slice %7 {offsets = [0, 4], sizes = [16, 128], strides = [1, 1]} : vector<16x256xbf16> to vector<16x128xbf16>
    %cst_29 = arith.constant dense<0.000000e+00> : vector<16x128xf32>
    %32 = tpu.matmul %30, %31, %cst_29 {dimension_numbers = #tpu.dot_dimension_numbers<[1], [0], [0], [1], [0, 0, 1, 1], [], []>} : vector<16x16xbf16>, vector<16x128xbf16>, vector<16x128xf32> -> vector<16x128xf32>
    %33 = arith.addf %28, %32 : vector<16x128xf32>
    %c0_30 = arith.constant 0 : index
    %c5 = arith.constant 5 : index
    %c0_31 = arith.constant 0 : index
    %c0_32 = arith.constant 0 : index
    %34 = vector.load %arg6[%c0_30, %c5, %c0_31, %c0_32] : memref<1x11x16x16xbf16, #tpu.memory_space<vmem>>, vector<1x1x16x16xbf16>
    %35 = vector.shape_cast %34 : vector<1x1x16x16xbf16> to vector<16x16xbf16>
    %36 = vector.extract_strided_slice %7 {offsets = [0, 5], sizes = [16, 128], strides = [1, 1]} : vector<16x256xbf16> to vector<16x128xbf16>
    %cst_33 = arith.constant dense<0.000000e+00> : vector<16x128xf32>
    %37 = tpu.matmul %35, %36, %cst_33 {dimension_numbers = #tpu.dot_dimension_numbers<[1], [0], [0], [1], [0, 0, 1, 1], [], []>} : vector<16x16xbf16>, vector<16x128xbf16>, vector<16x128xf32> -> vector<16x128xf32>
    %38 = arith.addf %33, %37 : vector<16x128xf32>
    %c0_34 = arith.constant 0 : index
    %c6 = arith.constant 6 : index
    %c0_35 = arith.constant 0 : index
    %c0_36 = arith.constant 0 : index
    %39 = vector.load %arg6[%c0_34, %c6, %c0_35, %c0_36] : memref<1x11x16x16xbf16, #tpu.memory_space<vmem>>, vector<1x1x16x16xbf16>
    %40 = vector.shape_cast %39 : vector<1x1x16x16xbf16> to vector<16x16xbf16>
    %41 = vector.extract_strided_slice %7 {offsets = [0, 6], sizes = [16, 128], strides = [1, 1]} : vector<16x256xbf16> to vector<16x128xbf16>
    %cst_37 = arith.constant dense<0.000000e+00> : vector<16x128xf32>
    %42 = tpu.matmul %40, %41, %cst_37 {dimension_numbers = #tpu.dot_dimension_numbers<[1], [0], [0], [1], [0, 0, 1, 1], [], []>} : vector<16x16xbf16>, vector<16x128xbf16>, vector<16x128xf32> -> vector<16x128xf32>
    %43 = arith.addf %38, %42 : vector<16x128xf32>
    %c0_38 = arith.constant 0 : index
    %c7 = arith.constant 7 : index
    %c0_39 = arith.constant 0 : index
    %c0_40 = arith.constant 0 : index
    %44 = vector.load %arg6[%c0_38, %c7, %c0_39, %c0_40] : memref<1x11x16x16xbf16, #tpu.memory_space<vmem>>, vector<1x1x16x16xbf16>
    %45 = vector.shape_cast %44 : vector<1x1x16x16xbf16> to vector<16x16xbf16>
    %46 = vector.extract_strided_slice %7 {offsets = [0, 7], sizes = [16, 128], strides = [1, 1]} : vector<16x256xbf16> to vector<16x128xbf16>
    %cst_41 = arith.constant dense<0.000000e+00> : vector<16x128xf32>
    %47 = tpu.matmul %45, %46, %cst_41 {dimension_numbers = #tpu.dot_dimension_numbers<[1], [0], [0], [1], [0, 0, 1, 1], [], []>} : vector<16x16xbf16>, vector<16x128xbf16>, vector<16x128xf32> -> vector<16x128xf32>
    %48 = arith.addf %43, %47 : vector<16x128xf32>
    %c0_42 = arith.constant 0 : index
    %c8 = arith.constant 8 : index
    %c0_43 = arith.constant 0 : index
    %c0_44 = arith.constant 0 : index
    %49 = vector.load %arg6[%c0_42, %c8, %c0_43, %c0_44] : memref<1x11x16x16xbf16, #tpu.memory_space<vmem>>, vector<1x1x16x16xbf16>
    %50 = vector.shape_cast %49 : vector<1x1x16x16xbf16> to vector<16x16xbf16>
    %51 = vector.extract_strided_slice %7 {offsets = [0, 8], sizes = [16, 128], strides = [1, 1]} : vector<16x256xbf16> to vector<16x128xbf16>
    %cst_45 = arith.constant dense<0.000000e+00> : vector<16x128xf32>
    %52 = tpu.matmul %50, %51, %cst_45 {dimension_numbers = #tpu.dot_dimension_numbers<[1], [0], [0], [1], [0, 0, 1, 1], [], []>} : vector<16x16xbf16>, vector<16x128xbf16>, vector<16x128xf32> -> vector<16x128xf32>
    %53 = arith.addf %48, %52 : vector<16x128xf32>
    %c0_46 = arith.constant 0 : index
    %c9 = arith.constant 9 : index
    %c0_47 = arith.constant 0 : index
    %c0_48 = arith.constant 0 : index
    %54 = vector.load %arg6[%c0_46, %c9, %c0_47, %c0_48] : memref<1x11x16x16xbf16, #tpu.memory_space<vmem>>, vector<1x1x16x16xbf16>
    %55 = vector.shape_cast %54 : vector<1x1x16x16xbf16> to vector<16x16xbf16>
    %56 = vector.extract_strided_slice %7 {offsets = [0, 9], sizes = [16, 128], strides = [1, 1]} : vector<16x256xbf16> to vector<16x128xbf16>
    %cst_49 = arith.constant dense<0.000000e+00> : vector<16x128xf32>
    %57 = tpu.matmul %55, %56, %cst_49 {dimension_numbers = #tpu.dot_dimension_numbers<[1], [0], [0], [1], [0, 0, 1, 1], [], []>} : vector<16x16xbf16>, vector<16x128xbf16>, vector<16x128xf32> -> vector<16x128xf32>
    %58 = arith.addf %53, %57 : vector<16x128xf32>
    %c0_50 = arith.constant 0 : index
    %c10 = arith.constant 10 : index
    %c0_51 = arith.constant 0 : index
    %c0_52 = arith.constant 0 : index
    %59 = vector.load %arg6[%c0_50, %c10, %c0_51, %c0_52] : memref<1x11x16x16xbf16, #tpu.memory_space<vmem>>, vector<1x1x16x16xbf16>
    %60 = vector.shape_cast %59 : vector<1x1x16x16xbf16> to vector<16x16xbf16>
    %61 = vector.extract_strided_slice %7 {offsets = [0, 10], sizes = [16, 128], strides = [1, 1]} : vector<16x256xbf16> to vector<16x128xbf16>
    %cst_53 = arith.constant dense<0.000000e+00> : vector<16x128xf32>
    %62 = tpu.matmul %60, %61, %cst_53 {dimension_numbers = #tpu.dot_dimension_numbers<[1], [0], [0], [1], [0, 0, 1, 1], [], []>} : vector<16x16xbf16>, vector<16x128xbf16>, vector<16x128xf32> -> vector<16x128xf32>
    %63 = arith.addf %58, %62 : vector<16x128xf32>
    %c0_54 = arith.constant 0 : index
    %c0_55 = arith.constant 0 : index
    %64 = vector.load %arg9[%c0_54, %c0_55] : memref<16x128xf32, #tpu.memory_space<vmem>>, vector<16x128xf32>
    tpu.vector_store %arg9[%c0_54, %c0_55], %63 {strides = array<i32>} : memref<16x128xf32, #tpu.memory_space<vmem>>, vector<16x128xf32>,
    %c0_i32_56 = arith.constant 0 : i32
    %65 = arith.cmpi eq, %arg3, %c0_i32_56 : i32
    %66 = arith.extui %65 : i1 to i32
    %c0_i32_57 = arith.constant 0 : i32
    %67 = arith.cmpi ne, %66, %c0_i32_57 : i32
    scf.if %67 {
      %c0_58 = arith.constant 0 : index
      %c0_59 = arith.constant 0 : index
      %68 = vector.load %arg9[%c0_58, %c0_59] : memref<16x128xf32, #tpu.memory_space<vmem>>, vector<16x128xf32>
      %c0_60 = arith.constant 0 : index
      %c0_61 = arith.constant 0 : index
      %c0_62 = arith.constant 0 : index
      %69 = vector.load %arg7[%c0_60, %c0_61, %c0_62] : memref<1x16x1xf32, #tpu.memory_space<vmem>>, vector<1x16x1xf32>
      %70 = vector.shape_cast %69 : vector<1x16x1xf32> to vector<16x1xf32>
      %71 = vector.broadcast %70 : vector<16x1xf32> to vector<16x128xf32>
      %72 = arith.addf %68, %71 : vector<16x128xf32>
      %cst_63 = arith.constant 0.000000e+00 : f32
      %73 = vector.broadcast %cst_63 : f32 to vector<16x128xf32>
      %74 = arith.cmpf oge, %72, %73 : vector<16x128xf32>
      %cst_64 = arith.constant 2.000000e-01 : f32
      %75 = vector.broadcast %cst_64 : f32 to vector<16x128xf32>
      %76 = arith.mulf %72, %75 : vector<16x128xf32>
      %77 = arith.select %74, %72, %76 : vector<16x128xi1>, vector<16x128xf32>
      %78 = arith.truncf %77 : vector<16x128xf32> to vector<16x128xbf16>
      %c0_65 = arith.constant 0 : index
      %c0_66 = arith.constant 0 : index
      %c0_67 = arith.constant 0 : index
      %c0_68 = arith.constant 0 : index
      %79 = vector.load %arg8[%c0_65, %c0_66, %c0_67, %c0_68] : memref<1x1x16x128xbf16, #tpu.memory_space<vmem>>, vector<1x1x16x128xbf16>
      %80 = vector.shape_cast %79 : vector<1x1x16x128xbf16> to vector<16x128xbf16>
      %81 = vector.shape_cast %78 : vector<16x128xbf16> to vector<1x1x16x128xbf16>
      tpu.vector_store %arg8[%c0_65, %c0_66, %c0_67, %c0_68], %81 {strides = array<i32>} : memref<1x1x16x128xbf16, #tpu.memory_space<vmem>>, vector<1x1x16x128xbf16>,
    } else {
    }
    return
  }
  func.func @transform_0(%arg0: i32, %arg1: i32, %arg2: i32, %arg3: i32) -> (i32, i32, i32, i32) {
    %c0_i32 = arith.constant 0 : i32
    return %arg0, %arg1, %arg3, %arg2 : i32, i32, i32, i32
  }
  func.func @transform_1(%arg0: i32, %arg1: i32, %arg2: i32, %arg3: i32) -> (i32, i32, i32, i32) {
    %c1_i32 = arith.constant 1 : i32
    %0 = arith.addi %arg2, %c1_i32 : i32
    %c1_i32_0 = arith.constant 1 : i32
    %1 = arith.muli %0, %c1_i32_0 : i32
    %c0_i32 = arith.constant 0 : i32
    return %arg0, %arg1, %arg3, %1 : i32, i32, i32, i32
  }
  func.func @transform_2(%arg0: i32, %arg1: i32, %arg2: i32, %arg3: i32) -> (i32, i32, i32, i32) {
    %c0_i32 = arith.constant 0 : i32
    %c0_i32_0 = arith.constant 0 : i32
    %c0_i32_1 = arith.constant 0 : i32
    return %arg1, %c0_i32, %c0_i32_0, %arg3 : i32, i32, i32, i32
  }
  func.func @transform_3(%arg0: i32, %arg1: i32, %arg2: i32, %arg3: i32) -> (i32, i32, i32) {
    %c0_i32 = arith.constant 0 : i32
    %c0_i32_0 = arith.constant 0 : i32
    %c0_i32_1 = arith.constant 0 : i32
    return %arg1, %c0_i32, %c0_i32_0 : i32, i32, i32
  }
  func.func @transform_4(%arg0: i32, %arg1: i32, %arg2: i32, %arg3: i32) -> (i32, i32, i32, i32) {
    %c0_i32 = arith.constant 0 : i32
    %c0_i32_0 = arith.constant 0 : i32
    return %arg0, %arg1, %c0_i32, %arg2 : i32, i32, i32, i32
  }
}

module attributes {stable_mosaic.version = 11 : i64} {
  func.func @_fused_conv_kernel(%arg0: i32, %arg1: i32, %arg2: i32, %arg3: i32, %arg4: memref<1x1x16x128xbf16, #tpu.memory_space<vmem>>, %arg5: memref<1x1x16x128xbf16, #tpu.memory_space<vmem>>, %arg6: memref<1x11x8x16xbf16, #tpu.memory_space<vmem>>, %arg7: memref<1x8x1xf32, #tpu.memory_space<vmem>>, %arg8: memref<1x1x8x128xbf16, #tpu.memory_space<vmem>>, %arg9: memref<8x128xf32, #tpu.memory_space<vmem>>) attributes {dimension_semantics = [#tpu.dimension_semantics<parallel>, #tpu.dimension_semantics<parallel>, #tpu.dimension_semantics<parallel>, #tpu.dimension_semantics<arbitrary>], iteration_bounds = array<i64: 2, 8, 1, 1>, scalar_prefetch = 0 : i64, scratch_operands = 1 : i64, tpu.core_type = #tpu.core_type<tc>, window_params = [{transform_indices = @transform_0, window_bounds = array<i64: 1, 1, 16, 128>}, {transform_indices = @transform_1, window_bounds = array<i64: 1, 1, 16, 128>}, {transform_indices = @transform_2, window_bounds = array<i64: 1, 11, 8, 16>}, {transform_indices = @transform_3, window_bounds = array<i64: 1, 8, 1>}, {transform_indices = @transform_4, window_bounds = array<i64: 1, 1, 8, 128>}]} {
    %c0_i32 = arith.constant 0 : i32
    %0 = arith.cmpi eq, %arg3, %c0_i32 : i32
    %1 = arith.extui %0 : i1 to i32
    %c0_i32_0 = arith.constant 0 : i32
    %2 = arith.cmpi ne, %1, %c0_i32_0 : i32
    scf.if %2 {
      %cst_58 = arith.constant 0.000000e+00 : f32
      %68 = vector.broadcast %cst_58 : f32 to vector<8x128xf32>
      %c0_59 = arith.constant 0 : index
      %c0_60 = arith.constant 0 : index
      %69 = vector.load %arg9[%c0_59, %c0_60] : memref<8x128xf32, #tpu.memory_space<vmem>>, vector<8x128xf32>
      tpu.vector_store %arg9[%c0_59, %c0_60], %68 {strides = array<i32>} : memref<8x128xf32, #tpu.memory_space<vmem>>, vector<8x128xf32>,
    } else {
    }
    %c0 = arith.constant 0 : index
    %c0_1 = arith.constant 0 : index
    %c0_2 = arith.constant 0 : index
    %c0_3 = arith.constant 0 : index
    %3 = vector.load %arg4[%c0, %c0_1, %c0_2, %c0_3] : memref<1x1x16x128xbf16, #tpu.memory_space<vmem>>, vector<1x1x16x128xbf16>
    %4 = vector.shape_cast %3 : vector<1x1x16x128xbf16> to vector<16x128xbf16>
    %c0_4 = arith.constant 0 : index
    %c0_5 = arith.constant 0 : index
    %c0_6 = arith.constant 0 : index
    %c0_7 = arith.constant 0 : index
    %5 = vector.load %arg5[%c0_4, %c0_5, %c0_6, %c0_7] : memref<1x1x16x128xbf16, #tpu.memory_space<vmem>>, vector<1x1x16x128xbf16>
    %6 = vector.shape_cast %5 : vector<1x1x16x128xbf16> to vector<16x128xbf16>
    %7 = tpu.concatenate %4, %6 in 1 : vector<16x128xbf16>, vector<16x128xbf16> -> vector<16x256xbf16>
    %c0_8 = arith.constant 0 : index
    %c0_9 = arith.constant 0 : index
    %8 = vector.load %arg9[%c0_8, %c0_9] : memref<8x128xf32, #tpu.memory_space<vmem>>, vector<8x128xf32>
    %c0_10 = arith.constant 0 : index
    %c0_11 = arith.constant 0 : index
    %c0_12 = arith.constant 0 : index
    %c0_13 = arith.constant 0 : index
    %9 = vector.load %arg6[%c0_10, %c0_11, %c0_12, %c0_13] : memref<1x11x8x16xbf16, #tpu.memory_space<vmem>>, vector<1x1x8x16xbf16>
    %10 = vector.shape_cast %9 : vector<1x1x8x16xbf16> to vector<8x16xbf16>
    %11 = vector.extract_strided_slice %7 {offsets = [0, 0], sizes = [16, 128], strides = [1, 1]} : vector<16x256xbf16> to vector<16x128xbf16>
    %cst = arith.constant dense<0.000000e+00> : vector<8x128xf32>
    %12 = tpu.matmul %10, %11, %cst {dimension_numbers = #tpu.dot_dimension_numbers<[1], [0], [0], [1], [0, 0, 1, 1], [], []>} : vector<8x16xbf16>, vector<16x128xbf16>, vector<8x128xf32> -> vector<8x128xf32>
    %13 = arith.addf %8, %12 : vector<8x128xf32>
    %c0_14 = arith.constant 0 : index
    %c1 = arith.constant 1 : index
    %c0_15 = arith.constant 0 : index
    %c0_16 = arith.constant 0 : index
    %14 = vector.load %arg6[%c0_14, %c1, %c0_15, %c0_16] : memref<1x11x8x16xbf16, #tpu.memory_space<vmem>>, vector<1x1x8x16xbf16>
    %15 = vector.shape_cast %14 : vector<1x1x8x16xbf16> to vector<8x16xbf16>
    %16 = vector.extract_strided_slice %7 {offsets = [0, 1], sizes = [16, 128], strides = [1, 1]} : vector<16x256xbf16> to vector<16x128xbf16>
    %cst_17 = arith.constant dense<0.000000e+00> : vector<8x128xf32>
    %17 = tpu.matmul %15, %16, %cst_17 {dimension_numbers = #tpu.dot_dimension_numbers<[1], [0], [0], [1], [0, 0, 1, 1], [], []>} : vector<8x16xbf16>, vector<16x128xbf16>, vector<8x128xf32> -> vector<8x128xf32>
    %18 = arith.addf %13, %17 : vector<8x128xf32>
    %c0_18 = arith.constant 0 : index
    %c2 = arith.constant 2 : index
    %c0_19 = arith.constant 0 : index
    %c0_20 = arith.constant 0 : index
    %19 = vector.load %arg6[%c0_18, %c2, %c0_19, %c0_20] : memref<1x11x8x16xbf16, #tpu.memory_space<vmem>>, vector<1x1x8x16xbf16>
    %20 = vector.shape_cast %19 : vector<1x1x8x16xbf16> to vector<8x16xbf16>
    %21 = vector.extract_strided_slice %7 {offsets = [0, 2], sizes = [16, 128], strides = [1, 1]} : vector<16x256xbf16> to vector<16x128xbf16>
    %cst_21 = arith.constant dense<0.000000e+00> : vector<8x128xf32>
    %22 = tpu.matmul %20, %21, %cst_21 {dimension_numbers = #tpu.dot_dimension_numbers<[1], [0], [0], [1], [0, 0, 1, 1], [], []>} : vector<8x16xbf16>, vector<16x128xbf16>, vector<8x128xf32> -> vector<8x128xf32>
    %23 = arith.addf %18, %22 : vector<8x128xf32>
    %c0_22 = arith.constant 0 : index
    %c3 = arith.constant 3 : index
    %c0_23 = arith.constant 0 : index
    %c0_24 = arith.constant 0 : index
    %24 = vector.load %arg6[%c0_22, %c3, %c0_23, %c0_24] : memref<1x11x8x16xbf16, #tpu.memory_space<vmem>>, vector<1x1x8x16xbf16>
    %25 = vector.shape_cast %24 : vector<1x1x8x16xbf16> to vector<8x16xbf16>
    %26 = vector.extract_strided_slice %7 {offsets = [0, 3], sizes = [16, 128], strides = [1, 1]} : vector<16x256xbf16> to vector<16x128xbf16>
    %cst_25 = arith.constant dense<0.000000e+00> : vector<8x128xf32>
    %27 = tpu.matmul %25, %26, %cst_25 {dimension_numbers = #tpu.dot_dimension_numbers<[1], [0], [0], [1], [0, 0, 1, 1], [], []>} : vector<8x16xbf16>, vector<16x128xbf16>, vector<8x128xf32> -> vector<8x128xf32>
    %28 = arith.addf %23, %27 : vector<8x128xf32>
    %c0_26 = arith.constant 0 : index
    %c4 = arith.constant 4 : index
    %c0_27 = arith.constant 0 : index
    %c0_28 = arith.constant 0 : index
    %29 = vector.load %arg6[%c0_26, %c4, %c0_27, %c0_28] : memref<1x11x8x16xbf16, #tpu.memory_space<vmem>>, vector<1x1x8x16xbf16>
    %30 = vector.shape_cast %29 : vector<1x1x8x16xbf16> to vector<8x16xbf16>
    %31 = vector.extract_strided_slice %7 {offsets = [0, 4], sizes = [16, 128], strides = [1, 1]} : vector<16x256xbf16> to vector<16x128xbf16>
    %cst_29 = arith.constant dense<0.000000e+00> : vector<8x128xf32>
    %32 = tpu.matmul %30, %31, %cst_29 {dimension_numbers = #tpu.dot_dimension_numbers<[1], [0], [0], [1], [0, 0, 1, 1], [], []>} : vector<8x16xbf16>, vector<16x128xbf16>, vector<8x128xf32> -> vector<8x128xf32>
    %33 = arith.addf %28, %32 : vector<8x128xf32>
    %c0_30 = arith.constant 0 : index
    %c5 = arith.constant 5 : index
    %c0_31 = arith.constant 0 : index
    %c0_32 = arith.constant 0 : index
    %34 = vector.load %arg6[%c0_30, %c5, %c0_31, %c0_32] : memref<1x11x8x16xbf16, #tpu.memory_space<vmem>>, vector<1x1x8x16xbf16>
    %35 = vector.shape_cast %34 : vector<1x1x8x16xbf16> to vector<8x16xbf16>
    %36 = vector.extract_strided_slice %7 {offsets = [0, 5], sizes = [16, 128], strides = [1, 1]} : vector<16x256xbf16> to vector<16x128xbf16>
    %cst_33 = arith.constant dense<0.000000e+00> : vector<8x128xf32>
    %37 = tpu.matmul %35, %36, %cst_33 {dimension_numbers = #tpu.dot_dimension_numbers<[1], [0], [0], [1], [0, 0, 1, 1], [], []>} : vector<8x16xbf16>, vector<16x128xbf16>, vector<8x128xf32> -> vector<8x128xf32>
    %38 = arith.addf %33, %37 : vector<8x128xf32>
    %c0_34 = arith.constant 0 : index
    %c6 = arith.constant 6 : index
    %c0_35 = arith.constant 0 : index
    %c0_36 = arith.constant 0 : index
    %39 = vector.load %arg6[%c0_34, %c6, %c0_35, %c0_36] : memref<1x11x8x16xbf16, #tpu.memory_space<vmem>>, vector<1x1x8x16xbf16>
    %40 = vector.shape_cast %39 : vector<1x1x8x16xbf16> to vector<8x16xbf16>
    %41 = vector.extract_strided_slice %7 {offsets = [0, 6], sizes = [16, 128], strides = [1, 1]} : vector<16x256xbf16> to vector<16x128xbf16>
    %cst_37 = arith.constant dense<0.000000e+00> : vector<8x128xf32>
    %42 = tpu.matmul %40, %41, %cst_37 {dimension_numbers = #tpu.dot_dimension_numbers<[1], [0], [0], [1], [0, 0, 1, 1], [], []>} : vector<8x16xbf16>, vector<16x128xbf16>, vector<8x128xf32> -> vector<8x128xf32>
    %43 = arith.addf %38, %42 : vector<8x128xf32>
    %c0_38 = arith.constant 0 : index
    %c7 = arith.constant 7 : index
    %c0_39 = arith.constant 0 : index
    %c0_40 = arith.constant 0 : index
    %44 = vector.load %arg6[%c0_38, %c7, %c0_39, %c0_40] : memref<1x11x8x16xbf16, #tpu.memory_space<vmem>>, vector<1x1x8x16xbf16>
    %45 = vector.shape_cast %44 : vector<1x1x8x16xbf16> to vector<8x16xbf16>
    %46 = vector.extract_strided_slice %7 {offsets = [0, 7], sizes = [16, 128], strides = [1, 1]} : vector<16x256xbf16> to vector<16x128xbf16>
    %cst_41 = arith.constant dense<0.000000e+00> : vector<8x128xf32>
    %47 = tpu.matmul %45, %46, %cst_41 {dimension_numbers = #tpu.dot_dimension_numbers<[1], [0], [0], [1], [0, 0, 1, 1], [], []>} : vector<8x16xbf16>, vector<16x128xbf16>, vector<8x128xf32> -> vector<8x128xf32>
    %48 = arith.addf %43, %47 : vector<8x128xf32>
    %c0_42 = arith.constant 0 : index
    %c8 = arith.constant 8 : index
    %c0_43 = arith.constant 0 : index
    %c0_44 = arith.constant 0 : index
    %49 = vector.load %arg6[%c0_42, %c8, %c0_43, %c0_44] : memref<1x11x8x16xbf16, #tpu.memory_space<vmem>>, vector<1x1x8x16xbf16>
    %50 = vector.shape_cast %49 : vector<1x1x8x16xbf16> to vector<8x16xbf16>
    %51 = vector.extract_strided_slice %7 {offsets = [0, 8], sizes = [16, 128], strides = [1, 1]} : vector<16x256xbf16> to vector<16x128xbf16>
    %cst_45 = arith.constant dense<0.000000e+00> : vector<8x128xf32>
    %52 = tpu.matmul %50, %51, %cst_45 {dimension_numbers = #tpu.dot_dimension_numbers<[1], [0], [0], [1], [0, 0, 1, 1], [], []>} : vector<8x16xbf16>, vector<16x128xbf16>, vector<8x128xf32> -> vector<8x128xf32>
    %53 = arith.addf %48, %52 : vector<8x128xf32>
    %c0_46 = arith.constant 0 : index
    %c9 = arith.constant 9 : index
    %c0_47 = arith.constant 0 : index
    %c0_48 = arith.constant 0 : index
    %54 = vector.load %arg6[%c0_46, %c9, %c0_47, %c0_48] : memref<1x11x8x16xbf16, #tpu.memory_space<vmem>>, vector<1x1x8x16xbf16>
    %55 = vector.shape_cast %54 : vector<1x1x8x16xbf16> to vector<8x16xbf16>
    %56 = vector.extract_strided_slice %7 {offsets = [0, 9], sizes = [16, 128], strides = [1, 1]} : vector<16x256xbf16> to vector<16x128xbf16>
    %cst_49 = arith.constant dense<0.000000e+00> : vector<8x128xf32>
    %57 = tpu.matmul %55, %56, %cst_49 {dimension_numbers = #tpu.dot_dimension_numbers<[1], [0], [0], [1], [0, 0, 1, 1], [], []>} : vector<8x16xbf16>, vector<16x128xbf16>, vector<8x128xf32> -> vector<8x128xf32>
    %58 = arith.addf %53, %57 : vector<8x128xf32>
    %c0_50 = arith.constant 0 : index
    %c10 = arith.constant 10 : index
    %c0_51 = arith.constant 0 : index
    %c0_52 = arith.constant 0 : index
    %59 = vector.load %arg6[%c0_50, %c10, %c0_51, %c0_52] : memref<1x11x8x16xbf16, #tpu.memory_space<vmem>>, vector<1x1x8x16xbf16>
    %60 = vector.shape_cast %59 : vector<1x1x8x16xbf16> to vector<8x16xbf16>
    %61 = vector.extract_strided_slice %7 {offsets = [0, 10], sizes = [16, 128], strides = [1, 1]} : vector<16x256xbf16> to vector<16x128xbf16>
    %cst_53 = arith.constant dense<0.000000e+00> : vector<8x128xf32>
    %62 = tpu.matmul %60, %61, %cst_53 {dimension_numbers = #tpu.dot_dimension_numbers<[1], [0], [0], [1], [0, 0, 1, 1], [], []>} : vector<8x16xbf16>, vector<16x128xbf16>, vector<8x128xf32> -> vector<8x128xf32>
    %63 = arith.addf %58, %62 : vector<8x128xf32>
    %c0_54 = arith.constant 0 : index
    %c0_55 = arith.constant 0 : index
    %64 = vector.load %arg9[%c0_54, %c0_55] : memref<8x128xf32, #tpu.memory_space<vmem>>, vector<8x128xf32>
    tpu.vector_store %arg9[%c0_54, %c0_55], %63 {strides = array<i32>} : memref<8x128xf32, #tpu.memory_space<vmem>>, vector<8x128xf32>,
    %c0_i32_56 = arith.constant 0 : i32
    %65 = arith.cmpi eq, %arg3, %c0_i32_56 : i32
    %66 = arith.extui %65 : i1 to i32
    %c0_i32_57 = arith.constant 0 : i32
    %67 = arith.cmpi ne, %66, %c0_i32_57 : i32
    scf.if %67 {
      %c0_58 = arith.constant 0 : index
      %c0_59 = arith.constant 0 : index
      %68 = vector.load %arg9[%c0_58, %c0_59] : memref<8x128xf32, #tpu.memory_space<vmem>>, vector<8x128xf32>
      %c0_60 = arith.constant 0 : index
      %c0_61 = arith.constant 0 : index
      %c0_62 = arith.constant 0 : index
      %69 = vector.load %arg7[%c0_60, %c0_61, %c0_62] : memref<1x8x1xf32, #tpu.memory_space<vmem>>, vector<1x8x1xf32>
      %70 = vector.shape_cast %69 : vector<1x8x1xf32> to vector<8x1xf32>
      %71 = vector.broadcast %70 : vector<8x1xf32> to vector<8x128xf32>
      %72 = arith.addf %68, %71 : vector<8x128xf32>
      %cst_63 = arith.constant 0.000000e+00 : f32
      %73 = vector.broadcast %cst_63 : f32 to vector<8x128xf32>
      %74 = arith.cmpf oge, %72, %73 : vector<8x128xf32>
      %cst_64 = arith.constant 2.000000e-01 : f32
      %75 = vector.broadcast %cst_64 : f32 to vector<8x128xf32>
      %76 = arith.mulf %72, %75 : vector<8x128xf32>
      %77 = arith.select %74, %72, %76 : vector<8x128xi1>, vector<8x128xf32>
      %78 = arith.truncf %77 : vector<8x128xf32> to vector<8x128xbf16>
      %c0_65 = arith.constant 0 : index
      %c0_66 = arith.constant 0 : index
      %c0_67 = arith.constant 0 : index
      %c0_68 = arith.constant 0 : index
      %79 = vector.load %arg8[%c0_65, %c0_66, %c0_67, %c0_68] : memref<1x1x8x128xbf16, #tpu.memory_space<vmem>>, vector<1x1x8x128xbf16>
      %80 = vector.shape_cast %79 : vector<1x1x8x128xbf16> to vector<8x128xbf16>
      %81 = vector.shape_cast %78 : vector<8x128xbf16> to vector<1x1x8x128xbf16>
      tpu.vector_store %arg8[%c0_65, %c0_66, %c0_67, %c0_68], %81 {strides = array<i32>} : memref<1x1x8x128xbf16, #tpu.memory_space<vmem>>, vector<1x1x8x128xbf16>,
    } else {
    }
    return
  }
  func.func @transform_0(%arg0: i32, %arg1: i32, %arg2: i32, %arg3: i32) -> (i32, i32, i32, i32) {
    %c0_i32 = arith.constant 0 : i32
    return %arg0, %arg1, %arg3, %arg2 : i32, i32, i32, i32
  }
  func.func @transform_1(%arg0: i32, %arg1: i32, %arg2: i32, %arg3: i32) -> (i32, i32, i32, i32) {
    %c1_i32 = arith.constant 1 : i32
    %0 = arith.addi %arg2, %c1_i32 : i32
    %c1_i32_0 = arith.constant 1 : i32
    %1 = arith.muli %0, %c1_i32_0 : i32
    %c0_i32 = arith.constant 0 : i32
    return %arg0, %arg1, %arg3, %1 : i32, i32, i32, i32
  }
  func.func @transform_2(%arg0: i32, %arg1: i32, %arg2: i32, %arg3: i32) -> (i32, i32, i32, i32) {
    %c0_i32 = arith.constant 0 : i32
    %c0_i32_0 = arith.constant 0 : i32
    %c0_i32_1 = arith.constant 0 : i32
    return %arg1, %c0_i32, %c0_i32_0, %arg3 : i32, i32, i32, i32
  }
  func.func @transform_3(%arg0: i32, %arg1: i32, %arg2: i32, %arg3: i32) -> (i32, i32, i32) {
    %c0_i32 = arith.constant 0 : i32
    %c0_i32_0 = arith.constant 0 : i32
    %c0_i32_1 = arith.constant 0 : i32
    return %arg1, %c0_i32, %c0_i32_0 : i32, i32, i32
  }
  func.func @transform_4(%arg0: i32, %arg1: i32, %arg2: i32, %arg3: i32) -> (i32, i32, i32, i32) {
    %c0_i32 = arith.constant 0 : i32
    %c0_i32_0 = arith.constant 0 : i32
    return %arg0, %arg1, %c0_i32, %arg2 : i32, i32, i32, i32
  }
}

module attributes {stable_mosaic.version = 11 : i64} {
  func.func @_fused_conv_kernel(%arg0: i32, %arg1: i32, %arg2: i32, %arg3: i32, %arg4: memref<1x1x64x128xbf16, #tpu.memory_space<vmem>>, %arg5: memref<1x1x64x128xbf16, #tpu.memory_space<vmem>>, %arg6: memref<1x5x64x64xbf16, #tpu.memory_space<vmem>>, %arg7: memref<1x64x1xf32, #tpu.memory_space<vmem>>, %arg8: memref<1x1x64x128xbf16, #tpu.memory_space<vmem>>, %arg9: memref<64x128xf32, #tpu.memory_space<vmem>>) attributes {dimension_semantics = [#tpu.dimension_semantics<parallel>, #tpu.dimension_semantics<parallel>, #tpu.dimension_semantics<parallel>, #tpu.dimension_semantics<arbitrary>], iteration_bounds = array<i64: 2, 1, 1, 1>, scalar_prefetch = 0 : i64, scratch_operands = 1 : i64, tpu.core_type = #tpu.core_type<tc>, window_params = [{transform_indices = @transform_0, window_bounds = array<i64: 1, 1, 64, 128>}, {transform_indices = @transform_1, window_bounds = array<i64: 1, 1, 64, 128>}, {transform_indices = @transform_2, window_bounds = array<i64: 1, 5, 64, 64>}, {transform_indices = @transform_3, window_bounds = array<i64: 1, 64, 1>}, {transform_indices = @transform_4, window_bounds = array<i64: 1, 1, 64, 128>}]} {
    %c0_i32 = arith.constant 0 : i32
    %0 = arith.cmpi eq, %arg3, %c0_i32 : i32
    %1 = arith.extui %0 : i1 to i32
    %c0_i32_0 = arith.constant 0 : i32
    %2 = arith.cmpi ne, %1, %c0_i32_0 : i32
    scf.if %2 {
      %cst_34 = arith.constant 0.000000e+00 : f32
      %38 = vector.broadcast %cst_34 : f32 to vector<64x128xf32>
      %c0_35 = arith.constant 0 : index
      %c0_36 = arith.constant 0 : index
      %39 = vector.load %arg9[%c0_35, %c0_36] : memref<64x128xf32, #tpu.memory_space<vmem>>, vector<64x128xf32>
      tpu.vector_store %arg9[%c0_35, %c0_36], %38 {strides = array<i32>} : memref<64x128xf32, #tpu.memory_space<vmem>>, vector<64x128xf32>,
    } else {
    }
    %c0 = arith.constant 0 : index
    %c0_1 = arith.constant 0 : index
    %c0_2 = arith.constant 0 : index
    %c0_3 = arith.constant 0 : index
    %3 = vector.load %arg4[%c0, %c0_1, %c0_2, %c0_3] : memref<1x1x64x128xbf16, #tpu.memory_space<vmem>>, vector<1x1x64x128xbf16>
    %4 = vector.shape_cast %3 : vector<1x1x64x128xbf16> to vector<64x128xbf16>
    %c0_4 = arith.constant 0 : index
    %c0_5 = arith.constant 0 : index
    %c0_6 = arith.constant 0 : index
    %c0_7 = arith.constant 0 : index
    %5 = vector.load %arg5[%c0_4, %c0_5, %c0_6, %c0_7] : memref<1x1x64x128xbf16, #tpu.memory_space<vmem>>, vector<1x1x64x128xbf16>
    %6 = vector.shape_cast %5 : vector<1x1x64x128xbf16> to vector<64x128xbf16>
    %7 = tpu.concatenate %4, %6 in 1 : vector<64x128xbf16>, vector<64x128xbf16> -> vector<64x256xbf16>
    %c0_8 = arith.constant 0 : index
    %c0_9 = arith.constant 0 : index
    %8 = vector.load %arg9[%c0_8, %c0_9] : memref<64x128xf32, #tpu.memory_space<vmem>>, vector<64x128xf32>
    %c0_10 = arith.constant 0 : index
    %c0_11 = arith.constant 0 : index
    %c0_12 = arith.constant 0 : index
    %c0_13 = arith.constant 0 : index
    %9 = vector.load %arg6[%c0_10, %c0_11, %c0_12, %c0_13] : memref<1x5x64x64xbf16, #tpu.memory_space<vmem>>, vector<1x1x64x64xbf16>
    %10 = vector.shape_cast %9 : vector<1x1x64x64xbf16> to vector<64x64xbf16>
    %11 = vector.extract_strided_slice %7 {offsets = [0, 0], sizes = [64, 128], strides = [1, 1]} : vector<64x256xbf16> to vector<64x128xbf16>
    %cst = arith.constant dense<0.000000e+00> : vector<64x128xf32>
    %12 = tpu.matmul %10, %11, %cst {dimension_numbers = #tpu.dot_dimension_numbers<[1], [0], [0], [1], [0, 0, 1, 1], [], []>} : vector<64x64xbf16>, vector<64x128xbf16>, vector<64x128xf32> -> vector<64x128xf32>
    %13 = arith.addf %8, %12 : vector<64x128xf32>
    %c0_14 = arith.constant 0 : index
    %c1 = arith.constant 1 : index
    %c0_15 = arith.constant 0 : index
    %c0_16 = arith.constant 0 : index
    %14 = vector.load %arg6[%c0_14, %c1, %c0_15, %c0_16] : memref<1x5x64x64xbf16, #tpu.memory_space<vmem>>, vector<1x1x64x64xbf16>
    %15 = vector.shape_cast %14 : vector<1x1x64x64xbf16> to vector<64x64xbf16>
    %16 = vector.extract_strided_slice %7 {offsets = [0, 1], sizes = [64, 128], strides = [1, 1]} : vector<64x256xbf16> to vector<64x128xbf16>
    %cst_17 = arith.constant dense<0.000000e+00> : vector<64x128xf32>
    %17 = tpu.matmul %15, %16, %cst_17 {dimension_numbers = #tpu.dot_dimension_numbers<[1], [0], [0], [1], [0, 0, 1, 1], [], []>} : vector<64x64xbf16>, vector<64x128xbf16>, vector<64x128xf32> -> vector<64x128xf32>
    %18 = arith.addf %13, %17 : vector<64x128xf32>
    %c0_18 = arith.constant 0 : index
    %c2 = arith.constant 2 : index
    %c0_19 = arith.constant 0 : index
    %c0_20 = arith.constant 0 : index
    %19 = vector.load %arg6[%c0_18, %c2, %c0_19, %c0_20] : memref<1x5x64x64xbf16, #tpu.memory_space<vmem>>, vector<1x1x64x64xbf16>
    %20 = vector.shape_cast %19 : vector<1x1x64x64xbf16> to vector<64x64xbf16>
    %21 = vector.extract_strided_slice %7 {offsets = [0, 2], sizes = [64, 128], strides = [1, 1]} : vector<64x256xbf16> to vector<64x128xbf16>
    %cst_21 = arith.constant dense<0.000000e+00> : vector<64x128xf32>
    %22 = tpu.matmul %20, %21, %cst_21 {dimension_numbers = #tpu.dot_dimension_numbers<[1], [0], [0], [1], [0, 0, 1, 1], [], []>} : vector<64x64xbf16>, vector<64x128xbf16>, vector<64x128xf32> -> vector<64x128xf32>
    %23 = arith.addf %18, %22 : vector<64x128xf32>
    %c0_22 = arith.constant 0 : index
    %c3 = arith.constant 3 : index
    %c0_23 = arith.constant 0 : index
    %c0_24 = arith.constant 0 : index
    %24 = vector.load %arg6[%c0_22, %c3, %c0_23, %c0_24] : memref<1x5x64x64xbf16, #tpu.memory_space<vmem>>, vector<1x1x64x64xbf16>
    %25 = vector.shape_cast %24 : vector<1x1x64x64xbf16> to vector<64x64xbf16>
    %26 = vector.extract_strided_slice %7 {offsets = [0, 3], sizes = [64, 128], strides = [1, 1]} : vector<64x256xbf16> to vector<64x128xbf16>
    %cst_25 = arith.constant dense<0.000000e+00> : vector<64x128xf32>
    %27 = tpu.matmul %25, %26, %cst_25 {dimension_numbers = #tpu.dot_dimension_numbers<[1], [0], [0], [1], [0, 0, 1, 1], [], []>} : vector<64x64xbf16>, vector<64x128xbf16>, vector<64x128xf32> -> vector<64x128xf32>
    %28 = arith.addf %23, %27 : vector<64x128xf32>
    %c0_26 = arith.constant 0 : index
    %c4 = arith.constant 4 : index
    %c0_27 = arith.constant 0 : index
    %c0_28 = arith.constant 0 : index
    %29 = vector.load %arg6[%c0_26, %c4, %c0_27, %c0_28] : memref<1x5x64x64xbf16, #tpu.memory_space<vmem>>, vector<1x1x64x64xbf16>
    %30 = vector.shape_cast %29 : vector<1x1x64x64xbf16> to vector<64x64xbf16>
    %31 = vector.extract_strided_slice %7 {offsets = [0, 4], sizes = [64, 128], strides = [1, 1]} : vector<64x256xbf16> to vector<64x128xbf16>
    %cst_29 = arith.constant dense<0.000000e+00> : vector<64x128xf32>
    %32 = tpu.matmul %30, %31, %cst_29 {dimension_numbers = #tpu.dot_dimension_numbers<[1], [0], [0], [1], [0, 0, 1, 1], [], []>} : vector<64x64xbf16>, vector<64x128xbf16>, vector<64x128xf32> -> vector<64x128xf32>
    %33 = arith.addf %28, %32 : vector<64x128xf32>
    %c0_30 = arith.constant 0 : index
    %c0_31 = arith.constant 0 : index
    %34 = vector.load %arg9[%c0_30, %c0_31] : memref<64x128xf32, #tpu.memory_space<vmem>>, vector<64x128xf32>
    tpu.vector_store %arg9[%c0_30, %c0_31], %33 {strides = array<i32>} : memref<64x128xf32, #tpu.memory_space<vmem>>, vector<64x128xf32>,
    %c0_i32_32 = arith.constant 0 : i32
    %35 = arith.cmpi eq, %arg3, %c0_i32_32 : i32
    %36 = arith.extui %35 : i1 to i32
    %c0_i32_33 = arith.constant 0 : i32
    %37 = arith.cmpi ne, %36, %c0_i32_33 : i32
    scf.if %37 {
      %c0_34 = arith.constant 0 : index
      %c0_35 = arith.constant 0 : index
      %38 = vector.load %arg9[%c0_34, %c0_35] : memref<64x128xf32, #tpu.memory_space<vmem>>, vector<64x128xf32>
      %c0_36 = arith.constant 0 : index
      %c0_37 = arith.constant 0 : index
      %c0_38 = arith.constant 0 : index
      %39 = vector.load %arg7[%c0_36, %c0_37, %c0_38] : memref<1x64x1xf32, #tpu.memory_space<vmem>>, vector<1x64x1xf32>
      %40 = vector.shape_cast %39 : vector<1x64x1xf32> to vector<64x1xf32>
      %41 = vector.broadcast %40 : vector<64x1xf32> to vector<64x128xf32>
      %42 = arith.addf %38, %41 : vector<64x128xf32>
      %cst_39 = arith.constant 0.000000e+00 : f32
      %43 = vector.broadcast %cst_39 : f32 to vector<64x128xf32>
      %44 = arith.cmpf oge, %42, %43 : vector<64x128xf32>
      %cst_40 = arith.constant 2.000000e-01 : f32
      %45 = vector.broadcast %cst_40 : f32 to vector<64x128xf32>
      %46 = arith.mulf %42, %45 : vector<64x128xf32>
      %47 = arith.select %44, %42, %46 : vector<64x128xi1>, vector<64x128xf32>
      %48 = arith.truncf %47 : vector<64x128xf32> to vector<64x128xbf16>
      %c0_41 = arith.constant 0 : index
      %c0_42 = arith.constant 0 : index
      %c0_43 = arith.constant 0 : index
      %c0_44 = arith.constant 0 : index
      %49 = vector.load %arg8[%c0_41, %c0_42, %c0_43, %c0_44] : memref<1x1x64x128xbf16, #tpu.memory_space<vmem>>, vector<1x1x64x128xbf16>
      %50 = vector.shape_cast %49 : vector<1x1x64x128xbf16> to vector<64x128xbf16>
      %51 = vector.shape_cast %48 : vector<64x128xbf16> to vector<1x1x64x128xbf16>
      tpu.vector_store %arg8[%c0_41, %c0_42, %c0_43, %c0_44], %51 {strides = array<i32>} : memref<1x1x64x128xbf16, #tpu.memory_space<vmem>>, vector<1x1x64x128xbf16>,
    } else {
    }
    return
  }
  func.func @transform_0(%arg0: i32, %arg1: i32, %arg2: i32, %arg3: i32) -> (i32, i32, i32, i32) {
    %c0_i32 = arith.constant 0 : i32
    return %arg0, %arg1, %arg3, %arg2 : i32, i32, i32, i32
  }
  func.func @transform_1(%arg0: i32, %arg1: i32, %arg2: i32, %arg3: i32) -> (i32, i32, i32, i32) {
    %c1_i32 = arith.constant 1 : i32
    %0 = arith.addi %arg2, %c1_i32 : i32
    %c1_i32_0 = arith.constant 1 : i32
    %1 = arith.muli %0, %c1_i32_0 : i32
    %c0_i32 = arith.constant 0 : i32
    return %arg0, %arg1, %arg3, %1 : i32, i32, i32, i32
  }
  func.func @transform_2(%arg0: i32, %arg1: i32, %arg2: i32, %arg3: i32) -> (i32, i32, i32, i32) {
    %c0_i32 = arith.constant 0 : i32
    %c0_i32_0 = arith.constant 0 : i32
    %c0_i32_1 = arith.constant 0 : i32
    return %arg1, %c0_i32, %c0_i32_0, %arg3 : i32, i32, i32, i32
  }
  func.func @transform_3(%arg0: i32, %arg1: i32, %arg2: i32, %arg3: i32) -> (i32, i32, i32) {
    %c0_i32 = arith.constant 0 : i32
    %c0_i32_0 = arith.constant 0 : i32
    %c0_i32_1 = arith.constant 0 : i32
    return %arg1, %c0_i32, %c0_i32_0 : i32, i32, i32
  }
  func.func @transform_4(%arg0: i32, %arg1: i32, %arg2: i32, %arg3: i32) -> (i32, i32, i32, i32) {
    %c0_i32 = arith.constant 0 : i32
    %c0_i32_0 = arith.constant 0 : i32
    return %arg0, %arg1, %c0_i32, %arg2 : i32, i32, i32, i32
  }
}

module attributes {stable_mosaic.version = 11 : i64} {
  func.func @_fused_conv_kernel(%arg0: i32, %arg1: i32, %arg2: i32, %arg3: i32, %arg4: memref<1x1x64x128xbf16, #tpu.memory_space<vmem>>, %arg5: memref<1x1x64x128xbf16, #tpu.memory_space<vmem>>, %arg6: memref<1x3x8x64xbf16, #tpu.memory_space<vmem>>, %arg7: memref<1x8x1xf32, #tpu.memory_space<vmem>>, %arg8: memref<1x1x8x128xbf16, #tpu.memory_space<vmem>>, %arg9: memref<8x128xf32, #tpu.memory_space<vmem>>) attributes {dimension_semantics = [#tpu.dimension_semantics<parallel>, #tpu.dimension_semantics<parallel>, #tpu.dimension_semantics<parallel>, #tpu.dimension_semantics<arbitrary>], iteration_bounds = array<i64: 2, 1, 1, 1>, scalar_prefetch = 0 : i64, scratch_operands = 1 : i64, tpu.core_type = #tpu.core_type<tc>, window_params = [{transform_indices = @transform_0, window_bounds = array<i64: 1, 1, 64, 128>}, {transform_indices = @transform_1, window_bounds = array<i64: 1, 1, 64, 128>}, {transform_indices = @transform_2, window_bounds = array<i64: 1, 3, 8, 64>}, {transform_indices = @transform_3, window_bounds = array<i64: 1, 8, 1>}, {transform_indices = @transform_4, window_bounds = array<i64: 1, 1, 8, 128>}]} {
    %c0_i32 = arith.constant 0 : i32
    %0 = arith.cmpi eq, %arg3, %c0_i32 : i32
    %1 = arith.extui %0 : i1 to i32
    %c0_i32_0 = arith.constant 0 : i32
    %2 = arith.cmpi ne, %1, %c0_i32_0 : i32
    scf.if %2 {
      %cst_26 = arith.constant 0.000000e+00 : f32
      %28 = vector.broadcast %cst_26 : f32 to vector<8x128xf32>
      %c0_27 = arith.constant 0 : index
      %c0_28 = arith.constant 0 : index
      %29 = vector.load %arg9[%c0_27, %c0_28] : memref<8x128xf32, #tpu.memory_space<vmem>>, vector<8x128xf32>
      tpu.vector_store %arg9[%c0_27, %c0_28], %28 {strides = array<i32>} : memref<8x128xf32, #tpu.memory_space<vmem>>, vector<8x128xf32>,
    } else {
    }
    %c0 = arith.constant 0 : index
    %c0_1 = arith.constant 0 : index
    %c0_2 = arith.constant 0 : index
    %c0_3 = arith.constant 0 : index
    %3 = vector.load %arg4[%c0, %c0_1, %c0_2, %c0_3] : memref<1x1x64x128xbf16, #tpu.memory_space<vmem>>, vector<1x1x64x128xbf16>
    %4 = vector.shape_cast %3 : vector<1x1x64x128xbf16> to vector<64x128xbf16>
    %c0_4 = arith.constant 0 : index
    %c0_5 = arith.constant 0 : index
    %c0_6 = arith.constant 0 : index
    %c0_7 = arith.constant 0 : index
    %5 = vector.load %arg5[%c0_4, %c0_5, %c0_6, %c0_7] : memref<1x1x64x128xbf16, #tpu.memory_space<vmem>>, vector<1x1x64x128xbf16>
    %6 = vector.shape_cast %5 : vector<1x1x64x128xbf16> to vector<64x128xbf16>
    %7 = tpu.concatenate %4, %6 in 1 : vector<64x128xbf16>, vector<64x128xbf16> -> vector<64x256xbf16>
    %c0_8 = arith.constant 0 : index
    %c0_9 = arith.constant 0 : index
    %8 = vector.load %arg9[%c0_8, %c0_9] : memref<8x128xf32, #tpu.memory_space<vmem>>, vector<8x128xf32>
    %c0_10 = arith.constant 0 : index
    %c0_11 = arith.constant 0 : index
    %c0_12 = arith.constant 0 : index
    %c0_13 = arith.constant 0 : index
    %9 = vector.load %arg6[%c0_10, %c0_11, %c0_12, %c0_13] : memref<1x3x8x64xbf16, #tpu.memory_space<vmem>>, vector<1x1x8x64xbf16>
    %10 = vector.shape_cast %9 : vector<1x1x8x64xbf16> to vector<8x64xbf16>
    %11 = vector.extract_strided_slice %7 {offsets = [0, 0], sizes = [64, 128], strides = [1, 1]} : vector<64x256xbf16> to vector<64x128xbf16>
    %cst = arith.constant dense<0.000000e+00> : vector<8x128xf32>
    %12 = tpu.matmul %10, %11, %cst {dimension_numbers = #tpu.dot_dimension_numbers<[1], [0], [0], [1], [0, 0, 1, 1], [], []>} : vector<8x64xbf16>, vector<64x128xbf16>, vector<8x128xf32> -> vector<8x128xf32>
    %13 = arith.addf %8, %12 : vector<8x128xf32>
    %c0_14 = arith.constant 0 : index
    %c1 = arith.constant 1 : index
    %c0_15 = arith.constant 0 : index
    %c0_16 = arith.constant 0 : index
    %14 = vector.load %arg6[%c0_14, %c1, %c0_15, %c0_16] : memref<1x3x8x64xbf16, #tpu.memory_space<vmem>>, vector<1x1x8x64xbf16>
    %15 = vector.shape_cast %14 : vector<1x1x8x64xbf16> to vector<8x64xbf16>
    %16 = vector.extract_strided_slice %7 {offsets = [0, 1], sizes = [64, 128], strides = [1, 1]} : vector<64x256xbf16> to vector<64x128xbf16>
    %cst_17 = arith.constant dense<0.000000e+00> : vector<8x128xf32>
    %17 = tpu.matmul %15, %16, %cst_17 {dimension_numbers = #tpu.dot_dimension_numbers<[1], [0], [0], [1], [0, 0, 1, 1], [], []>} : vector<8x64xbf16>, vector<64x128xbf16>, vector<8x128xf32> -> vector<8x128xf32>
    %18 = arith.addf %13, %17 : vector<8x128xf32>
    %c0_18 = arith.constant 0 : index
    %c2 = arith.constant 2 : index
    %c0_19 = arith.constant 0 : index
    %c0_20 = arith.constant 0 : index
    %19 = vector.load %arg6[%c0_18, %c2, %c0_19, %c0_20] : memref<1x3x8x64xbf16, #tpu.memory_space<vmem>>, vector<1x1x8x64xbf16>
    %20 = vector.shape_cast %19 : vector<1x1x8x64xbf16> to vector<8x64xbf16>
    %21 = vector.extract_strided_slice %7 {offsets = [0, 2], sizes = [64, 128], strides = [1, 1]} : vector<64x256xbf16> to vector<64x128xbf16>
    %cst_21 = arith.constant dense<0.000000e+00> : vector<8x128xf32>
    %22 = tpu.matmul %20, %21, %cst_21 {dimension_numbers = #tpu.dot_dimension_numbers<[1], [0], [0], [1], [0, 0, 1, 1], [], []>} : vector<8x64xbf16>, vector<64x128xbf16>, vector<8x128xf32> -> vector<8x128xf32>
    %23 = arith.addf %18, %22 : vector<8x128xf32>
    %c0_22 = arith.constant 0 : index
    %c0_23 = arith.constant 0 : index
    %24 = vector.load %arg9[%c0_22, %c0_23] : memref<8x128xf32, #tpu.memory_space<vmem>>, vector<8x128xf32>
    tpu.vector_store %arg9[%c0_22, %c0_23], %23 {strides = array<i32>} : memref<8x128xf32, #tpu.memory_space<vmem>>, vector<8x128xf32>,
    %c0_i32_24 = arith.constant 0 : i32
    %25 = arith.cmpi eq, %arg3, %c0_i32_24 : i32
    %26 = arith.extui %25 : i1 to i32
    %c0_i32_25 = arith.constant 0 : i32
    %27 = arith.cmpi ne, %26, %c0_i32_25 : i32
    scf.if %27 {
      %c0_26 = arith.constant 0 : index
      %c0_27 = arith.constant 0 : index
      %28 = vector.load %arg9[%c0_26, %c0_27] : memref<8x128xf32, #tpu.memory_space<vmem>>, vector<8x128xf32>
      %c0_28 = arith.constant 0 : index
      %c0_29 = arith.constant 0 : index
      %c0_30 = arith.constant 0 : index
      %29 = vector.load %arg7[%c0_28, %c0_29, %c0_30] : memref<1x8x1xf32, #tpu.memory_space<vmem>>, vector<1x8x1xf32>
      %30 = vector.shape_cast %29 : vector<1x8x1xf32> to vector<8x1xf32>
      %31 = vector.broadcast %30 : vector<8x1xf32> to vector<8x128xf32>
      %32 = arith.addf %28, %31 : vector<8x128xf32>
      %33 = arith.truncf %32 : vector<8x128xf32> to vector<8x128xbf16>
      %c0_31 = arith.constant 0 : index
      %c0_32 = arith.constant 0 : index
      %c0_33 = arith.constant 0 : index
      %c0_34 = arith.constant 0 : index
      %34 = vector.load %arg8[%c0_31, %c0_32, %c0_33, %c0_34] : memref<1x1x8x128xbf16, #tpu.memory_space<vmem>>, vector<1x1x8x128xbf16>
      %35 = vector.shape_cast %34 : vector<1x1x8x128xbf16> to vector<8x128xbf16>
      %36 = vector.shape_cast %33 : vector<8x128xbf16> to vector<1x1x8x128xbf16>
      tpu.vector_store %arg8[%c0_31, %c0_32, %c0_33, %c0_34], %36 {strides = array<i32>} : memref<1x1x8x128xbf16, #tpu.memory_space<vmem>>, vector<1x1x8x128xbf16>,
    } else {
    }
    return
  }
  func.func @transform_0(%arg0: i32, %arg1: i32, %arg2: i32, %arg3: i32) -> (i32, i32, i32, i32) {
    %c0_i32 = arith.constant 0 : i32
    return %arg0, %arg1, %arg3, %arg2 : i32, i32, i32, i32
  }
  func.func @transform_1(%arg0: i32, %arg1: i32, %arg2: i32, %arg3: i32) -> (i32, i32, i32, i32) {
    %c1_i32 = arith.constant 1 : i32
    %0 = arith.addi %arg2, %c1_i32 : i32
    %c1_i32_0 = arith.constant 1 : i32
    %1 = arith.muli %0, %c1_i32_0 : i32
    %c0_i32 = arith.constant 0 : i32
    return %arg0, %arg1, %arg3, %1 : i32, i32, i32, i32
  }
  func.func @transform_2(%arg0: i32, %arg1: i32, %arg2: i32, %arg3: i32) -> (i32, i32, i32, i32) {
    %c0_i32 = arith.constant 0 : i32
    %c0_i32_0 = arith.constant 0 : i32
    %c0_i32_1 = arith.constant 0 : i32
    return %arg1, %c0_i32, %c0_i32_0, %arg3 : i32, i32, i32, i32
  }
  func.func @transform_3(%arg0: i32, %arg1: i32, %arg2: i32, %arg3: i32) -> (i32, i32, i32) {
    %c0_i32 = arith.constant 0 : i32
    %c0_i32_0 = arith.constant 0 : i32
    %c0_i32_1 = arith.constant 0 : i32
    return %arg1, %c0_i32, %c0_i32_0 : i32, i32, i32
  }
  func.func @transform_4(%arg0: i32, %arg1: i32, %arg2: i32, %arg3: i32) -> (i32, i32, i32, i32) {
    %c0_i32 = arith.constant 0 : i32
    %c0_i32_0 = arith.constant 0 : i32
    return %arg0, %arg1, %c0_i32, %arg2 : i32, i32, i32, i32
  }
}

</mosaic_0001>

<bundles_post_ra>
// kernel: melgan_discriminator_forward.5
= control target key start
LH: loop header
LB: loop body
LE: loop exit
PB: predicated region body
PF: predicated region fallthrough
CT: control target
= control target key end

     0   :  { %9 = vsyncpa [#allocation4], 0  ;;  %s1950_s0 = inlined_call_operand.vmem [shape: bf16[2,1,8,256], index: 0, kind: input, shape index: {}, may-alias: {0,1}]   ;;  %s1951_s1 = inlined_call_operand.vmem [shape: bf16[2,1,8,256], index: 1, kind: input, shape index: {}, may-alias: {0,1}]   ;;  %s1952_s2 = inlined_call_operand.hbm [shape: bf16[1,15,8,8], index: 2, kind: input, shape index: {}]   ;;  %s1953_s3 = inlined_call_operand.hbm [shape: f32[1,8,1], index: 3, kind: input, shape index: {}]   ;;  %s1954_s4 = inlined_call_operand.vmem [shape: bf16[2,1,8,128], index: 4, kind: output, shape index: {}]  }
   0x1   :  { %10 = vsyncpa [#allocation6], 0  ;;  %s1755_s15 = smov 0   ;;  %s1757_s16 = smov 0  }
   0x2   :  { %s1759_s17 = smov 0  }
   0x3 LB: > { %s1401_s18 = sadd.s32 4294967295, %s1707_s17   ;;  %s42_s19 = sadd.s32 1, %s1703_s16  ;;  %s1707_s17 = sphi %s1759_s17, %s16_s17   ;;  %s1703_s16 = sphi %s1757_s16, %s1964_s16   ;;  %s1699_s15 = sphi %s1755_s15, %s1963_s15  }
   0x4   : > { %p44_p0 = scmp.ge.s32.totalorder %s42_s19, 2  ;;  %p1403_p1 = scmp.ge.s32.totalorder %s1707_s17, 1 }
   0x5   : > { %p197_p2 = scmp.lt.s32.totalorder %s1707_s17, 3  ;;  %p1780_p4 = scmp.eq.s32.totalorder %s1401_s18, 0 }
   0x6   : > { %s1966_s19 = smov (%p44_p0, %s42_s19), 0  ;;  %s1709_s22 = smov [#allocation3]  }
   0x7   : > { %p1776_p3 = pnand %p1403_p1, %p197_p2  ;;  %s213_s23 = sshll.u32 %s1709_s22, 4  ;;  %s214_s23 = int_to_ptr.vmem [resolvable:$true] %s213_s23 }
   0x8   : > { %s1959_s21 = scalar_select %p1780_p4, 1, 0 }
   0x9   : > { %s1958_s20 = scalar_select %p1776_p3, 1, 0 }
   0xa   : > { %p1564_p5 = pneg %p1776_p3  ;;  %s1710_s25 = smov [#allocation5]  }
   0xb   : > { %s229_s26 = sshll.u32 %s1710_s25, 4  ;;  %s1621_s29 = scalar_lea.hbm %s1952_s2, 960  ;;  %s1792_s26 = int_to_ptr.vmem [resolvable:$true] %s229_s26 }
   0xc   : > { %p1788_p6 = pnand %p1780_p4, %p1564_p5  ;;  %p1622_p7 = scmp.ne.s32.totalorder %s1952_s2, %s1621_s29 }
   0xd   : > { %p1628_p11 = scmp.lt.u32.totalorder %s1621_s29, %s1952_s2 }
   0xe   : > { %p1623_p8 = pneg %p1788_p6 }
  0x10   : > { %p1624_p9 = pnand %p1623_p8, %p1622_p7 }
  0x12   : > { %p1625_p10 = pneg %p1624_p9 }
  0x14   : > { %p1630_p12 = pnand %p1628_p11, %p1625_p10 }
  0x16   : > { %1633 = shalt.err (!%p1630_p12)
}
  0x17   : > { %s1634_s8 = scalar_lea.vmem %s214_s23, 960  ;;  %p1642_p2 = scmp.lt.s32.totalorder %s214_s23, %s214_s23 }
  0x18   : > { %p1635_p13 = scmp.ne.s32.totalorder %s214_s23, %s1634_s8  ;;  %p1643_p5 = scmp.lt.s32.totalorder %s1634_s8, %s1634_s8 }
  0x1a   : > { %p1637_p0 = pnand %p1635_p13, %p1623_p8  ;;  %p1644_p4 = por %p1643_p5, %p1642_p2 }
  0x1c   : > { %p1638_p1 = pneg %p1637_p0 }
  0x1e   : > { %p1645_p3 = pnand %p1644_p4, %p1638_p1 }
  0x20   : > { %1648 = shalt.err (!%p1645_p3)
}
  0x21   : > { %s1711_s9 = smov 64   ;;  %s1712_s10 = smov 4  }
  0x22   : > { %1567 = dma.hbm_to_vmem [thread:$0]  (!%p1788_p6), %s1952_s2, 960, %s214_s23, [#allocation4], %s1711_s9, %s1711_s9, %s1712_s10  }
  0x23   : > { %s1649_s18 = scalar_lea.hbm %s1953_s3, 128 }
  0x24   : > { %p1650_p7 = scmp.ne.s32.totalorder %s1953_s3, %s1649_s18  ;;  %p1656_p9 = scmp.lt.u32.totalorder %s1649_s18, %s1953_s3 }
  0x26   : > { %p1652_p3 = pnand %p1650_p7, %p1623_p8 }
  0x28   : > { %p1653_p4 = pneg %p1652_p3 }
  0x2a   : > { %p1658_p10 = pnand %p1656_p9, %p1653_p4 }
  0x2c   : > { %1661 = shalt.err (!%p1658_p10)
}
  0x2d   : > { %s1662_s23 = scalar_lea.vmem %s1792_s26, 128  ;;  %p1670_p0 = scmp.lt.s32.totalorder %s1792_s26, %s1792_s26 }
  0x2e   : > { %p1663_p11 = scmp.ne.s32.totalorder %s1792_s26, %s1662_s23  ;;  %p1671_p1 = scmp.lt.s32.totalorder %s1662_s23, %s1662_s23 }
  0x30   : > { %p1665_p12 = pnand %p1663_p11, %p1623_p8  ;;  %p1672_p2 = por %p1671_p1, %p1670_p0 }
  0x32   : > { %p1666_p13 = pneg %p1665_p12 }
  0x34   : > { %p1673_p5 = pnand %p1672_p2, %p1666_p13 }
  0x36   : > { %1676 = shalt.err (!%p1673_p5)
}
  0x37   : > { %1570 = dma.hbm_to_vmem [thread:$0]  (!%p1788_p6), %s1953_s3, 128, %s1792_s26, [#allocation6]  }
  0x38   : > { %p1961_p7 = scmp.ne.s32.totalorder %s1958_s20, 0 }
  0x39   : > { %p1962_p3 = scmp.ne.s32.totalorder (!%p1961_p7), %s1959_s21, 0 }
  0x3a   : > { %282 = sbr.rel (%p1961_p7) target bundleno = 470 (0x1d6), region = 36 }
  0x41   : > { %1690 = dma.done.wait (%p1962_p3), [#allocation4], 960  }
  0x42   : > { %1692 = vsyncadd (%p1962_p3), [#allocation4], 4294966336 }
  0x43   : > { %1694 = dma.done.wait (%p1962_p3), [#allocation6], 128  }
  0x44   : > { %1696 = vsyncadd (%p1962_p3), [#allocation6], 4294967168  ;;  %p345_p8 = scmp.lt.s32.totalorder %s1699_s15, 1  ;;  %v1713_v0 = vmov 0.0   ;;  %vm1714_vm0 = vmmov 0   ;;  %vm403_vm1 = vcmask 1043456  }
  0x45   : > { %1466 = vmatprep.subr.bf16.mxu0 %v1713_v0  ;;  %1472 = vmatprep.subr.bf16.mxu1 %v1713_v0  ;;  %s1715_s9 = smov 126   ;;  %s1716_s10 = smov 127   ;;  %v398_v4 = vld [vmem:[#allocation3] sm:$0xf]  ;;  %vm399_vm2 = vcmask 64512   ;;  %v1727_v5 = vmov 0  }
  0x46   : > { %s1968_s15 = smov (!%p345_p8, %s1699_s15), 1  ;;  %1468 = vmatprep.mubr.msk.bf16.mxu0 %vm1714_vm0, %v1713_v0  ;;  %1474 = vmatprep.mubr.msk.bf16.mxu1 %vm1714_vm0, %v1713_v0  ;;  %s1717_s11 = smov 125   ;;  %v1225_v6 = vld [vmem:[#allocation5] sm:$0xff]  ;;  %vm511_vm3 = vcmask 1031168   ;;  %vm456_vm4 = vcmask 1039360   ;;  %vm566_vm5 = vcmask 1022976  }
  0x47   : > { %s1432_s20 = sshll.u32 %s1968_s15, 3  ;;  %s1718_s12 = smov 124   ;;  %1620 = vset.pattern.permute.xlu0 %v1727_v5  ;;  %v449_v15 = vld [vmem:[#allocation3 + $0x4] sm:$0xf]  ;;  %v506_v16 = vld [vmem:[#allocation3 + $0x8] sm:$0xf] }
  0x48   : > { %s360_s26 = scalar_lea.vmem %s1950_s0, %s1432_s20  ;;  %s1434_s5 = sadd.s32 4, %s1432_s20  ;;  %vm621_vm6 = vcmask 1014784   ;;  %vm676_vm7 = vcmask 1006592   ;;  %v561_v25 = vld [vmem:[#allocation3 + $0xc] sm:$0xf]  ;;  %vm731_vm8 = vcmask 998400  }
  0x49   : > { %s377_s8 = scalar_lea.vmem %s1951_s1, %s1434_s5  ;;  %v395_v1 = vld [vmem:[%s360_s26] sm:$0xf]  ;;  %s1719_s13 = smov 123   ;;  %v616_v26 = vld [vmem:[#allocation3 + $0x10] sm:$0xf]  ;;  %vm786_vm9 = vcmask 990208  }
  0x4a   : > { %507 = vrot.lane.b32.xlu1 %v395_v1, %s1715_s9  ;;  %452 = vrot.lane.b32.xlu0 %v395_v1, %s1716_s10  ;;  %v405_v2 = vsel %vm403_vm1, %v395_v1, 0  ;;  %v396_v3 = vld [vmem:[%s377_s8] sm:$0xf]  ;;  %s1720_s14 = smov 122   ;;  %s1721_s18 = smov 121   ;;  %vm841_vm10 = vcmask 982016  }
  0x4b   : > { %1467 = vmatpush3.bf16.msra.mxu0 %v405_v2  ;;  %s1722_s22 = smov 120   ;;  %s1723_s25 = smov 119   ;;  %v671_v35 = vld [vmem:[#allocation3 + $0x14] sm:$0xf]  ;;  %v726_v36 = vld [vmem:[#allocation3 + $0x18] sm:$0xf] }
  0x4c   : > { %1478 = vmatprep.subr.bf16.mxu0 %v1713_v0  ;;  %s1724_s27 = smov 118   ;;  %s1725_s28 = smov 117   ;;  %vm896_vm11 = vcmask 973824   ;;  %v781_v45 = vld [vmem:[#allocation3 + $0x1c] sm:$0xf]  ;;  %vm951_vm12 = vcmask 965632  }
  0x4d   : > { %s1726_s23 = smov 116   ;;  %s1728_s29 = smov 115   ;;  %v836_v46 = vld [vmem:[#allocation3 + $0x20] sm:$0xf]  ;;  %vm1006_vm13 = vcmask 957440   ;;  %vm1061_vm14 = vcmask 949248  }
  0x4e   : > { %509 = vrot.lane.b32.xlu1 %v396_v3, %s1715_s9  ;;  %454 = vrot.lane.b32.xlu0 %v396_v3, %s1716_s10  ;;  %s1729_s30 = smov 114   ;;  %v891_v55 = vld [vmem:[#allocation3 + $0x24] sm:$0xf]  ;;  %v946_v56 = vld [vmem:[#allocation3 + $0x28] sm:$0xf]  ;;  %vm1116_vm15 = vcmask 941056  }
  0x4f   : > { %1469 = vmatmul.mubr.msk.bf16.vlgmr.msra.gmra.mrb[0].mxu0 %vm399_vm2, %v398_v4  ;;  %v1001_v2 = vld [vmem:[#allocation3 + $0x2c] sm:$0xf]  ;;  %s1414_s20 = sshll.u32 %s1968_s15, 2 }
  0x50   : > { %1480 = vmatprep.mubr.msk.bf16.mxu0 %vm1714_vm0, %v1713_v0  ;;  %s388_s26 = scalar_lea.vmem %s1954_s4, %s1414_s20 }
  0x52   : > { %564 = vrot.lane.b32.xlu1 %v396_v3, %s1717_s11  ;;  %562 = vrot.lane.b32.xlu0 %v395_v1, %s1717_s11 }
  0x56   : > { %619 = vrot.lane.b32.xlu1 %v396_v3, %s1718_s12  ;;  %617 = vrot.lane.b32.xlu0 %v395_v1, %s1718_s12 }
  0x5a   : > { %674 = vrot.lane.b32.xlu1 %v396_v3, %s1719_s13  ;;  %672 = vrot.lane.b32.xlu0 %v395_v1, %s1719_s13 }
  0x5e   : > { %729 = vrot.lane.b32.xlu1 %v396_v3, %s1720_s14  ;;  %727 = vrot.lane.b32.xlu0 %v395_v1, %s1720_s14 }
  0x62   : > { %784 = vrot.lane.b32.xlu1 %v396_v3, %s1721_s18  ;;  %782 = vrot.lane.b32.xlu0 %v395_v1, %s1721_s18 }
  0x66   : > { %839 = vrot.lane.b32.xlu1 %v396_v3, %s1722_s22  ;;  %837 = vrot.lane.b32.xlu0 %v395_v1, %s1722_s22 }
  0x6a   : > { %894 = vrot.lane.b32.xlu1 %v396_v3, %s1723_s25  ;;  %892 = vrot.lane.b32.xlu0 %v395_v1, %s1723_s25 }
  0x6e   : > { %949 = vrot.lane.b32.xlu1 %v396_v3, %s1724_s27  ;;  %947 = vrot.lane.b32.xlu0 %v395_v1, %s1724_s27 }
  0x72   : > { %1004 = vrot.lane.b32.xlu1 %v396_v3, %s1725_s28  ;;  %1002 = vrot.lane.b32.xlu0 %v395_v1, %s1725_s28 }
  0x76   : > { %1059 = vrot.lane.b32.xlu1 %v396_v3, %s1726_s23  ;;  %1057 = vrot.lane.b32.xlu0 %v395_v1, %s1726_s23 }
  0x7a   : > { %1114 = vrot.lane.b32.xlu1 %v396_v3, %s1728_s29  ;;  %1112 = vrot.lane.b32.xlu0 %v395_v1, %s1728_s29 }
  0x7e   : > { %1169 = vrot.lane.b32.xlu1 %v396_v3, %s1729_s30  ;;  %1167 = vrot.lane.b32.xlu0 %v395_v1, %s1729_s30  ;;  %v1056_v3 = vld [vmem:[#allocation3 + $0x30] sm:$0xf] }
  0x82   : > { %1228 = vperm.xlu0 %1620, %v1225_v6  }
  0xbc   : > { %v508_v7 = vpop.permute.xlu1 %507  ;;  %v453_v8 = vpop.permute.xlu0 %452 }
  0xc0   : > { %v510_v9 = vpop.permute.xlu1 %509  ;;  %v455_v10 = vpop.permute.xlu0 %454 }
  0xc1   : > { %v512_v11 = vsel %vm511_vm3, %v508_v7, %v510_v9  ;;  %v457_v12 = vsel %vm456_vm4, %v453_v8, %v455_v10  ;;  %vm1171_vm3 = vcmask 932864  }
  0xc2   : > { %v517_v13 = vsel %vm403_vm1, %v512_v11, 0  ;;  %v462_v14 = vsel %vm403_vm1, %v457_v12, 0  ;;  %v1111_v12 = vld [vmem:[#allocation3 + $0x34] sm:$0xf] }
  0xc3   : > { %1473 = vmatpush3.bf16.msra.mxu1 %v462_v14  ;;  %1479 = vmatpush3.bf16.msra.mxu0 %v517_v13  ;;  %v1166_v13 = vld [vmem:[#allocation3 + $0x38] sm:$0xf] }
  0xc4   : > { %v565_v17 = vpop.permute.xlu1 %564  ;;  %v563_v18 = vpop.permute.xlu0 %562  ;;  %1484 = vmatprep.subr.bf16.mxu1 %v1713_v0  ;;  %1490 = vmatprep.subr.bf16.mxu0 %v1713_v0 }
  0xc5   : > { %v567_v19 = vsel %vm566_vm5, %v563_v18, %v565_v17 }
  0xc6   : > { %v572_v20 = vsel %vm403_vm1, %v567_v19, 0  ;;  %1475 = vmatmul.mubr.msk.bf16.vlgmr.msra.gmra.mrb[0].mxu1 %vm399_vm2, %v449_v15  ;;  %1481 = vmatmul.mubr.msk.bf16.vlgmr.msra.gmra.mrb[4].mxu0 %vm399_vm2, %v506_v16 }
  0xc7   : > { %1485 = vmatpush3.bf16.msra.mxu1 %v572_v20  ;;  %1486 = vmatprep.mubr.msk.bf16.mxu1 %vm1714_vm0, %v1713_v0 }
  0xc8   : > { %v620_v21 = vpop.permute.xlu1 %619  ;;  %v618_v22 = vpop.permute.xlu0 %617  ;;  %1496 = vmatprep.subr.bf16.mxu1 %v1713_v0  ;;  %1492 = vmatprep.mubr.msk.bf16.mxu0 %vm1714_vm0, %v1713_v0 }
  0xc9   : > { %v622_v23 = vsel %vm621_vm6, %v618_v22, %v620_v21 }
  0xca   : > { %v627_v24 = vsel %vm403_vm1, %v622_v23, 0 }
  0xcb   : > { %1491 = vmatpush3.bf16.msra.mxu0 %v627_v24 }
  0xcc   : > { %v675_v27 = vpop.permute.xlu1 %674  ;;  %v673_v28 = vpop.permute.xlu0 %672  ;;  %1502 = vmatprep.subr.bf16.mxu0 %v1713_v0 }
  0xcd   : > { %v677_v29 = vsel %vm676_vm7, %v673_v28, %v675_v27 }
  0xce   : > { %v682_v30 = vsel %vm403_vm1, %v677_v29, 0  ;;  %1487 = vmatmul.mubr.msk.bf16.vlgmr.msra.gmra.mrb[4].mxu1 %vm399_vm2, %v561_v25  ;;  %1493 = vmatmul.mubr.msk.bf16.vlgmr.msra.gmra.mrb[8].mxu0 %vm399_vm2, %v616_v26 }
  0xcf   : > { %1497 = vmatpush3.bf16.msra.mxu1 %v682_v30  ;;  %1498 = vmatprep.mubr.msk.bf16.mxu1 %vm1714_vm0, %v1713_v0 }
  0xd0   : > { %v730_v31 = vpop.permute.xlu1 %729  ;;  %v728_v32 = vpop.permute.xlu0 %727  ;;  %1508 = vmatprep.subr.bf16.mxu1 %v1713_v0  ;;  %1504 = vmatprep.mubr.msk.bf16.mxu0 %vm1714_vm0, %v1713_v0 }
  0xd1   : > { %v732_v33 = vsel %vm731_vm8, %v728_v32, %v730_v31 }
  0xd2   : > { %v737_v34 = vsel %vm403_vm1, %v732_v33, 0 }
  0xd3   : > { %1503 = vmatpush3.bf16.msra.mxu0 %v737_v34 }
  0xd4   : > { %v785_v37 = vpop.permute.xlu1 %784  ;;  %v783_v38 = vpop.permute.xlu0 %782  ;;  %1514 = vmatprep.subr.bf16.mxu0 %v1713_v0 }
  0xd5   : > { %v787_v39 = vsel %vm786_vm9, %v783_v38, %v785_v37 }
  0xd6   : > { %v792_v40 = vsel %vm403_vm1, %v787_v39, 0  ;;  %1499 = vmatmul.mubr.msk.bf16.vlgmr.msra.gmra.mrb[8].mxu1 %vm399_vm2, %v671_v35  ;;  %1505 = vmatmul.mubr.msk.bf16.vlgmr.msra.gmra.mrb[12].mxu0 %vm399_vm2, %v726_v36 }
  0xd7   : > { %1509 = vmatpush3.bf16.msra.mxu1 %v792_v40  ;;  %1510 = vmatprep.mubr.msk.bf16.mxu1 %vm1714_vm0, %v1713_v0 }
  0xd8   : > { %v840_v41 = vpop.permute.xlu1 %839  ;;  %v838_v42 = vpop.permute.xlu0 %837  ;;  %1520 = vmatprep.subr.bf16.mxu1 %v1713_v0  ;;  %1516 = vmatprep.mubr.msk.bf16.mxu0 %vm1714_vm0, %v1713_v0 }
  0xd9   : > { %v842_v43 = vsel %vm841_vm10, %v838_v42, %v840_v41 }
  0xda   : > { %v847_v44 = vsel %vm403_vm1, %v842_v43, 0 }
  0xdb   : > { %1515 = vmatpush3.bf16.msra.mxu0 %v847_v44 }
  0xdc   : > { %v895_v47 = vpop.permute.xlu1 %894  ;;  %v893_v48 = vpop.permute.xlu0 %892  ;;  %1526 = vmatprep.subr.bf16.mxu0 %v1713_v0 }
  0xdd   : > { %v897_v49 = vsel %vm896_vm11, %v893_v48, %v895_v47 }
  0xde   : > { %v902_v50 = vsel %vm403_vm1, %v897_v49, 0  ;;  %1511 = vmatmul.mubr.msk.bf16.vlgmr.msra.gmra.mrb[12].mxu1 %vm399_vm2, %v781_v45  ;;  %1517 = vmatmul.mubr.msk.bf16.vlgmr.msra.gmra.mrb[16].mxu0 %vm399_vm2, %v836_v46 }
  0xdf   : > { %1521 = vmatpush3.bf16.msra.mxu1 %v902_v50  ;;  %1522 = vmatprep.mubr.msk.bf16.mxu1 %vm1714_vm0, %v1713_v0 }
  0xe0   : > { %v950_v51 = vpop.permute.xlu1 %949  ;;  %v948_v52 = vpop.permute.xlu0 %947  ;;  %1532 = vmatprep.subr.bf16.mxu1 %v1713_v0  ;;  %1528 = vmatprep.mubr.msk.bf16.mxu0 %vm1714_vm0, %v1713_v0 }
  0xe1   : > { %v952_v53 = vsel %vm951_vm12, %v948_v52, %v950_v51 }
  0xe2   : > { %v957_v54 = vsel %vm403_vm1, %v952_v53, 0 }
  0xe3   : > { %1527 = vmatpush3.bf16.msra.mxu0 %v957_v54 }
  0xe4   : > { %v1005_v57 = vpop.permute.xlu1 %1004  ;;  %v1003_v58 = vpop.permute.xlu0 %1002  ;;  %1538 = vmatprep.subr.bf16.mxu0 %v1713_v0 }
  0xe5   : > { %v1007_v59 = vsel %vm1006_vm13, %v1003_v58, %v1005_v57 }
  0xe6   : > { %v1012_v60 = vsel %vm403_vm1, %v1007_v59, 0  ;;  %1523 = vmatmul.mubr.msk.bf16.vlgmr.msra.gmra.mrb[16].mxu1 %vm399_vm2, %v891_v55  ;;  %1529 = vmatmul.mubr.msk.bf16.vlgmr.msra.gmra.mrb[20].mxu0 %vm399_vm2, %v946_v56 }
  0xe7   : > { %1533 = vmatpush3.bf16.msra.mxu1 %v1012_v60  ;;  %1534 = vmatprep.mubr.msk.bf16.mxu1 %vm1714_vm0, %v1713_v0 }
  0xe8   : > { %v1060_v61 = vpop.permute.xlu1 %1059  ;;  %v1058_v62 = vpop.permute.xlu0 %1057  ;;  %1544 = vmatprep.subr.bf16.mxu1 %v1713_v0  ;;  %1540 = vmatprep.mubr.msk.bf16.mxu0 %vm1714_vm0, %v1713_v0 }
  0xe9   : > { %v1062_v63 = vsel %vm1061_vm14, %v1058_v62, %v1060_v61 }
  0xea   : > { %v1067_v1 = vsel %vm403_vm1, %v1062_v63, 0 }
  0xeb   : > { %1539 = vmatpush3.bf16.msra.mxu0 %v1067_v1 }
  0xec   : > { %v1115_v4 = vpop.permute.xlu1 %1114  ;;  %v1113_v5 = vpop.permute.xlu0 %1112  ;;  %1550 = vmatprep.subr.bf16.mxu0 %v1713_v0 }
  0xed   : > { %v1117_v6 = vsel %vm1116_vm15, %v1113_v5, %v1115_v4 }
  0xee   : > { %v1122_v7 = vsel %vm403_vm1, %v1117_v6, 0  ;;  %1535 = vmatmul.mubr.msk.bf16.vlgmr.msra.gmra.mrb[20].mxu1 %vm399_vm2, %v1001_v2  ;;  %1541 = vmatmul.mubr.msk.bf16.vlgmr.msra.gmra.mrb[24].mxu0 %vm399_vm2, %v1056_v3 }
  0xef   : > { %1545 = vmatpush3.bf16.msra.mxu1 %v1122_v7  ;;  %1546 = vmatprep.mubr.msk.bf16.mxu1 %vm1714_vm0, %v1713_v0 }
  0xf0   : > { %v1170_v8 = vpop.permute.xlu1 %1169  ;;  %v1168_v9 = vpop.permute.xlu0 %1167  ;;  %1552 = vmatprep.mubr.msk.bf16.mxu0 %vm1714_vm0, %v1713_v0 }
  0xf1   : > { %v1172_v10 = vsel %vm1171_vm3, %v1168_v9, %v1170_v8 }
  0xf2   : > { %v1177_v11 = vsel %vm403_vm1, %v1172_v10, 0 }
  0xf3   : > { %1551 = vmatpush3.bf16.msra.mxu0 %v1177_v11 }
  0xf6   : > { %1547 = vmatmul.mubr.msk.bf16.vlgmr.msra.gmra.mrb[24].mxu1 %vm399_vm2, %v1111_v12  ;;  %1553 = vmatmul.mubr.msk.bf16.vlgmr.msra.gmra.mrb[28].mxu0 %vm399_vm2, %v1166_v13 }
 0x122   : > { %v441_v14 = vpop.f32.mrb[0].mxu0 }
 0x123   : > { %v1470_v15 = vpop.f32.mrb[1].mxu0 }
 0x124   : > { %v444_v16 = vpop.f32.mrb[2].mxu0 }
 0x125   : > { %v1471_v17 = vpop.f32.mrb[3].mxu0 }
 0x199   : > { %v498_v18 = vpop.f32.mrb[0].mxu1  ;;  %v553_v19 = vpop.f32.mrb[4].mxu0 }
 0x19a   : > { %v504_v20 = vadd.f32 %v498_v18, %v441_v14  ;;  %v1476_v21 = vpop.f32.mrb[1].mxu1  ;;  %v1482_v22 = vpop.f32.mrb[5].mxu0 }
 0x19b   : > { %v501_v0 = vpop.f32.mrb[2].mxu1  ;;  %v556_v23 = vpop.f32.mrb[6].mxu0 }
 0x19c   : > { %v559_v24 = vadd.f32 %v553_v19, %v504_v20  ;;  %v1477_v25 = vpop.f32.mrb[3].mxu1  ;;  %v1483_v26 = vpop.f32.mrb[7].mxu0 }
 0x19d   : > { %v1229_v14 = vpop.permute.xlu0 %1228 }
 0x1a1   : > { %v608_v27 = vpop.f32.mrb[4].mxu1  ;;  %v663_v28 = vpop.f32.mrb[8].mxu0 }
 0x1a2   : > { %v614_v29 = vadd.f32 %v608_v27, %v559_v24  ;;  %v1488_v30 = vpop.f32.mrb[5].mxu1  ;;  %v1494_v31 = vpop.f32.mrb[9].mxu0 }
 0x1a3   : > { %v611_v32 = vpop.f32.mrb[6].mxu1  ;;  %v666_v33 = vpop.f32.mrb[10].mxu0 }
 0x1a4   : > { %v669_v34 = vadd.f32 %v663_v28, %v614_v29  ;;  %v1489_v35 = vpop.f32.mrb[7].mxu1  ;;  %v1495_v36 = vpop.f32.mrb[11].mxu0 }
 0x1a9   : > { %v718_v37 = vpop.f32.mrb[8].mxu1  ;;  %v773_v38 = vpop.f32.mrb[12].mxu0 }
 0x1aa   : > { %v724_v39 = vadd.f32 %v718_v37, %v669_v34  ;;  %v1500_v40 = vpop.f32.mrb[9].mxu1  ;;  %v1506_v41 = vpop.f32.mrb[13].mxu0 }
 0x1ab   : > { %v721_v42 = vpop.f32.mrb[10].mxu1  ;;  %v776_v43 = vpop.f32.mrb[14].mxu0 }
 0x1ac   : > { %v779_v44 = vadd.f32 %v773_v38, %v724_v39  ;;  %v1501_v45 = vpop.f32.mrb[11].mxu1  ;;  %v1507_v46 = vpop.f32.mrb[15].mxu0 }
 0x1b1   : > { %v828_v47 = vpop.f32.mrb[12].mxu1  ;;  %v883_v48 = vpop.f32.mrb[16].mxu0 }
 0x1b2   : > { %v834_v49 = vadd.f32 %v828_v47, %v779_v44  ;;  %v1512_v50 = vpop.f32.mrb[13].mxu1  ;;  %v1518_v51 = vpop.f32.mrb[17].mxu0 }
 0x1b3   : > { %v831_v52 = vpop.f32.mrb[14].mxu1  ;;  %v886_v53 = vpop.f32.mrb[18].mxu0 }
 0x1b4   : > { %v889_v54 = vadd.f32 %v883_v48, %v834_v49  ;;  %v1513_v55 = vpop.f32.mrb[15].mxu1  ;;  %v1519_v56 = vpop.f32.mrb[19].mxu0 }
 0x1b9   : > { %v938_v57 = vpop.f32.mrb[16].mxu1  ;;  %v993_v58 = vpop.f32.mrb[20].mxu0 }
 0x1ba   : > { %v944_v59 = vadd.f32 %v938_v57, %v889_v54  ;;  %v1524_v60 = vpop.f32.mrb[17].mxu1  ;;  %v1530_v61 = vpop.f32.mrb[21].mxu0 }
 0x1bb   : > { %v941_v62 = vpop.f32.mrb[18].mxu1  ;;  %v996_v63 = vpop.f32.mrb[22].mxu0 }
 0x1bc   : > { %v999_v1 = vadd.f32 %v993_v58, %v944_v59  ;;  %v1525_v2 = vpop.f32.mrb[19].mxu1  ;;  %v1531_v3 = vpop.f32.mrb[23].mxu0 }
 0x1c1   : > { %v1048_v4 = vpop.f32.mrb[20].mxu1  ;;  %v1103_v5 = vpop.f32.mrb[24].mxu0 }
 0x1c2   : > { %v1054_v6 = vadd.f32 %v1048_v4, %v999_v1  ;;  %v1536_v7 = vpop.f32.mrb[21].mxu1  ;;  %v1542_v8 = vpop.f32.mrb[25].mxu0 }
 0x1c3   : > { %v1051_v9 = vpop.f32.mrb[22].mxu1  ;;  %v1106_v10 = vpop.f32.mrb[26].mxu0 }
 0x1c4   : > { %v1109_v11 = vadd.f32 %v1103_v5, %v1054_v6  ;;  %v1537_v12 = vpop.f32.mrb[23].mxu1  ;;  %v1543_v13 = vpop.f32.mrb[27].mxu0 }
 0x1c9   : > { %v1158_v15 = vpop.f32.mrb[24].mxu1  ;;  %v1213_v16 = vpop.f32.mrb[28].mxu0 }
 0x1ca   : > { %v1164_v17 = vadd.f32 %v1158_v15, %v1109_v11  ;;  %v1548_v18 = vpop.f32.mrb[25].mxu1  ;;  %v1554_v19 = vpop.f32.mrb[29].mxu0 }
 0x1cb   : > { %v1161_v20 = vpop.f32.mrb[26].mxu1  ;;  %v1216_v21 = vpop.f32.mrb[30].mxu0 }
 0x1cc   : > { %v1219_v22 = vadd.f32 %v1213_v16, %v1164_v17  ;;  %v1549_v0 = vpop.f32.mrb[27].mxu1  ;;  %v1555_v23 = vpop.f32.mrb[31].mxu0 }
 0x1ce   : > { %v1231_v24 = vadd.f32 %v1229_v14, %v1219_v22 }
 0x1d0   : > { %vm1232_vm0 = vcmp.ge.f32.partialorder %v1231_v24, 0.0  ;;  %v1233_v25 = vmul.f32 0.2, %v1231_v24 }
 0x1d2   : > { %v1234_v26 = vsel %vm1232_vm0, %v1231_v24, %v1233_v25 }
 0x1d3   : > { %v1235_v27 = vpack.c.bf16 %v1234_v26, %v1234_v26 }
 0x1d5   : > { %1236 = vst [vmem:[%s388_s26] sm:$0xf] %v1235_v27 }
 0x1d6 PF: > { %s16_s17 = sadd.s32 1, %s1707_s17   ;;  %s1963_s15 = smov %s1703_s16 }
 0x1d7   : > { %p13_p6 = scmp.ge.s32.totalorder %s16_s17, 4   ;;  %s1964_s16 = smov %s1966_s19 }
 0x1d9   :  { %15 = sbr.rel (!%p13_p6) target bundleno = 3 (0x3), region = 102 }
 0x1e0   :  { %1268 = vsyncpa [#allocation4], 1 }
 0x1e1   :  { %1270 = vsyncpa [#allocation4 + $0x1], 1 }
 0x1e2   :  { %1271 = vsyncpa [#allocation6], 1 }

// kernel: melgan_discriminator_forward.6
= control target key start
LH: loop header
LB: loop body
LE: loop exit
PB: predicated region body
PF: predicated region fallthrough
CT: control target
= control target key end

     0   :  { %s2143_s0 = inlined_call_operand.vmem [shape: bf16[2,2,16,256], index: 0, kind: input, shape index: {}, may-alias: {0,1}]   ;;  %s2144_s1 = inlined_call_operand.vmem [shape: bf16[2,2,16,256], index: 1, kind: input, shape index: {}, may-alias: {0,1}]   ;;  %s2145_s2 = inlined_call_operand.hbm [shape: bf16[2,11,16,16], index: 2, kind: input, shape index: {}]   ;;  %s2146_s3 = inlined_call_operand.hbm [shape: f32[2,16,1], index: 3, kind: input, shape index: {}]   ;;  %s2147_s4 = inlined_call_operand.vmem [shape: bf16[2,2,16,128], index: 4, kind: output, shape index: {}]  }
   0x1   :  { %2150 = sst [smem:[#allocation13_spill]] %s2143_s0 }
   0x2   :  { %2151 = sst [smem:[#allocation14_spill]] %s2144_s1 }
   0x3   :  { %9 = vsyncpa [#allocation6], 0 }
   0x4   :  { %11 = vsyncpa [#allocation6 + $0x1], 0 }
   0x5   :  { %12 = vsyncpa [#allocation8], 0 }
   0x6   :  { %14 = vsyncpa [#allocation8 + $0x1], 0  ;;  %s1856_s15 = smov 0   ;;  %s1858_s16 = smov 0  }
   0x7   :  { %s1860_s17 = smov 0   ;;  %s1862_s18 = smov 0  }
   0x8   :  { %s1864_s19 = smov 0   ;;  %s1866_s20 = smov 0  }
   0x9   :  { %s1868_s21 = smov 0   ;;  %s1870_s22 = smov 0  }
   0xa   :  { %s1872_s23 = smov 0   ;;  %s1874_s24 = smov 0  }
   0xb LB: > { %s1380_s25 = sadd.s32 4294967295, %s1810_s24   ;;  %s42_s26 = sadd.s32 1, %s1802_s22  ;;  %s1810_s24 = sphi %s1874_s24, %s20_s24   ;;  %s1806_s23 = sphi %s1872_s23, %s2169_s23   ;;  %s1802_s22 = sphi %s1870_s22, %s2168_s22   ;;  %s1798_s21 = sphi %s1868_s21, %s2167_s21   ;;  %s1794_s20 = sphi %s1866_s20, %s2166_s20   ;;  %s1790_s19 = sphi %s1864_s19, %s2165_s19   ;;  %s1786_s18 = sphi %s1862_s18, %s2164_s18   ;;  %s1782_s17 = sphi %s1860_s17, %s2163_s17   ;;  %s1778_s16 = sphi %s1858_s16, %s2162_s16   ;;  %s1774_s15 = sphi %s1856_s15, %s2161_s15  }
   0xc   : > { %p44_p0 = scmp.ge.s32.totalorder %s42_s26, 2  ;;  %s46_s27 = sadd.s32 1, %s1806_s23 }
   0xd   : > { %s59_s28 = sadd.s32 1, %s1790_s19  ;;  %p66_p1 = scmp.ne.s32.totalorder %s1790_s19, %s1786_s18 }
   0xe   : > { %s2171_s26 = smov (%p44_p0, %s42_s26), 0  ;;  %s2173_s27 = smov (!%p44_p0, %s46_s27), %s1806_s23 }
   0xf   : > { %2152 = sst [smem:[#allocation11_spill]] %s2171_s26  ;;  %s51_s29 = ssub.s32 %s1802_s22, %s2171_s26 }
  0x10   : > { %p67_p2 = scmp.eq.s32.totalorder %s1810_s24, 0  ;;  %p48_p3 = scmp.ge.s32.totalorder %s2173_s27, 2 }
  0x11   : > { %p119_p4 = scmp.eq.s32.totalorder %s51_s29, 0  ;;  %s121_s5 = sadd.s32 1, %s1782_s17 }
  0x12   : > { %p1918_p5 = por %p67_p2, %p66_p1  ;;  %s2175_s27 = smov (%p48_p3, %s2173_s27), 0 }
  0x13   : > { %2154 = sst [smem:[#allocation12_spill]] %s2175_s27  ;;  %s50_s7 = ssub.s32 %s1806_s23, %s2175_s27 }
  0x14   : > { %s1926_s6 = scalar_select %p119_p4, %s1782_s17, %s121_s5  }
  0x15   : > { %p128_p6 = scmp.ne.s32.totalorder %s1782_s17, %s1778_s16  ;;  %s52_s8 = sor.u32 %s51_s29, %s50_s7 }
  0x16   : > { %p134_p7 = scmp.ne.s32.totalorder %s1778_s16, %s1774_s15  ;;  %p57_p8 = scmp.eq.s32.totalorder %s52_s8, 0 }
  0x17   : > { %p1934_p9 = por %p128_p6, %p67_p2  ;;  %p135_p10 = scmp.eq.s32.totalorder %s1380_s25, 0 }
  0x18   : > { %s1939_s10 = scalar_select %p57_p8, %s1790_s19, %s59_s28  }
  0x19   : > { %p1941_p11 = por %p135_p10, %p134_p7  ;;  %p1383_p12 = scmp.ge.s32.totalorder %s1810_s24, 4 }
  0x1b   : > { %210 = sbr.rel (%p1383_p12) target bundleno = 108 (0x6c), region = 16 }
  0x22   : > { %213 = sbr.rel (!%p1918_p5) target bundleno = 45 (0x2d), region = 20  ;;  %s215_s12 = sand.u32 (%p1918_p5), 1, %s1790_s19  }
  0x23   : > { %s1385_s13 = sshll.u32 (%p1918_p5), %s1802_s22, 2  ;;  %s1384_s14 = sshll.u32 (%p1918_p5), %s215_s12, 3 }
  0x24   : > { %s1386_s15 = sshll.u32 (%p1918_p5), %s1806_s23, 3  ;;  %s2157_s0 = sld [smem:[#allocation13_spill]] (%p1918_p5) }
  0x25   : > { %s224_s25 = sadd.s32 (%p1918_p5), %s1386_s15, %s1385_s13  ;;  %s217_s8 = scalar_lea.vmem (%p1918_p5), [#allocation3], %s1384_s14 }
  0x26   : > { %s1387_s28 = sshll.u32 (%p1918_p5), %s224_s25, 2 }
  0x2a   : > { %s226_s7 = scalar_lea.vmem %s2157_s0, %s1387_s28 }
  0x2b   : > { %v242_v0 = vld [vmem:[%s226_s7] sm:$0xf]  ;;  %v244_v1 = vld [vmem:[%s226_s7 + $0x8] sm:$0xf] }
  0x2c   : > { %243 = vst [vmem:[%s217_s8] sm:$0xf] %v242_v0  ;;  %245 = vst [vmem:[%s217_s8 + $0x4] sm:$0xf] %v244_v1 }
  0x2d PF: > { %272 = sbr.rel (!%p1918_p5) target bundleno = 56 (0x38), region = 61  ;;  %s274_s12 = sand.u32 (%p1918_p5), 1, %s1790_s19  }
  0x2e   : > { %s1389_s27 = sshll.u32 (%p1918_p5), %s1802_s22, 2  ;;  %s1388_s13 = sshll.u32 (%p1918_p5), %s274_s12, 3 }
  0x2f   : > { %s1390_s15 = sshll.u32 (%p1918_p5), %s1806_s23, 3  ;;  %s2158_s1 = sld [smem:[#allocation14_spill]] (%p1918_p5) }
  0x30   : > { %s1250_s25 = sadd.s32 (%p1918_p5), %s1390_s15, %s1389_s27  ;;  %s276_s14 = scalar_lea.vmem (%p1918_p5), [#allocation4], %s1388_s13 }
  0x31   : > { %s1391_s26 = sshll.u32 (%p1918_p5), %s1250_s25, 2 }
  0x35   : > { %s1252_s5 = scalar_lea.vmem %s2158_s1, %s1391_s26 }
  0x36   : > { %v1392_v2 = vld [vmem:[%s1252_s5 + $0x4] sm:$0xf]  ;;  %v1393_v3 = vld [vmem:[%s1252_s5 + $0xc] sm:$0xf] }
  0x37   : > { %303 = vst [vmem:[%s276_s14] sm:$0xf] %v1392_v2  ;;  %305 = vst [vmem:[%s276_s14 + $0x4] sm:$0xf] %v1393_v3 }
  0x38 PF: > { %s1963_s30 = sand.u32 1, %s1782_s17   ;;  %s1550_s27 = smul.u32 1408, %s1802_s22 }
  0x39   : > { %s1549_s7 = smul.u32 88, %s1963_s30  ;;  %s1395_s25 = sshll.u32 %s1963_s30, 4 }
  0x3a   : > { %s1970_s26 = scalar_lea.hbm %s2145_s2, %s1550_s27  ;;  %s334_s29 = scalar_lea.sflag [#allocation6], %s1963_s30 }
  0x3b   : > { %s337_s13 = scalar_lea.vmem [#allocation5], %s1549_s7  ;;  %s1668_s28 = scalar_lea.hbm %s1970_s26, 1408 }
  0x3c   : > { %s345_s15 = sshll.u32 %s337_s13, 4  ;;  %p1669_p13 = scmp.ne.s32.totalorder %s1970_s26, %s1668_s28  ;;  %s1972_s15 = int_to_ptr.vmem [resolvable:$true] %s345_s15 }
  0x3d   : > { %s1672_s27 = scalar_lea.hbm %s2145_s2, 2816  ;;  %p1673_p2 = scmp.lt.u32.totalorder %s1970_s26, %s2145_s2 }
  0x3e   : > { %p1670_p0 = pnand %p1669_p13, %p1934_p9  ;;  %p1674_p3 = scmp.lt.u32.totalorder %s1672_s27, %s1668_s28 }
  0x3f   : > { %p1676_p5 = scmp.lt.u32.totalorder %s1668_s28, %s1970_s26 }
  0x40   : > { %p1671_p1 = pneg %p1670_p0  ;;  %p1675_p4 = por %p1674_p3, %p1673_p2 }
  0x42   : > { %p1677_p6 = por %p1676_p5, %p1675_p4 }
  0x44   : > { %p1678_p7 = pnand %p1677_p6, %p1671_p1 }
  0x46   : > { %1681 = shalt.err (!%p1678_p7)
}
  0x47   : > { %s1682_s7 = scalar_lea.vmem %s1972_s15, 1408  ;;  %s1812_s13 = smov [#allocation5]  }
  0x48   : > { %p1683_p8 = scmp.ne.s32.totalorder %s1972_s15, %s1682_s7  ;;  %s1686_s5 = sshll.u32 %s1812_s13, 4  ;;  %s1687_s5 = int_to_ptr.vmem [resolvable:$false] %s1686_s5 }
  0x49   : > { %s1688_s14 = scalar_lea.vmem %s1687_s5, 2816  ;;  %p1689_p13 = scmp.lt.s32.totalorder %s1972_s15, %s1687_s5 }
  0x4a   : > { %p1684_p10 = pnand %p1683_p8, %p1934_p9  ;;  %p1690_p0 = scmp.lt.s32.totalorder %s1688_s14, %s1682_s7 }
  0x4c   : > { %p1685_p12 = pneg %p1684_p10  ;;  %p1691_p2 = por %p1690_p0, %p1689_p13 }
  0x4e   : > { %p1692_p3 = pnand %p1691_p2, %p1685_p12 }
  0x50   : > { %1695 = shalt.err (!%p1692_p3)
}
  0x51   : > { %s1813_s28 = smov 64   ;;  %s1814_s27 = smov 4  }
  0x52   : > { %1552 = dma.hbm_to_vmem [thread:$0]  (%p1934_p9), %s1970_s26, 1408, %s1972_s15, %s334_s29, %s1813_s28, %s1813_s28, %s1814_s27  }
  0x53   : > { %s1453_s8 = sshll.u32 %s1802_s22, 8  ;;  %s359_s5 = scalar_lea.vmem [#allocation7], %s1395_s25 }
  0x54   : > { %s2003_s7 = scalar_lea.hbm %s2146_s3, %s1453_s8  ;;  %s366_s14 = sshll.u32 %s359_s5, 4  ;;  %s2007_s14 = int_to_ptr.vmem [resolvable:$true] %s366_s14 }
  0x55   : > { %s356_s0 = scalar_lea.sflag [#allocation8], %s1963_s30  ;;  %s1696_s1 = scalar_lea.hbm %s2003_s7, 256 }
  0x56   : > { %p1697_p1 = scmp.ne.s32.totalorder %s2003_s7, %s1696_s1  ;;  %s1700_s29 = scalar_lea.hbm %s2146_s3, 512 }
  0x57   : > { %p1701_p6 = scmp.lt.u32.totalorder %s2003_s7, %s2146_s3  ;;  %p1702_p7 = scmp.lt.u32.totalorder %s1700_s29, %s1696_s1 }
  0x58   : > { %p1698_p4 = pnand %p1697_p1, %p1934_p9  ;;  %p1704_p10 = scmp.lt.u32.totalorder %s1696_s1, %s2003_s7 }
  0x59   : > { %p1703_p8 = por %p1702_p7, %p1701_p6 }
  0x5a   : > { %p1699_p5 = pneg %p1698_p4 }
  0x5b   : > { %p1705_p12 = por %p1704_p10, %p1703_p8 }
  0x5d   : > { %p1706_p13 = pnand %p1705_p12, %p1699_p5 }
  0x5f   : > { %1709 = shalt.err (!%p1706_p13)
}
  0x60   : > { %s1710_s25 = scalar_lea.vmem %s2007_s14, 256  ;;  %s1815_s8 = smov [#allocation7]  }
  0x61   : > { %p1711_p0 = scmp.ne.s32.totalorder %s2007_s14, %s1710_s25  ;;  %s1714_s12 = sshll.u32 %s1815_s8, 4  ;;  %s1715_s12 = int_to_ptr.vmem [resolvable:$false] %s1714_s12 }
  0x62   : > { %s1716_s13 = scalar_lea.vmem %s1715_s12, 512  ;;  %p1717_p1 = scmp.lt.s32.totalorder %s2007_s14, %s1715_s12 }
  0x63   : > { %p1712_p2 = pnand %p1711_p0, %p1934_p9  ;;  %p1718_p4 = scmp.lt.s32.totalorder %s1716_s13, %s1710_s25 }
  0x65   : > { %p1713_p3 = pneg %p1712_p2  ;;  %p1719_p6 = por %p1718_p4, %p1717_p1 }
  0x67   : > { %p1720_p7 = pnand %p1719_p6, %p1713_p3 }
  0x69   : > { %1723 = shalt.err (!%p1720_p7)
}
  0x6a   : > { %s1816_s1 = smov 128   ;;  %s1817_s5 = smov 8  }
  0x6b   : > { %1553 = dma.hbm_to_vmem [thread:$0]  (%p1934_p9), %s2003_s7, 256, %s2007_s14, %s356_s0, %s1816_s1, %s1816_s1, %s1817_s5  }
  0x6c PF: > { %p1398_p5 = scmp.ge.s32.totalorder %s1810_s24, 1  ;;  %p374_p8 = scmp.lt.s32.totalorder %s1810_s24, 5 }
  0x6e   : > { %p375_p10 = pnand %p1398_p5, %p374_p8 }
  0x6f   : > { %s381_s26 = sand.u32 (!%p375_p10), 1, %s1786_s18   ;;  %s394_s15 = sand.u32 (!%p375_p10), 1, %s1778_s16  }
  0x70   : > { %378 = sbr.rel (%p375_p10) target bundleno = 507 (0x1fb), region = 110  ;;  %s1399_s29 = sshll.u32 (!%p375_p10), %s381_s26, 3 }
  0x71   : > { %s1551_s28 = smul.u32 (!%p375_p10), 88, %s394_s15  ;;  %s383_s27 = scalar_lea.vmem (!%p375_p10), [#allocation3], %s1399_s29 }
  0x72   : > { %s390_s25 = scalar_lea.vmem (!%p375_p10), [#allocation4], %s1399_s29  ;;  %s395_s8 = scalar_lea.sflag (!%p375_p10), [#allocation6], %s394_s15 }
  0x73   : > { %s2037_s9 = scalar_lea.vmem (!%p375_p10), [#allocation5], %s1551_s28 }
  0x77   : > { %1765 = dma.done.wait (%p1941_p11), %s395_s8, 1408  }
  0x78   : > { %1767 = vsyncadd (%p1941_p11), %s395_s8, 4294965888  ;;  %s1401_s0 = sshll.u32 %s394_s15, 4  ;;  %s404_s30 = scalar_lea.sflag [#allocation8], %s394_s15 }
  0x79   : > { %s2043_s7 = scalar_lea.vmem [#allocation7], %s1401_s0 }
  0x7a   : > { %1769 = dma.done.wait (%p1941_p11), %s404_s30, 256  }
  0x7b   : > { %1771 = vsyncadd (%p1941_p11), %s404_s30, 4294967040  ;;  %v1818_v4 = vmov 0.0   ;;  %vm1819_vm0 = vmmov 0   ;;  %v1655_v5 = vld [vmem:[%s383_s27] sm:$0xff]   ;;  %v1656_v6 = vld [vmem:[%s390_s25] sm:$0xff]   ;;  %s1820_s18 = smov 126  }
  0x7c   : > { %1483 = vmatprep.subr.bf16.mxu0 %v1818_v4  ;;  %1485 = vmatprep.mubr.msk.bf16.mxu0 %vm1819_vm0, %v1818_v4  ;;  %s1821_s14 = smov 127   ;;  %v1657_v7 = vld [vmem:[%s2037_s9] sm:$0xff]   ;;  %vm498_vm1 = vcmask 130048   ;;  %s1822_s11 = smov 125   ;;  %v1828_v8 = vmov 0   ;;  %v1162_v9 = vld [vmem:[%s2043_s7] sm:$0xff] }
  0x7d   : > { %1489 = vmatprep.subr.bf16.mxu1 %v1818_v4  ;;  %1491 = vmatprep.mubr.msk.bf16.mxu1 %vm1819_vm0, %v1818_v4  ;;  %s1823_s12 = smov 124   ;;  %s1824_s13 = smov 123   ;;  %v1163_v10 = vld [vmem:[%s2043_s7 + $0x8] sm:$0xff]  ;;  %vm618_vm2 = vcmask 1031168   ;;  %vm557_vm3 = vcmask 1039360   ;;  %v1658_v17 = vld [vmem:[%s2037_s9 + $0x8] sm:$0xff]  }
  0x7e   : > { %614 = vrot.lane.b32.xlu1 %v1655_v5, %s1820_s18  ;;  %553 = vrot.lane.b32.xlu0 %v1655_v5, %s1821_s14  ;;  %s1825_s1 = smov 122   ;;  %s1826_s5 = smov 121   ;;  %v1659_v18 = vld [vmem:[%s2037_s9 + $0x10] sm:$0xff]   ;;  %vm679_vm4 = vcmask 1022976   ;;  %vm740_vm5 = vcmask 1014784   ;;  %v1660_v25 = vld [vmem:[%s2037_s9 + $0x18] sm:$0xff]  }
  0x7f   : > { %1484 = vmatpush3.bf16.msra.mxu0 %v1655_v5  ;;  %s1827_s26 = smov 120   ;;  %1653 = vset.pattern.permute.xlu0 %v1828_v8  ;;  %s1829_s15 = smov 119   ;;  %v1661_v26 = vld [vmem:[%s2037_s9 + $0x20] sm:$0xff]   ;;  %vm801_vm6 = vcmask 1006592   ;;  %vm862_vm7 = vcmask 998400   ;;  %v1662_v33 = vld [vmem:[%s2037_s9 + $0x28] sm:$0xff]  }
  0x80   : > { %1495 = vmatprep.subr.bf16.mxu0 %v1818_v4  ;;  %1654 = vset.pattern.permute.xlu1 %v1828_v8  ;;  %s1830_s29 = smov 118   ;;  %v1663_v34 = vld [vmem:[%s2037_s9 + $0x30] sm:$0xff]   ;;  %vm923_vm8 = vcmask 990208   ;;  %vm984_vm9 = vcmask 982016   ;;  %v1664_v41 = vld [vmem:[%s2037_s9 + $0x38] sm:$0xff]   ;;  %v1665_v42 = vld [vmem:[%s2037_s9 + $0x40] sm:$0xff]  }
  0x81   : > { %vm1045_vm10 = vcmask 973824   ;;  %vm1106_vm11 = vcmask 965632   ;;  %v1666_v49 = vld [vmem:[%s2037_s9 + $0x48] sm:$0xff]   ;;  %v1667_v50 = vld [vmem:[%s2037_s9 + $0x50] sm:$0xff]   ;;  %p455_p9 = scmp.lt.s32.totalorder %s1798_s21, 1  ;;  %p457_p11 = scmp.lt.s32.totalorder %s1794_s20, 1 }
  0x82   : > { %616 = vrot.lane.b32.xlu1 %v1656_v6, %s1820_s18  ;;  %555 = vrot.lane.b32.xlu0 %v1656_v6, %s1821_s14 }
  0x83   : > { %1486 = vmatmul.mubr.msk.bf16.vlgmr.msra.gmra.mrb[0].mxu0 %vm498_vm1, %v1657_v7  ;;  %s2177_s21 = smov (!%p455_p9, %s1798_s21), 1  ;;  %s2179_s20 = smov (!%p457_p11, %s1794_s20), 1 }
  0x84   : > { %1497 = vmatprep.mubr.msk.bf16.mxu0 %vm1819_vm0, %v1818_v4  ;;  %s1402_s28 = sshll.u32 %s2179_s20, 1  ;;  %s1403_s27 = sshll.u32 %s2177_s21, 2 }
  0x85   : > { %s464_s25 = sadd.s32 %s1403_s27, %s1402_s28 }
  0x86   : > { %677 = vrot.lane.b32.xlu1 %v1656_v6, %s1822_s11  ;;  %675 = vrot.lane.b32.xlu0 %v1655_v5, %s1822_s11  ;;  %s1404_s8 = sshll.u32 %s464_s25, 2 }
  0x87   : > { %s466_s20 = scalar_lea.vmem %s2147_s4, %s1404_s8 }
  0x8a   : > { %738 = vrot.lane.b32.xlu1 %v1656_v6, %s1823_s12  ;;  %736 = vrot.lane.b32.xlu0 %v1655_v5, %s1823_s12 }
  0x8e   : > { %799 = vrot.lane.b32.xlu1 %v1656_v6, %s1824_s13  ;;  %797 = vrot.lane.b32.xlu0 %v1655_v5, %s1824_s13 }
  0x92   : > { %860 = vrot.lane.b32.xlu1 %v1656_v6, %s1825_s1  ;;  %858 = vrot.lane.b32.xlu0 %v1655_v5, %s1825_s1 }
  0x96   : > { %921 = vrot.lane.b32.xlu1 %v1656_v6, %s1826_s5  ;;  %919 = vrot.lane.b32.xlu0 %v1655_v5, %s1826_s5 }
  0x9a   : > { %982 = vrot.lane.b32.xlu1 %v1656_v6, %s1827_s26  ;;  %980 = vrot.lane.b32.xlu0 %v1655_v5, %s1827_s26 }
  0x9e   : > { %1043 = vrot.lane.b32.xlu1 %v1656_v6, %s1829_s15  ;;  %1041 = vrot.lane.b32.xlu0 %v1655_v5, %s1829_s15 }
  0xa2   : > { %1104 = vrot.lane.b32.xlu1 %v1656_v6, %s1830_s29  ;;  %1102 = vrot.lane.b32.xlu0 %v1655_v5, %s1830_s29 }
  0xa6   : > { %1166 = vperm.xlu0 %1653, %v1162_v9   ;;  %1171 = vperm.xlu1 %1654, %v1163_v10  }
  0xf0   : > { %v615_v11 = vpop.permute.xlu1 %614  ;;  %v554_v12 = vpop.permute.xlu0 %553 }
  0xf4   : > { %v617_v13 = vpop.permute.xlu1 %616  ;;  %v556_v14 = vpop.permute.xlu0 %555 }
  0xf5   : > { %v619_v15 = vsel %vm618_vm2, %v615_v11, %v617_v13  ;;  %v558_v16 = vsel %vm557_vm3, %v554_v12, %v556_v14 }
  0xf6   : > { %1490 = vmatpush3.bf16.msra.mxu1 %v558_v16  ;;  %1496 = vmatpush3.bf16.msra.mxu0 %v619_v15 }
  0xf7   : > { %1501 = vmatprep.subr.bf16.mxu1 %v1818_v4  ;;  %1507 = vmatprep.subr.bf16.mxu0 %v1818_v4 }
  0xf8   : > { %v678_v19 = vpop.permute.xlu1 %677  ;;  %v676_v20 = vpop.permute.xlu0 %675 }
  0xf9   : > { %v680_v21 = vsel %vm679_vm4, %v676_v20, %v678_v19  ;;  %1492 = vmatmul.mubr.msk.bf16.vlgmr.msra.gmra.mrb[0].mxu1 %vm498_vm1, %v1658_v17  ;;  %1498 = vmatmul.mubr.msk.bf16.vlgmr.msra.gmra.mrb[4].mxu0 %vm498_vm1, %v1659_v18 }
  0xfa   : > { %1502 = vmatpush3.bf16.msra.mxu1 %v680_v21  ;;  %1503 = vmatprep.mubr.msk.bf16.mxu1 %vm1819_vm0, %v1818_v4 }
  0xfb   : > { %1513 = vmatprep.subr.bf16.mxu1 %v1818_v4  ;;  %1509 = vmatprep.mubr.msk.bf16.mxu0 %vm1819_vm0, %v1818_v4 }
  0xfc   : > { %v739_v22 = vpop.permute.xlu1 %738  ;;  %v737_v23 = vpop.permute.xlu0 %736 }
  0xfd   : > { %v741_v24 = vsel %vm740_vm5, %v737_v23, %v739_v22 }
  0xfe   : > { %1508 = vmatpush3.bf16.msra.mxu0 %v741_v24 }
  0xff   : > { %1519 = vmatprep.subr.bf16.mxu0 %v1818_v4 }
 0x100   : > { %v800_v27 = vpop.permute.xlu1 %799  ;;  %v798_v28 = vpop.permute.xlu0 %797 }
 0x101   : > { %v802_v29 = vsel %vm801_vm6, %v798_v28, %v800_v27  ;;  %1504 = vmatmul.mubr.msk.bf16.vlgmr.msra.gmra.mrb[4].mxu1 %vm498_vm1, %v1660_v25  ;;  %1510 = vmatmul.mubr.msk.bf16.vlgmr.msra.gmra.mrb[8].mxu0 %vm498_vm1, %v1661_v26 }
 0x102   : > { %1514 = vmatpush3.bf16.msra.mxu1 %v802_v29  ;;  %1515 = vmatprep.mubr.msk.bf16.mxu1 %vm1819_vm0, %v1818_v4 }
 0x103   : > { %1525 = vmatprep.subr.bf16.mxu1 %v1818_v4  ;;  %1521 = vmatprep.mubr.msk.bf16.mxu0 %vm1819_vm0, %v1818_v4 }
 0x104   : > { %v861_v30 = vpop.permute.xlu1 %860  ;;  %v859_v31 = vpop.permute.xlu0 %858 }
 0x105   : > { %v863_v32 = vsel %vm862_vm7, %v859_v31, %v861_v30 }
 0x106   : > { %1520 = vmatpush3.bf16.msra.mxu0 %v863_v32 }
 0x107   : > { %1531 = vmatprep.subr.bf16.mxu0 %v1818_v4 }
 0x108   : > { %v922_v35 = vpop.permute.xlu1 %921  ;;  %v920_v36 = vpop.permute.xlu0 %919 }
 0x109   : > { %v924_v37 = vsel %vm923_vm8, %v920_v36, %v922_v35  ;;  %1516 = vmatmul.mubr.msk.bf16.vlgmr.msra.gmra.mrb[8].mxu1 %vm498_vm1, %v1662_v33  ;;  %1522 = vmatmul.mubr.msk.bf16.vlgmr.msra.gmra.mrb[12].mxu0 %vm498_vm1, %v1663_v34 }
 0x10a   : > { %1526 = vmatpush3.bf16.msra.mxu1 %v924_v37  ;;  %1527 = vmatprep.mubr.msk.bf16.mxu1 %vm1819_vm0, %v1818_v4 }
 0x10b   : > { %1537 = vmatprep.subr.bf16.mxu1 %v1818_v4  ;;  %1533 = vmatprep.mubr.msk.bf16.mxu0 %vm1819_vm0, %v1818_v4 }
 0x10c   : > { %v983_v38 = vpop.permute.xlu1 %982  ;;  %v981_v39 = vpop.permute.xlu0 %980 }
 0x10d   : > { %v985_v40 = vsel %vm984_vm9, %v981_v39, %v983_v38 }
 0x10e   : > { %1532 = vmatpush3.bf16.msra.mxu0 %v985_v40 }
 0x10f   : > { %1543 = vmatprep.subr.bf16.mxu0 %v1818_v4 }
 0x110   : > { %v1044_v43 = vpop.permute.xlu1 %1043  ;;  %v1042_v44 = vpop.permute.xlu0 %1041 }
 0x111   : > { %v1046_v45 = vsel %vm1045_vm10, %v1042_v44, %v1044_v43  ;;  %1528 = vmatmul.mubr.msk.bf16.vlgmr.msra.gmra.mrb[12].mxu1 %vm498_vm1, %v1664_v41  ;;  %1534 = vmatmul.mubr.msk.bf16.vlgmr.msra.gmra.mrb[16].mxu0 %vm498_vm1, %v1665_v42 }
 0x112   : > { %1538 = vmatpush3.bf16.msra.mxu1 %v1046_v45  ;;  %1539 = vmatprep.mubr.msk.bf16.mxu1 %vm1819_vm0, %v1818_v4 }
 0x113   : > { %1545 = vmatprep.mubr.msk.bf16.mxu0 %vm1819_vm0, %v1818_v4 }
 0x114   : > { %v1105_v46 = vpop.permute.xlu1 %1104  ;;  %v1103_v47 = vpop.permute.xlu0 %1102 }
 0x115   : > { %v1107_v48 = vsel %vm1106_vm11, %v1103_v47, %v1105_v46 }
 0x116   : > { %1544 = vmatpush3.bf16.msra.mxu0 %v1107_v48 }
 0x119   : > { %1540 = vmatmul.mubr.msk.bf16.vlgmr.msra.gmra.mrb[16].mxu1 %vm498_vm1, %v1666_v49  ;;  %1546 = vmatmul.mubr.msk.bf16.vlgmr.msra.gmra.mrb[20].mxu0 %vm498_vm1, %v1667_v50 }
 0x125   : > { %v1167_v39 = vpop.permute.xlu0 %1166 }
 0x156   : > { %v536_v51 = vpop.f32.mrb[0].mxu0 }
 0x157   : > { %v1487_v52 = vpop.f32.mrb[1].mxu0 }
 0x158   : > { %v539_v53 = vpop.f32.mrb[2].mxu0 }
 0x159   : > { %v1488_v54 = vpop.f32.mrb[3].mxu0 }
 0x1cc   : > { %v597_v55 = vpop.f32.mrb[0].mxu1  ;;  %v658_v56 = vpop.f32.mrb[4].mxu0 }
 0x1cd   : > { %v604_v57 = vadd.f32 %v597_v55, %v536_v51  ;;  %v1493_v58 = vpop.f32.mrb[1].mxu1  ;;  %v1499_v59 = vpop.f32.mrb[5].mxu0 }
 0x1ce   : > { %v600_v60 = vpop.f32.mrb[2].mxu1  ;;  %v661_v61 = vpop.f32.mrb[6].mxu0 }
 0x1cf   : > { %v605_v62 = vadd.f32 %v600_v60, %v539_v53  ;;  %v665_v63 = vadd.f32 %v658_v56, %v604_v57  ;;  %v1494_v0 = vpop.f32.mrb[3].mxu1  ;;  %v1500_v1 = vpop.f32.mrb[7].mxu0 }
 0x1d0   : > { %v1172_v51 = vpop.permute.xlu1 %1171 }
 0x1d1   : > { %v666_v2 = vadd.f32 %v661_v61, %v605_v62 }
 0x1d4   : > { %v719_v3 = vpop.f32.mrb[4].mxu1  ;;  %v780_v4 = vpop.f32.mrb[8].mxu0 }
 0x1d5   : > { %v726_v5 = vadd.f32 %v719_v3, %v665_v63  ;;  %v1505_v6 = vpop.f32.mrb[5].mxu1  ;;  %v1511_v7 = vpop.f32.mrb[9].mxu0 }
 0x1d6   : > { %v722_v8 = vpop.f32.mrb[6].mxu1  ;;  %v783_v9 = vpop.f32.mrb[10].mxu0 }
 0x1d7   : > { %v727_v10 = vadd.f32 %v722_v8, %v666_v2  ;;  %v787_v11 = vadd.f32 %v780_v4, %v726_v5  ;;  %v1506_v12 = vpop.f32.mrb[7].mxu1  ;;  %v1512_v13 = vpop.f32.mrb[11].mxu0 }
 0x1d9   : > { %v788_v14 = vadd.f32 %v783_v9, %v727_v10 }
 0x1dc   : > { %v841_v15 = vpop.f32.mrb[8].mxu1  ;;  %v902_v16 = vpop.f32.mrb[12].mxu0 }
 0x1dd   : > { %v848_v17 = vadd.f32 %v841_v15, %v787_v11  ;;  %v1517_v18 = vpop.f32.mrb[9].mxu1  ;;  %v1523_v19 = vpop.f32.mrb[13].mxu0 }
 0x1de   : > { %v844_v20 = vpop.f32.mrb[10].mxu1  ;;  %v905_v21 = vpop.f32.mrb[14].mxu0 }
 0x1df   : > { %v849_v22 = vadd.f32 %v844_v20, %v788_v14  ;;  %v909_v23 = vadd.f32 %v902_v16, %v848_v17  ;;  %v1518_v24 = vpop.f32.mrb[11].mxu1  ;;  %v1524_v25 = vpop.f32.mrb[15].mxu0 }
 0x1e1   : > { %v910_v26 = vadd.f32 %v905_v21, %v849_v22 }
 0x1e4   : > { %v963_v27 = vpop.f32.mrb[12].mxu1  ;;  %v1024_v28 = vpop.f32.mrb[16].mxu0 }
 0x1e5   : > { %v970_v29 = vadd.f32 %v963_v27, %v909_v23  ;;  %v1529_v30 = vpop.f32.mrb[13].mxu1  ;;  %v1535_v31 = vpop.f32.mrb[17].mxu0 }
 0x1e6   : > { %v966_v32 = vpop.f32.mrb[14].mxu1  ;;  %v1027_v33 = vpop.f32.mrb[18].mxu0 }
 0x1e7   : > { %v971_v34 = vadd.f32 %v966_v32, %v910_v26  ;;  %v1031_v35 = vadd.f32 %v1024_v28, %v970_v29  ;;  %v1530_v36 = vpop.f32.mrb[15].mxu1  ;;  %v1536_v37 = vpop.f32.mrb[19].mxu0 }
 0x1e9   : > { %v1032_v38 = vadd.f32 %v1027_v33, %v971_v34 }
 0x1ec   : > { %v1085_v40 = vpop.f32.mrb[16].mxu1  ;;  %v1146_v41 = vpop.f32.mrb[20].mxu0 }
 0x1ed   : > { %v1092_v42 = vadd.f32 %v1085_v40, %v1031_v35  ;;  %v1541_v43 = vpop.f32.mrb[17].mxu1  ;;  %v1547_v44 = vpop.f32.mrb[21].mxu0 }
 0x1ee   : > { %v1088_v45 = vpop.f32.mrb[18].mxu1  ;;  %v1149_v46 = vpop.f32.mrb[22].mxu0 }
 0x1ef   : > { %v1093_v47 = vadd.f32 %v1088_v45, %v1032_v38  ;;  %v1153_v48 = vadd.f32 %v1146_v41, %v1092_v42  ;;  %v1542_v49 = vpop.f32.mrb[19].mxu1  ;;  %v1548_v50 = vpop.f32.mrb[23].mxu0 }
 0x1f1   : > { %v1174_v52 = vadd.f32 %v1167_v39, %v1153_v48  ;;  %v1154_v53 = vadd.f32 %v1149_v46, %v1093_v47 }
 0x1f3   : > { %v1178_v54 = vmul.f32 0.2, %v1174_v52  ;;  %v1175_v55 = vadd.f32 %v1172_v51, %v1154_v53  ;;  %vm1176_vm12 = vcmp.ge.f32.partialorder %v1174_v52, 0.0 }
 0x1f5   : > { %vm1177_vm13 = vcmp.ge.f32.partialorder %v1175_v55, 0.0  ;;  %v1179_v56 = vmul.f32 0.2, %v1175_v55  ;;  %v1180_v57 = vsel %vm1176_vm12, %v1174_v52, %v1178_v54 }
 0x1f7   : > { %v1181_v58 = vsel %vm1177_vm13, %v1175_v55, %v1179_v56 }
 0x1f8   : > { %v1459_v59 = vpack.c.bf16 %v1181_v58, %v1180_v57 }
 0x1fa   : > { %1460 = vst [vmem:[%s466_s20] sm:$0xff] %v1459_v59  }
 0x1fb PF: > { %s20_s24 = sadd.s32 1, %s1810_s24   ;;  %s2159_s30 = sld [smem:[#allocation11_spill]] }
 0x1fc   : > { %p17_p12 = scmp.ge.s32.totalorder %s20_s24, 6   ;;  %s2160_s7 = sld [smem:[#allocation12_spill]] }
 0x1fd   : > { %s2161_s15 = smov %s1778_s16  ;;  %s2162_s16 = smov %s1782_s17 }
 0x1fe   : > { %s2163_s17 = smov %s1926_s6  ;;  %s2164_s18 = smov %s1790_s19 }
 0x1ff   : > { %s2165_s19 = smov %s1939_s10  ;;  %s2166_s20 = smov %s1802_s22 }
 0x200   : > { %s2167_s21 = smov %s1806_s23  ;;  %19 = sbr.rel (!%p17_p12) target bundleno = 11 (0xb), region = 205 }
 0x201   : > { %s2168_s22 = smov %s2159_s30 }
 0x202   : > { %s2169_s23 = smov %s2160_s7 }
 0x207   :  { %1227 = vsyncpa [#allocation6], 1 }
 0x208   :  { %1229 = vsyncpa [#allocation6 + $0x1], 1 }
 0x209   :  { %1230 = vsyncpa [#allocation8], 1 }
 0x20a   :  { %1232 = vsyncpa [#allocation8 + $0x1], 1 }

// kernel: melgan_discriminator_forward.7
= control target key start
LH: loop header
LB: loop body
LE: loop exit
PB: predicated region body
PF: predicated region fallthrough
CT: control target
= control target key end

     0   :  { %s1509_s15 = smov 0   ;;  %s1511_s16 = smov 0   ;;  %s1682_s0 = inlined_call_operand.vmem [shape: bf16[2,8,16,256], index: 0, kind: input, shape index: {}, may-alias: {0,1}]   ;;  %s1683_s1 = inlined_call_operand.vmem [shape: bf16[2,8,16,256], index: 1, kind: input, shape index: {}, may-alias: {0,1}]   ;;  %s1684_s2 = inlined_call_operand.vmem [shape: bf16[8,11,8,16], index: 2, kind: input, shape index: {}]   ;;  %s1685_s3 = inlined_call_operand.vmem [shape: f32[8,8,1], index: 3, kind: input, shape index: {}]   ;;  %s1686_s4 = inlined_call_operand.vmem [shape: bf16[2,8,8,128], index: 4, kind: output, shape index: {}]  }
   0x1   :  { %s1513_s17 = smov 0   ;;  %s1515_s18 = smov 0  }
   0x2   :  { %s1517_s19 = smov 0   ;;  %s1519_s20 = smov 0  }
   0x3   :  { %s1521_s21 = smov 0  }
   0x4 LB: > { %s36_s22 = sadd.s32 1, %s1461_s19  ;;  %s40_s23 = sadd.s32 1, %s1465_s20  ;;  %s1469_s21 = sphi %s1521_s21, %s14_s21   ;;  %s1465_s20 = sphi %s1519_s20, %s1693_s20   ;;  %s1461_s19 = sphi %s1517_s19, %s1692_s19   ;;  %s1457_s18 = sphi %s1515_s18, %s1691_s18   ;;  %s1453_s17 = sphi %s1513_s17, %s1690_s17   ;;  %s1449_s16 = sphi %s1511_s16, %s1689_s16   ;;  %s1445_s15 = sphi %s1509_s15, %s1688_s15  }
   0x5   : > { %p38_p0 = scmp.ge.s32.totalorder %s36_s22, 8  ;;  %p60_p1 = scmp.ne.s32.totalorder %s1449_s16, %s1445_s15 }
   0x6   : > { %p61_p2 = scmp.eq.s32.totalorder %s1469_s21, 0  ;;  %s53_s28 = sadd.s32 1, %s1449_s16 }
   0x7   : > { %s1695_s22 = smov (%p38_p0, %s36_s22), 0  ;;  %s1697_s23 = smov (!%p38_p0, %s40_s23), %s1465_s20 }
   0x8   : > { %p1552_p3 = por %p61_p2, %p60_p1  ;;  %p42_p4 = scmp.ge.s32.totalorder %s1697_s23, 2 }
   0x9   : > { %s45_s25 = ssub.s32 %s1461_s19, %s1695_s22  ;;  %p1211_p6 = scmp.ge.s32.totalorder %s1469_s21, 16 }
   0xa   : > { %s1699_s23 = smov (%p42_p4, %s1697_s23), 0 }
   0xb   : > { %s44_s26 = ssub.s32 %s1465_s20, %s1699_s23  ;;  %204 = sbr.rel (%p1211_p6) target bundleno = 34 (0x22), region = 16 }
   0xc   : > { %s46_s27 = sor.u32 %s45_s25, %s44_s26 }
   0xd   : > { %p51_p5 = scmp.eq.s32.totalorder %s46_s27, 0 }
   0xf   : > { %s1564_s29 = scalar_select %p51_p5, %s1449_s16, %s53_s28  }
  0x12   : > { %207 = sbr.rel (!%p1552_p3) target bundleno = 26 (0x1a), region = 20  ;;  %s209_s30 = sand.u32 (%p1552_p3), 1, %s1449_s16  }
  0x13   : > { %s1213_s5 = sshll.u32 (%p1552_p3), %s1461_s19, 2  ;;  %s1212_s6 = sshll.u32 (%p1552_p3), %s209_s30, 3 }
  0x14   : > { %s1214_s7 = sshll.u32 (%p1552_p3), %s1465_s20, 5  ;;  %s211_s13 = scalar_lea.vmem (%p1552_p3), [#allocation3], %s1212_s6 }
  0x15   : > { %s218_s8 = sadd.s32 (%p1552_p3), %s1214_s7, %s1213_s5 }
  0x16   : > { %s1215_s9 = sshll.u32 (%p1552_p3), %s218_s8, 2 }
  0x17   : > { %s220_s12 = scalar_lea.vmem (%p1552_p3), %s1682_s0, %s1215_s9 }
  0x18   : > { %v236_v0 = vld [vmem:[%s220_s12] sm:$0xf] (%p1552_p3)  ;;  %v238_v1 = vld [vmem:[%s220_s12 + $0x8] sm:$0xf] (%p1552_p3) }
  0x19   : > { %237 = vst [vmem:[%s211_s13] sm:$0xf] %v236_v0  ;;  %239 = vst [vmem:[%s211_s13 + $0x4] sm:$0xf] %v238_v1 }
  0x1a PF: > { %266 = sbr.rel (!%p1552_p3) target bundleno = 34 (0x22), region = 61  ;;  %s268_s14 = sand.u32 (%p1552_p3), 1, %s1449_s16  }
  0x1b   : > { %s1217_s25 = sshll.u32 (%p1552_p3), %s1461_s19, 2  ;;  %s1216_s26 = sshll.u32 (%p1552_p3), %s268_s14, 3 }
  0x1c   : > { %s1218_s27 = sshll.u32 (%p1552_p3), %s1465_s20, 5  ;;  %s270_s6 = scalar_lea.vmem (%p1552_p3), [#allocation4], %s1216_s26 }
  0x1d   : > { %s1095_s28 = sadd.s32 (%p1552_p3), %s1218_s27, %s1217_s25 }
  0x1e   : > { %s1219_s30 = sshll.u32 (%p1552_p3), %s1095_s28, 2 }
  0x1f   : > { %s1097_s8 = scalar_lea.vmem (%p1552_p3), %s1683_s1, %s1219_s30 }
  0x20   : > { %v1220_v2 = vld [vmem:[%s1097_s8 + $0x4] sm:$0xf] (%p1552_p3)  ;;  %v1221_v3 = vld [vmem:[%s1097_s8 + $0xc] sm:$0xf] (%p1552_p3) }
  0x21   : > { %297 = vst [vmem:[%s270_s6] sm:$0xf] %v1220_v2  ;;  %299 = vst [vmem:[%s270_s6 + $0x4] sm:$0xf] %v1221_v3 }
  0x22 PF: > { %p1222_p7 = scmp.ge.s32.totalorder %s1469_s21, 1  ;;  %p343_p8 = scmp.lt.s32.totalorder %s1469_s21, 17 }
  0x24   : > { %p344_p9 = pnand %p1222_p7, %p343_p8 }
  0x25   : > { %s350_s24 = sand.u32 (!%p344_p9), 1, %s1445_s15   ;;  %v1471_v4 = vmov (!%p344_p9), 0.0   ;;  %vm1472_vm0 = vmmov (!%p344_p9), 0   ;;  %s1473_s12 = smov (!%p344_p9), 126   ;;  %vm453_vm1 = vcmask (!%p344_p9), 130048   ;;  %v1481_v8 = vmov (!%p344_p9), 0  }
  0x26   : > { %347 = sbr.rel (%p344_p9) target bundleno = 420 (0x1a4), region = 110  ;;  %s1223_s9 = sshll.u32 (!%p344_p9), %s350_s24, 3  ;;  %1276 = vmatprep.subr.bf16.mxu0 (!%p344_p9), %v1471_v4  ;;  %1278 = vmatprep.mubr.msk.bf16.mxu0 (!%p344_p9), %vm1472_vm0, %v1471_v4  ;;  %vm557_vm2 = vcmask (!%p344_p9), 1031168   ;;  %vm504_vm3 = vcmask (!%p344_p9), 1039360   ;;  %vm610_vm4 = vcmask (!%p344_p9), 1022976   ;;  %vm663_vm5 = vcmask (!%p344_p9), 1014784  }
  0x27   : > { %1282 = vmatprep.subr.bf16.mxu1 (!%p344_p9), %v1471_v4  ;;  %1284 = vmatprep.mubr.msk.bf16.mxu1 (!%p344_p9), %vm1472_vm0, %v1471_v4  ;;  %s352_s10 = scalar_lea.vmem (!%p344_p9), [#allocation3], %s1223_s9  ;;  %s359_s11 = scalar_lea.vmem (!%p344_p9), [#allocation4], %s1223_s9  ;;  %vm716_vm6 = vcmask (!%p344_p9), 1006592   ;;  %vm769_vm7 = vcmask (!%p344_p9), 998400   ;;  %vm822_vm8 = vcmask (!%p344_p9), 990208   ;;  %vm875_vm9 = vcmask (!%p344_p9), 982016  }
  0x28   : > { %v1413_v5 = vld [vmem:[%s352_s10] sm:$0xff] (!%p344_p9)   ;;  %s1474_s15 = smov (!%p344_p9), 127   ;;  %v1414_v6 = vld [vmem:[%s359_s11] sm:$0xff] (!%p344_p9)   ;;  %p407_p10 = scmp.lt.s32.totalorder (!%p344_p9), %s1453_s17, 7  ;;  %1412 = vset.pattern.permute.xlu0 (!%p344_p9), %v1481_v8  ;;  %vm928_vm10 = vcmask (!%p344_p9), 973824   ;;  %vm981_vm11 = vcmask (!%p344_p9), 965632  }
  0x29   : > { %553 = vrot.lane.b32.xlu1 (!%p344_p9), %v1413_v5, %s1473_s12  ;;  %500 = vrot.lane.b32.xlu0 (!%p344_p9), %v1413_v5, %s1474_s15  ;;  %s1475_s14 = smov (!%p344_p9), 125   ;;  %s1476_s28 = smov (!%p344_p9), 124  }
  0x2a   : > { %1277 = vmatpush3.bf16.msra.mxu0 (!%p344_p9), %v1413_v5  ;;  %s1477_s30 = smov (!%p344_p9), 123   ;;  %s1478_s5 = smov (!%p344_p9), 122  }
  0x2b   : > { %1288 = vmatprep.subr.bf16.mxu0 (!%p344_p9), %v1471_v4  ;;  %s1479_s7 = smov (!%p344_p9), 121   ;;  %s1480_s8 = smov (!%p344_p9), 120  }
  0x2c   : > { %s1482_s24 = smov (!%p344_p9), 119   ;;  %p419_p11 = scmp.lt.s32.totalorder (!%p344_p9), %s1457_s18, 1 }
  0x2d   : > { %555 = vrot.lane.b32.xlu1 %v1414_v6, %s1473_s12  ;;  %502 = vrot.lane.b32.xlu0 %v1414_v6, %s1474_s15  ;;  %s1701_s17 = smov (!%p407_p10, %s1453_s17), 7  ;;  %s1483_s12 = smov 118  }
  0x2e   : > { %s1342_s13 = smul.u32 44, %s1701_s17  ;;  %s1226_s6 = sshll.u32 %s1701_s17, 3 }
  0x2f   : > { %s418_s11 = scalar_lea.vmem %s1685_s3, %s1226_s6  ;;  %s1703_s18 = smov (!%p419_p11, %s1457_s18), 1 }
  0x30   : > { %s1601_s27 = scalar_lea.vmem %s1684_s2, %s1342_s13  ;;  %v1033_v9 = vld [vmem:[%s418_s11] sm:$0xff]  ;;  %s1227_s15 = sshll.u32 %s1703_s18, 3 }
  0x31   : > { %608 = vrot.lane.b32.xlu1 %v1414_v6, %s1475_s14  ;;  %606 = vrot.lane.b32.xlu0 %v1413_v5, %s1475_s14  ;;  %v452_v7 = vld [vmem:[%s1601_s27] sm:$0xf]  ;;  %v1232_v16 = vld [vmem:[%s1601_s27 + $0x4] sm:$0xf]  ;;  %s427_s13 = sadd.s32 %s1227_s15, %s1701_s17 }
  0x32   : > { %1279 = vmatmul.mubr.msk.bf16.vlgmr.msra.gmra.mrb[0].mxu0 %vm453_vm1, %v452_v7  ;;  %v1234_v17 = vld [vmem:[%s1601_s27 + $0x8] sm:$0xf]  ;;  %v1236_v24 = vld [vmem:[%s1601_s27 + $0xc] sm:$0xf]  ;;  %v1238_v25 = vld [vmem:[%s1601_s27 + $0x10] sm:$0xf] }
  0x33   : > { %1290 = vmatprep.mubr.msk.bf16.mxu0 %vm1472_vm0, %v1471_v4  ;;  %v1240_v32 = vld [vmem:[%s1601_s27 + $0x14] sm:$0xf]  ;;  %v1242_v33 = vld [vmem:[%s1601_s27 + $0x18] sm:$0xf]  ;;  %v1244_v40 = vld [vmem:[%s1601_s27 + $0x1c] sm:$0xf] }
  0x34   : > { %v1246_v41 = vld [vmem:[%s1601_s27 + $0x20] sm:$0xf]  ;;  %v1248_v48 = vld [vmem:[%s1601_s27 + $0x24] sm:$0xf]  ;;  %v1250_v49 = vld [vmem:[%s1601_s27 + $0x28] sm:$0xf] }
  0x35   : > { %661 = vrot.lane.b32.xlu1 %v1414_v6, %s1476_s28  ;;  %659 = vrot.lane.b32.xlu0 %v1413_v5, %s1476_s28  ;;  %s1228_s14 = sshll.u32 %s427_s13, 2 }
  0x36   : > { %s429_s27 = scalar_lea.vmem %s1686_s4, %s1228_s14 }
  0x39   : > { %714 = vrot.lane.b32.xlu1 %v1414_v6, %s1477_s30  ;;  %712 = vrot.lane.b32.xlu0 %v1413_v5, %s1477_s30 }
  0x3d   : > { %767 = vrot.lane.b32.xlu1 %v1414_v6, %s1478_s5  ;;  %765 = vrot.lane.b32.xlu0 %v1413_v5, %s1478_s5 }
  0x41   : > { %820 = vrot.lane.b32.xlu1 %v1414_v6, %s1479_s7  ;;  %818 = vrot.lane.b32.xlu0 %v1413_v5, %s1479_s7 }
  0x45   : > { %873 = vrot.lane.b32.xlu1 %v1414_v6, %s1480_s8  ;;  %871 = vrot.lane.b32.xlu0 %v1413_v5, %s1480_s8 }
  0x49   : > { %926 = vrot.lane.b32.xlu1 %v1414_v6, %s1482_s24  ;;  %924 = vrot.lane.b32.xlu0 %v1413_v5, %s1482_s24 }
  0x4d   : > { %979 = vrot.lane.b32.xlu1 %v1414_v6, %s1483_s12  ;;  %977 = vrot.lane.b32.xlu0 %v1413_v5, %s1483_s12 }
  0x51   : > { %1036 = vperm.xlu0 %1412, %v1033_v9  }
  0x9b   : > { %v554_v10 = vpop.permute.xlu1 %553  ;;  %v501_v11 = vpop.permute.xlu0 %500 }
  0x9f   : > { %v556_v12 = vpop.permute.xlu1 %555  ;;  %v503_v13 = vpop.permute.xlu0 %502 }
  0xa0   : > { %v558_v14 = vsel %vm557_vm2, %v554_v10, %v556_v12  ;;  %v505_v15 = vsel %vm504_vm3, %v501_v11, %v503_v13 }
  0xa1   : > { %1283 = vmatpush3.bf16.msra.mxu1 %v505_v15  ;;  %1289 = vmatpush3.bf16.msra.mxu0 %v558_v14 }
  0xa2   : > { %1294 = vmatprep.subr.bf16.mxu1 %v1471_v4  ;;  %1300 = vmatprep.subr.bf16.mxu0 %v1471_v4 }
  0xa3   : > { %v609_v18 = vpop.permute.xlu1 %608  ;;  %v607_v19 = vpop.permute.xlu0 %606 }
  0xa4   : > { %v611_v20 = vsel %vm610_vm4, %v607_v19, %v609_v18  ;;  %1285 = vmatmul.mubr.msk.bf16.vlgmr.msra.gmra.mrb[0].mxu1 %vm453_vm1, %v1232_v16  ;;  %1291 = vmatmul.mubr.msk.bf16.vlgmr.msra.gmra.mrb[4].mxu0 %vm453_vm1, %v1234_v17 }
  0xa5   : > { %1295 = vmatpush3.bf16.msra.mxu1 %v611_v20  ;;  %1296 = vmatprep.mubr.msk.bf16.mxu1 %vm1472_vm0, %v1471_v4 }
  0xa6   : > { %1306 = vmatprep.subr.bf16.mxu1 %v1471_v4  ;;  %1302 = vmatprep.mubr.msk.bf16.mxu0 %vm1472_vm0, %v1471_v4 }
  0xa7   : > { %v662_v21 = vpop.permute.xlu1 %661  ;;  %v660_v22 = vpop.permute.xlu0 %659 }
  0xa8   : > { %v664_v23 = vsel %vm663_vm5, %v660_v22, %v662_v21 }
  0xa9   : > { %1301 = vmatpush3.bf16.msra.mxu0 %v664_v23 }
  0xaa   : > { %1312 = vmatprep.subr.bf16.mxu0 %v1471_v4 }
  0xab   : > { %v715_v26 = vpop.permute.xlu1 %714  ;;  %v713_v27 = vpop.permute.xlu0 %712 }
  0xac   : > { %v717_v28 = vsel %vm716_vm6, %v713_v27, %v715_v26  ;;  %1297 = vmatmul.mubr.msk.bf16.vlgmr.msra.gmra.mrb[4].mxu1 %vm453_vm1, %v1236_v24  ;;  %1303 = vmatmul.mubr.msk.bf16.vlgmr.msra.gmra.mrb[8].mxu0 %vm453_vm1, %v1238_v25 }
  0xad   : > { %1307 = vmatpush3.bf16.msra.mxu1 %v717_v28  ;;  %1308 = vmatprep.mubr.msk.bf16.mxu1 %vm1472_vm0, %v1471_v4 }
  0xae   : > { %1318 = vmatprep.subr.bf16.mxu1 %v1471_v4  ;;  %1314 = vmatprep.mubr.msk.bf16.mxu0 %vm1472_vm0, %v1471_v4 }
  0xaf   : > { %v768_v29 = vpop.permute.xlu1 %767  ;;  %v766_v30 = vpop.permute.xlu0 %765 }
  0xb0   : > { %v770_v31 = vsel %vm769_vm7, %v766_v30, %v768_v29 }
  0xb1   : > { %1313 = vmatpush3.bf16.msra.mxu0 %v770_v31 }
  0xb2   : > { %1324 = vmatprep.subr.bf16.mxu0 %v1471_v4 }
  0xb3   : > { %v821_v34 = vpop.permute.xlu1 %820  ;;  %v819_v35 = vpop.permute.xlu0 %818 }
  0xb4   : > { %v823_v36 = vsel %vm822_vm8, %v819_v35, %v821_v34  ;;  %1309 = vmatmul.mubr.msk.bf16.vlgmr.msra.gmra.mrb[8].mxu1 %vm453_vm1, %v1240_v32  ;;  %1315 = vmatmul.mubr.msk.bf16.vlgmr.msra.gmra.mrb[12].mxu0 %vm453_vm1, %v1242_v33 }
  0xb5   : > { %1319 = vmatpush3.bf16.msra.mxu1 %v823_v36  ;;  %1320 = vmatprep.mubr.msk.bf16.mxu1 %vm1472_vm0, %v1471_v4 }
  0xb6   : > { %1330 = vmatprep.subr.bf16.mxu1 %v1471_v4  ;;  %1326 = vmatprep.mubr.msk.bf16.mxu0 %vm1472_vm0, %v1471_v4 }
  0xb7   : > { %v874_v37 = vpop.permute.xlu1 %873  ;;  %v872_v38 = vpop.permute.xlu0 %871 }
  0xb8   : > { %v876_v39 = vsel %vm875_vm9, %v872_v38, %v874_v37 }
  0xb9   : > { %1325 = vmatpush3.bf16.msra.mxu0 %v876_v39 }
  0xba   : > { %1336 = vmatprep.subr.bf16.mxu0 %v1471_v4 }
  0xbb   : > { %v927_v42 = vpop.permute.xlu1 %926  ;;  %v925_v43 = vpop.permute.xlu0 %924 }
  0xbc   : > { %v929_v44 = vsel %vm928_vm10, %v925_v43, %v927_v42  ;;  %1321 = vmatmul.mubr.msk.bf16.vlgmr.msra.gmra.mrb[12].mxu1 %vm453_vm1, %v1244_v40  ;;  %1327 = vmatmul.mubr.msk.bf16.vlgmr.msra.gmra.mrb[16].mxu0 %vm453_vm1, %v1246_v41 }
  0xbd   : > { %1331 = vmatpush3.bf16.msra.mxu1 %v929_v44  ;;  %1332 = vmatprep.mubr.msk.bf16.mxu1 %vm1472_vm0, %v1471_v4 }
  0xbe   : > { %1338 = vmatprep.mubr.msk.bf16.mxu0 %vm1472_vm0, %v1471_v4 }
  0xbf   : > { %v980_v45 = vpop.permute.xlu1 %979  ;;  %v978_v46 = vpop.permute.xlu0 %977 }
  0xc0   : > { %v982_v47 = vsel %vm981_vm11, %v978_v46, %v980_v45 }
  0xc1   : > { %1337 = vmatpush3.bf16.msra.mxu0 %v982_v47 }
  0xc4   : > { %1333 = vmatmul.mubr.msk.bf16.vlgmr.msra.gmra.mrb[16].mxu1 %vm453_vm1, %v1248_v48  ;;  %1339 = vmatmul.mubr.msk.bf16.vlgmr.msra.gmra.mrb[20].mxu0 %vm453_vm1, %v1250_v49 }
  0xd0   : > { %v1037_v30 = vpop.permute.xlu0 %1036 }
 0x105   : > { %v491_v50 = vpop.f32.mrb[0].mxu0 }
 0x106   : > { %v1280_v51 = vpop.f32.mrb[1].mxu0 }
 0x107   : > { %v494_v52 = vpop.f32.mrb[2].mxu0 }
 0x108   : > { %v1281_v53 = vpop.f32.mrb[3].mxu0 }
 0x177   : > { %v544_v54 = vpop.f32.mrb[0].mxu1  ;;  %v597_v55 = vpop.f32.mrb[4].mxu0 }
 0x178   : > { %v550_v56 = vadd.f32 %v544_v54, %v491_v50  ;;  %v1286_v57 = vpop.f32.mrb[1].mxu1  ;;  %v1292_v58 = vpop.f32.mrb[5].mxu0 }
 0x179   : > { %v547_v59 = vpop.f32.mrb[2].mxu1  ;;  %v600_v60 = vpop.f32.mrb[6].mxu0 }
 0x17a   : > { %v603_v61 = vadd.f32 %v597_v55, %v550_v56  ;;  %v1287_v62 = vpop.f32.mrb[3].mxu1  ;;  %v1293_v63 = vpop.f32.mrb[7].mxu0 }
 0x17f   : > { %v650_v0 = vpop.f32.mrb[4].mxu1  ;;  %v703_v1 = vpop.f32.mrb[8].mxu0 }
 0x180   : > { %v656_v2 = vadd.f32 %v650_v0, %v603_v61  ;;  %v1298_v3 = vpop.f32.mrb[5].mxu1  ;;  %v1304_v4 = vpop.f32.mrb[9].mxu0 }
 0x181   : > { %v653_v5 = vpop.f32.mrb[6].mxu1  ;;  %v706_v6 = vpop.f32.mrb[10].mxu0 }
 0x182   : > { %v709_v7 = vadd.f32 %v703_v1, %v656_v2  ;;  %v1299_v8 = vpop.f32.mrb[7].mxu1  ;;  %v1305_v9 = vpop.f32.mrb[11].mxu0 }
 0x187   : > { %v756_v10 = vpop.f32.mrb[8].mxu1  ;;  %v809_v11 = vpop.f32.mrb[12].mxu0 }
 0x188   : > { %v762_v12 = vadd.f32 %v756_v10, %v709_v7  ;;  %v1310_v13 = vpop.f32.mrb[9].mxu1  ;;  %v1316_v14 = vpop.f32.mrb[13].mxu0 }
 0x189   : > { %v759_v15 = vpop.f32.mrb[10].mxu1  ;;  %v812_v16 = vpop.f32.mrb[14].mxu0 }
 0x18a   : > { %v815_v17 = vadd.f32 %v809_v11, %v762_v12  ;;  %v1311_v18 = vpop.f32.mrb[11].mxu1  ;;  %v1317_v19 = vpop.f32.mrb[15].mxu0 }
 0x18f   : > { %v862_v20 = vpop.f32.mrb[12].mxu1  ;;  %v915_v21 = vpop.f32.mrb[16].mxu0 }
 0x190   : > { %v868_v22 = vadd.f32 %v862_v20, %v815_v17  ;;  %v1322_v23 = vpop.f32.mrb[13].mxu1  ;;  %v1328_v24 = vpop.f32.mrb[17].mxu0 }
 0x191   : > { %v865_v25 = vpop.f32.mrb[14].mxu1  ;;  %v918_v26 = vpop.f32.mrb[18].mxu0 }
 0x192   : > { %v921_v27 = vadd.f32 %v915_v21, %v868_v22  ;;  %v1323_v28 = vpop.f32.mrb[15].mxu1  ;;  %v1329_v29 = vpop.f32.mrb[19].mxu0 }
 0x197   : > { %v968_v31 = vpop.f32.mrb[16].mxu1  ;;  %v1021_v32 = vpop.f32.mrb[20].mxu0 }
 0x198   : > { %v974_v33 = vadd.f32 %v968_v31, %v921_v27  ;;  %v1334_v34 = vpop.f32.mrb[17].mxu1  ;;  %v1340_v35 = vpop.f32.mrb[21].mxu0 }
 0x199   : > { %v971_v36 = vpop.f32.mrb[18].mxu1  ;;  %v1024_v37 = vpop.f32.mrb[22].mxu0 }
 0x19a   : > { %v1027_v38 = vadd.f32 %v1021_v32, %v974_v33  ;;  %v1335_v39 = vpop.f32.mrb[19].mxu1  ;;  %v1341_v40 = vpop.f32.mrb[23].mxu0 }
 0x19c   : > { %v1039_v41 = vadd.f32 %v1037_v30, %v1027_v38 }
 0x19e   : > { %vm1040_vm12 = vcmp.ge.f32.partialorder %v1039_v41, 0.0  ;;  %v1041_v42 = vmul.f32 0.2, %v1039_v41 }
 0x1a0   : > { %v1042_v43 = vsel %vm1040_vm12, %v1039_v41, %v1041_v42 }
 0x1a1   : > { %v1043_v44 = vpack.c.bf16 %v1042_v43, %v1042_v43 }
 0x1a3   : > { %1044 = vst [vmem:[%s429_s27] sm:$0xf] %v1043_v44 }
 0x1a4 PF: > { %s14_s21 = sadd.s32 1, %s1469_s21   ;;  %s1688_s15 = smov %s1449_s16 }
 0x1a5   : > { %p11_p12 = scmp.ge.s32.totalorder %s14_s21, 18   ;;  %s1689_s16 = smov %s1564_s29 }
 0x1a6   : > { %s1690_s17 = smov %s1461_s19  ;;  %s1691_s18 = smov %s1465_s20 }
 0x1a7   : > { %s1692_s19 = smov %s1695_s22  ;;  %s1693_s20 = smov %s1699_s23 }
 0x1a8   :  { %13 = sbr.rel (!%p11_p12) target bundleno = 4 (0x4), region = 185 }

// kernel: melgan_discriminator_forward.8
= control target key start
LH: loop header
LB: loop body
LE: loop exit
PB: predicated region body
PF: predicated region fallthrough
CT: control target
= control target key end

     0   :  { %s2000_s15 = smov 0   ;;  %s2002_s16 = smov 0   ;;  %s2200_s0 = inlined_call_operand.vmem [shape: bf16[2,1,64,256], index: 0, kind: input, shape index: {}, may-alias: {0,1}]   ;;  %s2201_s1 = inlined_call_operand.vmem [shape: bf16[2,1,64,256], index: 1, kind: input, shape index: {}, may-alias: {0,1}]   ;;  %s2202_s2 = inlined_call_operand.vmem [shape: bf16[1,5,64,64], index: 2, kind: input, shape index: {}]   ;;  %s2203_s3 = inlined_call_operand.vmem [shape: f32[1,64,1], index: 3, kind: input, shape index: {}]   ;;  %s2204_s4 = inlined_call_operand.vmem [shape: bf16[2,1,64,128], index: 4, kind: output, shape index: {}]  }
   0x1   :  { %s2004_s17 = smov 0   ;;  %s2006_s18 = smov 0  }
   0x2   :  { %s2008_s19 = smov 0  }
   0x3 LB: > { %s40_s20 = sadd.s32 1, %s1964_s18  ;;  %p60_p1 = scmp.ne.s32.totalorder %s1956_s16, %s1952_s15  ;;  %s1968_s19 = sphi %s2008_s19, %s14_s19   ;;  %s1964_s18 = sphi %s2006_s18, %s2209_s18   ;;  %s1960_s17 = sphi %s2004_s17, %s2208_s17   ;;  %s1956_s16 = sphi %s2002_s16, %s2207_s16   ;;  %s1952_s15 = sphi %s2000_s15, %s2206_s15  }
   0x4   : > { %p42_p0 = scmp.ge.s32.totalorder %s40_s20, 2  ;;  %p61_p2 = scmp.eq.s32.totalorder %s1968_s19, 0 }
   0x5   : > { %s53_s23 = sadd.s32 1, %s1956_s16  ;;  %p1551_p5 = scmp.ge.s32.totalorder %s1968_s19, 2 }
   0x6   : > { %s2211_s20 = smov (%p42_p0, %s40_s20), 0  ;;  %p2031_p3 = por %p61_p2, %p60_p1 }
   0x7   : > { %s44_s22 = ssub.s32 %s1964_s18, %s2211_s20  ;;  %223 = sbr.rel (%p1551_p5) target bundleno = 32 (0x20), region = 24 }
   0x8   : > { %p51_p4 = scmp.eq.s32.totalorder %s44_s22, 0 }
   0xa   : > { %s2039_s24 = scalar_select %p51_p4, %s1956_s16, %s53_s23  }
   0xe   : > { %226 = sbr.rel (!%p2031_p3) target bundleno = 23 (0x17), region = 28  ;;  %s228_s25 = sand.u32 (%p2031_p3), 1, %s1956_s16  }
   0xf   : > { %s1661_s26 = sshll.u32 (%p2031_p3), %s1964_s18, 6  ;;  %s1552_s27 = sshll.u32 (%p2031_p3), %s228_s25, 5 }
  0x10   : > { %s239_s30 = scalar_lea.vmem (%p2031_p3), %s2200_s0, %s1661_s26  ;;  %s230_s5 = scalar_lea.vmem (%p2031_p3), [#allocation3], %s1552_s27 }
  0x11   : > { %v255_v0 = vld [vmem:[%s239_s30] sm:$0xf] (%p2031_p3)  ;;  %v257_v1 = vld [vmem:[%s239_s30 + $0x8] sm:$0xf] (%p2031_p3)  ;;  %v259_v2 = vld [vmem:[%s239_s30 + $0x10] sm:$0xf] (%p2031_p3) }
  0x12   : > { %256 = vst [vmem:[%s230_s5] sm:$0xf] (%p2031_p3), %v255_v0  ;;  %258 = vst [vmem:[%s230_s5 + $0x4] sm:$0xf] (%p2031_p3), %v257_v1  ;;  %v261_v3 = vld [vmem:[%s239_s30 + $0x18] sm:$0xf] (%p2031_p3) }
  0x13   : > { %v263_v4 = vld [vmem:[%s239_s30 + $0x20] sm:$0xf] (%p2031_p3)  ;;  %260 = vst [vmem:[%s230_s5 + $0x8] sm:$0xf] (%p2031_p3), %v259_v2  ;;  %262 = vst [vmem:[%s230_s5 + $0xc] sm:$0xf] (%p2031_p3), %v261_v3 }
  0x14   : > { %264 = vst [vmem:[%s230_s5 + $0x10] sm:$0xf] (%p2031_p3), %v263_v4  ;;  %v265_v5 = vld [vmem:[%s239_s30 + $0x28] sm:$0xf] (%p2031_p3)  ;;  %v267_v6 = vld [vmem:[%s239_s30 + $0x30] sm:$0xf] (%p2031_p3) }
  0x15   : > { %v269_v7 = vld [vmem:[%s239_s30 + $0x38] sm:$0xf]  ;;  %266 = vst [vmem:[%s230_s5 + $0x14] sm:$0xf] %v265_v5  ;;  %268 = vst [vmem:[%s230_s5 + $0x18] sm:$0xf] %v267_v6 }
  0x16   : > { %270 = vst [vmem:[%s230_s5 + $0x1c] sm:$0xf] %v269_v7 }
  0x17 PF: > { %309 = sbr.rel (!%p2031_p3) target bundleno = 32 (0x20), region = 69  ;;  %s311_s6 = sand.u32 (%p2031_p3), 1, %s1956_s16  }
  0x18   : > { %s1662_s7 = sshll.u32 (%p2031_p3), %s1964_s18, 6  ;;  %s1555_s8 = sshll.u32 (%p2031_p3), %s311_s6, 5 }
  0x19   : > { %s1433_s11 = scalar_lea.vmem (%p2031_p3), %s2201_s1, %s1662_s7  ;;  %s313_s12 = scalar_lea.vmem (%p2031_p3), [#allocation4], %s1555_s8 }
  0x1a   : > { %v1558_v8 = vld [vmem:[%s1433_s11 + $0x4] sm:$0xf] (%p2031_p3)  ;;  %v1559_v9 = vld [vmem:[%s1433_s11 + $0xc] sm:$0xf] (%p2031_p3)  ;;  %v1560_v10 = vld [vmem:[%s1433_s11 + $0x14] sm:$0xf] (%p2031_p3) }
  0x1b   : > { %340 = vst [vmem:[%s313_s12] sm:$0xf] (%p2031_p3), %v1558_v8  ;;  %342 = vst [vmem:[%s313_s12 + $0x4] sm:$0xf] (%p2031_p3), %v1559_v9  ;;  %v1561_v11 = vld [vmem:[%s1433_s11 + $0x1c] sm:$0xf] (%p2031_p3) }
  0x1c   : > { %v1562_v12 = vld [vmem:[%s1433_s11 + $0x24] sm:$0xf] (%p2031_p3)  ;;  %344 = vst [vmem:[%s313_s12 + $0x8] sm:$0xf] (%p2031_p3), %v1560_v10  ;;  %346 = vst [vmem:[%s313_s12 + $0xc] sm:$0xf] (%p2031_p3), %v1561_v11 }
  0x1d   : > { %348 = vst [vmem:[%s313_s12 + $0x10] sm:$0xf] (%p2031_p3), %v1562_v12  ;;  %v1563_v13 = vld [vmem:[%s1433_s11 + $0x2c] sm:$0xf] (%p2031_p3)  ;;  %v1564_v14 = vld [vmem:[%s1433_s11 + $0x34] sm:$0xf] (%p2031_p3) }
  0x1e   : > { %v1565_v15 = vld [vmem:[%s1433_s11 + $0x3c] sm:$0xf]  ;;  %350 = vst [vmem:[%s313_s12 + $0x14] sm:$0xf] %v1563_v13  ;;  %352 = vst [vmem:[%s313_s12 + $0x18] sm:$0xf] %v1564_v14 }
  0x1f   : > { %354 = vst [vmem:[%s313_s12 + $0x1c] sm:$0xf] %v1565_v15 }
  0x20 PF: > { %p1566_p6 = scmp.ge.s32.totalorder %s1968_s19, 1  ;;  %p392_p7 = scmp.lt.s32.totalorder %s1968_s19, 3 }
  0x22   : > { %p393_p8 = pnand %p1566_p6, %p392_p7 }
  0x23   : > { %s399_s13 = sand.u32 (!%p393_p8), 1, %s1952_s15   ;;  %s1970_s22 = smov (!%p393_p8), 126   ;;  %vm592_vm0 = vcmask (!%p393_p8), 523264   ;;  %v1910_v23 = vld [vmem:[%s2202_s2] sm:$0xff] (!%p393_p8)   ;;  %v1911_v26 = vld [vmem:[%s2202_s2 + $0x8] sm:$0xff] (!%p393_p8)   ;;  %v1914_v27 = vld [vmem:[%s2202_s2 + $0x10] sm:$0xff] (!%p393_p8)  }
  0x24   : > { %396 = sbr.rel (%p393_p8) target bundleno = 448 (0x1c0), region = 110  ;;  %s1567_s14 = sshll.u32 (!%p393_p8), %s399_s13, 5  ;;  %v1912_v24 = vld [vmem:[%s2202_s2 + $0x40] sm:$0xff] (!%p393_p8)   ;;  %1743 = vmatprep.mubr.msk.bf16.mxu1 (!%p393_p8), %vm592_vm0, %v1910_v23  ;;  %v1915_v28 = vld [vmem:[%s2202_s2 + $0x18] sm:$0xff] (!%p393_p8)   ;;  %v1974_v30 = vmov (!%p393_p8), 0   ;;  %v1254_v31 = vld [vmem:[%s2203_s3 + $0x8] sm:$0xff] (!%p393_p8) }
  0x25   : > { %s401_s21 = scalar_lea.vmem (!%p393_p8), [#allocation3], %s1567_s14  ;;  %s408_s23 = scalar_lea.vmem (!%p393_p8), [#allocation4], %s1567_s14  ;;  %1775 = vmatprep.mubr.msk.bf16.mxu0 (!%p393_p8), %vm592_vm0, %v1912_v24  ;;  %v1918_v29 = vld [vmem:[%s2202_s2 + $0x20] sm:$0xff] (!%p393_p8)   ;;  %1901 = vset.pattern.permute.xlu1 (!%p393_p8), %v1974_v30  ;;  %v1255_v33 = vld [vmem:[%s2203_s3 + $0x10] sm:$0xff] (!%p393_p8)  ;;  %v1256_v34 = vld [vmem:[%s2203_s3 + $0x18] sm:$0xff] (!%p393_p8)  ;;  %vm862_vm1 = vcmask (!%p393_p8), 1031168  }
  0x26   : > { %v1902_v16 = vld [vmem:[%s401_s21 + $0x8] sm:$0xff] (!%p393_p8)   ;;  %v1903_v17 = vld [vmem:[%s401_s21] sm:$0xff] (!%p393_p8)   ;;  %v1906_v20 = vld [vmem:[%s408_s23 + $0x10] sm:$0xff] (!%p393_p8)   ;;  %s1971_s30 = smov (!%p393_p8), 127   ;;  %s1972_s5 = smov (!%p393_p8), 125   ;;  %1900 = vset.pattern.permute.xlu0 (!%p393_p8), %v1974_v30  ;;  %vm723_vm2 = vcmask (!%p393_p8), 1039360  }
  0x27   : > { %850 = vrot.lane.b32.xlu1 (!%p393_p8), %v1902_v16, %s1970_s22  ;;  %v1904_v18 = vld [vmem:[%s408_s23 + $0x8] sm:$0xff] (!%p393_p8)   ;;  %846 = vrot.lane.b32.xlu0 (!%p393_p8), %v1903_v17, %s1970_s22  ;;  %v1905_v19 = vld [vmem:[%s408_s23] sm:$0xff] (!%p393_p8)   ;;  %s1973_s12 = smov (!%p393_p8), 124   ;;  %vm1001_vm3 = vcmask (!%p393_p8), 1022976   ;;  %vm1140_vm4 = vcmask (!%p393_p8), 1014784   ;;  %p471_p9 = scmp.lt.s32.totalorder (!%p393_p8), %s1960_s17, 1 }
  0x28   : > { %1735 = vmatprep.subr.bf16.mxu1 (!%p393_p8), %v1903_v17  ;;  %v1907_v21 = vld [vmem:[%s401_s21 + $0x10] sm:$0xff] (!%p393_p8)   ;;  %v1908_v22 = vld [vmem:[%s408_s23 + $0x18] sm:$0xff] (!%p393_p8)   ;;  %v1253_v32 = vld [vmem:[%s2203_s3] sm:$0xff] (!%p393_p8) }
  0x29   : > { %1736 = vmatpush3.bf16.msra.mxu1 (!%p393_p8), %v1903_v17  ;;  %v1909_v25 = vld [vmem:[%s401_s21 + $0x18] sm:$0xff] (!%p393_p8)   ;;  %v1257_v35 = vld [vmem:[%s2203_s3 + $0x20] sm:$0xff] (!%p393_p8)  ;;  %v1258_v36 = vld [vmem:[%s2203_s3 + $0x28] sm:$0xff] (!%p393_p8) }
  0x2a   : > { %1737 = vmatprep.subr.bf16.mxu1 (!%p393_p8), %v1902_v16  ;;  %v1259_v37 = vld [vmem:[%s2203_s3 + $0x30] sm:$0xff] (!%p393_p8)  ;;  %v1260_v38 = vld [vmem:[%s2203_s3 + $0x38] sm:$0xff] (!%p393_p8)  ;;  %v1913_v54 = vld [vmem:[%s2202_s2 + $0x48] sm:$0xff] (!%p393_p8)  }
  0x2b   : > { %852 = vrot.lane.b32.xlu1 %v1904_v18, %s1970_s22  ;;  %848 = vrot.lane.b32.xlu0 %v1905_v19, %s1970_s22  ;;  %v1916_v56 = vld [vmem:[%s2202_s2 + $0x50] sm:$0xff]   ;;  %v1917_v62 = vld [vmem:[%s2202_s2 + $0x58] sm:$0xff]   ;;  %s2213_s17 = smov (!%p471_p9, %s1960_s17), 1 }
  0x2c   : > { %v1920_v0 = vld [vmem:[%s2202_s2 + $0x60] sm:$0xff]   ;;  %v1919_v12 = vld [vmem:[%s2202_s2 + $0x28] sm:$0xff]   ;;  %v1922_v14 = vld [vmem:[%s2202_s2 + $0x30] sm:$0xff]   ;;  %s1663_s23 = sshll.u32 %s2213_s17, 5 }
  0x2d   : > { %1738 = vmatpush3.bf16.msra.mxu1 %v1902_v16  ;;  %v1926_v30 = vld [vmem:[%s2202_s2 + $0x80] sm:$0xff]   ;;  %s482_s26 = scalar_lea.vmem %s2204_s4, %s1663_s23 }
  0x2e   : > { %1739 = vmatprep.subr.bf16.mxu1 %v1907_v21 }
  0x2f   : > { %856 = vrot.lane.b32.xlu1 %v1906_v20, %s1970_s22  ;;  %854 = vrot.lane.b32.xlu0 %v1907_v21, %s1970_s22 }
  0x31   : > { %1740 = vmatpush3.bf16.msra.mxu1 %v1907_v21 }
  0x32   : > { %1741 = vmatprep.subr.bf16.mxu1 %v1909_v25 }
  0x33   : > { %860 = vrot.lane.b32.xlu1 %v1908_v22, %s1970_s22  ;;  %858 = vrot.lane.b32.xlu0 %v1909_v25, %s1970_s22 }
  0x35   : > { %1742 = vmatpush3.bf16.msra.mxu1 %v1909_v25 }
  0x37   : > { %709 = vrot.lane.b32.xlu1 %v1905_v19, %s1971_s30  ;;  %707 = vrot.lane.b32.xlu0 %v1903_v17, %s1971_s30 }
  0x38   : > { %1744 = vmatmul.mubr.msk.bf16.vlgmr.msra.gmra.mrb[0].mxu1 %vm592_vm0, %v1911_v26 }
  0x39   : > { %1747 = vmatprep.mubr.msk.bf16.mxu1 %vm592_vm0, %v1914_v27  ;;  %v1925_v27 = vld [vmem:[%s2202_s2 + $0x78] sm:$0xff]  }
  0x3b   : > { %987 = vrot.lane.b32.xlu1 %v1905_v19, %s1972_s5  ;;  %985 = vrot.lane.b32.xlu0 %v1903_v17, %s1972_s5 }
  0x3f   : > { %713 = vrot.lane.b32.xlu1 %v1904_v18, %s1971_s30  ;;  %711 = vrot.lane.b32.xlu0 %v1902_v16, %s1971_s30 }
  0x40   : > { %1748 = vmatmul.mubr.msk.bf16.gmra.mrb[4].mxu1 %vm592_vm0, %v1915_v28 }
  0x41   : > { %1759 = vmatprep.mubr.msk.bf16.mxu1 %vm592_vm0, %v1918_v29 }
  0x43   : > { %991 = vrot.lane.b32.xlu1 %v1904_v18, %s1972_s5  ;;  %989 = vrot.lane.b32.xlu0 %v1902_v16, %s1972_s5 }
  0x47   : > { %717 = vrot.lane.b32.xlu1 %v1906_v20, %s1971_s30  ;;  %715 = vrot.lane.b32.xlu0 %v1907_v21, %s1971_s30 }
  0x4b   : > { %995 = vrot.lane.b32.xlu1 %v1906_v20, %s1972_s5  ;;  %993 = vrot.lane.b32.xlu0 %v1907_v21, %s1972_s5 }
  0x4f   : > { %721 = vrot.lane.b32.xlu1 %v1908_v22, %s1971_s30  ;;  %719 = vrot.lane.b32.xlu0 %v1909_v25, %s1971_s30 }
  0x53   : > { %999 = vrot.lane.b32.xlu1 %v1908_v22, %s1972_s5  ;;  %997 = vrot.lane.b32.xlu0 %v1909_v25, %s1972_s5 }
  0x57   : > { %1126 = vrot.lane.b32.xlu1 %v1905_v19, %s1973_s12  ;;  %1124 = vrot.lane.b32.xlu0 %v1903_v17, %s1973_s12  ;;  %v1921_v17 = vld [vmem:[%s2202_s2 + $0x68] sm:$0xff]  }
  0x5b   : > { %1130 = vrot.lane.b32.xlu1 %v1904_v18, %s1973_s12  ;;  %1128 = vrot.lane.b32.xlu0 %v1902_v16, %s1973_s12 }
  0x5f   : > { %1134 = vrot.lane.b32.xlu1 %v1906_v20, %s1973_s12  ;;  %1132 = vrot.lane.b32.xlu0 %v1907_v21, %s1973_s12  ;;  %v1924_v20 = vld [vmem:[%s2202_s2 + $0x70] sm:$0xff]  }
  0x63   : > { %1138 = vrot.lane.b32.xlu1 %v1908_v22, %s1973_s12  ;;  %1136 = vrot.lane.b32.xlu0 %v1909_v25, %s1973_s12  ;;  %v1923_v22 = vld [vmem:[%s2202_s2 + $0x38] sm:$0xff]   ;;  %v1927_v25 = vld [vmem:[%s2202_s2 + $0x90] sm:$0xff]  }
  0x67   : > { %1268 = vperm.xlu1 %1901, %v1254_v31   ;;  %1263 = vperm.xlu0 %1900, %v1253_v32  }
  0x6b   : > { %1273 = vperm.xlu1 %1901, %v1255_v33   ;;  %1278 = vperm.xlu0 %1900, %v1256_v34  }
  0x6f   : > { %1283 = vperm.xlu1 %1901, %v1257_v35   ;;  %1288 = vperm.xlu0 %1900, %v1258_v36   ;;  %v1928_v35 = vld [vmem:[%s2202_s2 + $0x88] sm:$0xff]   ;;  %v1929_v36 = vld [vmem:[%s2202_s2 + $0x98] sm:$0xff]  }
  0x73   : > { %1293 = vperm.xlu1 %1901, %v1259_v37   ;;  %1298 = vperm.xlu0 %1900, %v1260_v38  }
  0x99   : > { %v851_v39 = vpop.permute.xlu1 %850  ;;  %v847_v40 = vpop.permute.xlu0 %846 }
  0x9d   : > { %v853_v41 = vpop.permute.xlu1 %852  ;;  %v849_v42 = vpop.permute.xlu0 %848 }
  0x9e   : > { %v863_v43 = vsel %vm862_vm1, %v847_v40, %v849_v42  ;;  %v864_v45 = vsel %vm862_vm1, %v851_v39, %v853_v41 }
  0x9f   : > { %1767 = vmatprep.subr.bf16.mxu0 %v863_v43 }
  0xa0   : > { %1768 = vmatpush3.bf16.msra.mxu0 %v863_v43 }
  0xa1   : > { %v857_v44 = vpop.permute.xlu1 %856  ;;  %1769 = vmatprep.subr.bf16.mxu0 %v864_v45  ;;  %v855_v46 = vpop.permute.xlu0 %854 }
  0xa2   : > { %v865_v48 = vsel %vm862_vm1, %v855_v46, %v857_v44 }
  0xa4   : > { %1770 = vmatpush3.bf16.msra.mxu0 %v864_v45 }
  0xa5   : > { %v861_v47 = vpop.permute.xlu1 %860  ;;  %1771 = vmatprep.subr.bf16.mxu0 %v865_v48  ;;  %v859_v49 = vpop.permute.xlu0 %858 }
  0xa6   : > { %v866_v51 = vsel %vm862_vm1, %v859_v49, %v861_v47 }
  0xa8   : > { %1772 = vmatpush3.bf16.msra.mxu0 %v865_v48 }
  0xa9   : > { %v710_v50 = vpop.permute.xlu1 %709  ;;  %1773 = vmatprep.subr.bf16.mxu0 %v866_v51  ;;  %v708_v52 = vpop.permute.xlu0 %707 }
  0xaa   : > { %v724_v53 = vsel %vm723_vm2, %v708_v52, %v710_v50 }
  0xab   : > { %1751 = vmatprep.subr.bf16.mxu1 %v724_v53 }
  0xac   : > { %1752 = vmatpush3.bf16.msra.mxu1 %v724_v53  ;;  %1774 = vmatpush3.bf16.msra.mxu0 %v866_v51 }
  0xad   : > { %v988_v55 = vpop.permute.xlu1 %987  ;;  %v986_v57 = vpop.permute.xlu0 %985 }
  0xae   : > { %v1002_v58 = vsel %vm1001_vm3, %v986_v57, %v988_v55 }
  0xaf   : > { %1783 = vmatprep.subr.bf16.mxu0 %v1002_v58  ;;  %1776 = vmatmul.mubr.msk.bf16.vlgmr.msra.gmra.mrb[0].mxu0 %vm592_vm0, %v1913_v54 }
  0xb0   : > { %1784 = vmatpush3.bf16.msra.mxu0 %v1002_v58  ;;  %1779 = vmatprep.mubr.msk.bf16.mxu0 %vm592_vm0, %v1916_v56 }
  0xb1   : > { %v714_v59 = vpop.permute.xlu1 %713  ;;  %v712_v60 = vpop.permute.xlu0 %711 }
  0xb2   : > { %v725_v61 = vsel %vm723_vm2, %v712_v60, %v714_v59 }
  0xb3   : > { %1753 = vmatprep.subr.bf16.mxu1 %v725_v61 }
  0xb4   : > { %1754 = vmatpush3.bf16.msra.mxu1 %v725_v61 }
  0xb5   : > { %v992_v63 = vpop.permute.xlu1 %991  ;;  %v990_v1 = vpop.permute.xlu0 %989 }
  0xb6   : > { %v1003_v2 = vsel %vm1001_vm3, %v990_v1, %v992_v63 }
  0xb7   : > { %1785 = vmatprep.subr.bf16.mxu0 %v1003_v2  ;;  %1780 = vmatmul.mubr.msk.bf16.gmra.mrb[4].mxu0 %vm592_vm0, %v1917_v62 }
  0xb8   : > { %1786 = vmatpush3.bf16.msra.mxu0 %v1003_v2  ;;  %1791 = vmatprep.mubr.msk.bf16.mxu0 %vm592_vm0, %v1920_v0 }
  0xb9   : > { %v718_v3 = vpop.permute.xlu1 %717  ;;  %v716_v4 = vpop.permute.xlu0 %715 }
  0xba   : > { %v726_v5 = vsel %vm723_vm2, %v716_v4, %v718_v3 }
  0xbb   : > { %1755 = vmatprep.subr.bf16.mxu1 %v726_v5 }
  0xbc   : > { %1756 = vmatpush3.bf16.msra.mxu1 %v726_v5 }
  0xbd   : > { %v996_v6 = vpop.permute.xlu1 %995  ;;  %v994_v7 = vpop.permute.xlu0 %993 }
  0xbe   : > { %v1004_v8 = vsel %vm1001_vm3, %v994_v7, %v996_v6 }
  0xbf   : > { %1787 = vmatprep.subr.bf16.mxu0 %v1004_v8 }
  0xc0   : > { %1788 = vmatpush3.bf16.msra.mxu0 %v1004_v8 }
  0xc1   : > { %v722_v9 = vpop.permute.xlu1 %721  ;;  %v720_v10 = vpop.permute.xlu0 %719 }
  0xc2   : > { %v727_v11 = vsel %vm723_vm2, %v720_v10, %v722_v9 }
  0xc3   : > { %1757 = vmatprep.subr.bf16.mxu1 %v727_v11 }
  0xc4   : > { %1758 = vmatpush3.bf16.msra.mxu1 %v727_v11 }
  0xc5   : > { %v1000_v13 = vpop.permute.xlu1 %999  ;;  %v998_v15 = vpop.permute.xlu0 %997 }
  0xc6   : > { %v1005_v16 = vsel %vm1001_vm3, %v998_v15, %v1000_v13 }
  0xc7   : > { %1760 = vmatmul.mubr.msk.bf16.vlgmr.msra.gmra.mrb[0].mxu1 %vm592_vm0, %v1919_v12  ;;  %1789 = vmatprep.subr.bf16.mxu0 %v1005_v16 }
  0xc8   : > { %1790 = vmatpush3.bf16.msra.mxu0 %v1005_v16  ;;  %1763 = vmatprep.mubr.msk.bf16.mxu1 %vm592_vm0, %v1922_v14 }
  0xc9   : > { %v1127_v18 = vpop.permute.xlu1 %1126  ;;  %v1125_v19 = vpop.permute.xlu0 %1124 }
  0xca   : > { %v1141_v21 = vsel %vm1140_vm4, %v1125_v19, %v1127_v18 }
  0xcb   : > { %1792 = vmatmul.mubr.msk.bf16.vlgmr.msra.gmra.mrb[0].mxu0 %vm592_vm0, %v1921_v17  ;;  %1799 = vmatprep.subr.bf16.mxu0 %v1141_v21 }
  0xcc   : > { %1815 = vmatprep.subr.bf16.mxu1 %v1141_v21  ;;  %1800 = vmatpush3.bf16.msra.mxu0 %v1141_v21 }
  0xcd   : > { %v1131_v23 = vpop.permute.xlu1 %1130  ;;  %1819 = vmatpush3.bf16.msra.mxu1 %v1141_v21  ;;  %v1129_v24 = vpop.permute.xlu0 %1128  ;;  %1795 = vmatprep.mubr.msk.bf16.mxu0 %vm592_vm0, %v1924_v20 }
  0xce   : > { %v1142_v26 = vsel %vm1140_vm4, %v1129_v24, %v1131_v23 }
  0xcf   : > { %1764 = vmatmul.mubr.msk.bf16.gmra.mrb[4].mxu1 %vm592_vm0, %v1923_v22  ;;  %1801 = vmatprep.subr.bf16.mxu0 %v1142_v26 }
  0xd0   : > { %1816 = vmatprep.subr.bf16.mxu1 %v1142_v26  ;;  %1802 = vmatpush3.bf16.msra.mxu0 %v1142_v26 }
  0xd1   : > { %v1135_v28 = vpop.permute.xlu1 %1134  ;;  %1820 = vmatpush3.bf16.msra.mxu1 %v1142_v26  ;;  %v1133_v29 = vpop.permute.xlu0 %1132  ;;  %1811 = vmatprep.mubr.msk.bf16.mxu1 %vm592_vm0, %v1927_v25 }
  0xd2   : > { %v1143_v31 = vsel %vm1140_vm4, %v1133_v29, %v1135_v28 }
  0xd3   : > { %1796 = vmatmul.mubr.msk.bf16.gmra.mrb[4].mxu0 %vm592_vm0, %v1925_v27  ;;  %1803 = vmatprep.subr.bf16.mxu0 %v1143_v31 }
  0xd4   : > { %1817 = vmatprep.subr.bf16.mxu1 %v1143_v31  ;;  %1804 = vmatpush3.bf16.msra.mxu0 %v1143_v31 }
  0xd5   : > { %v1139_v32 = vpop.permute.xlu1 %1138  ;;  %1821 = vmatpush3.bf16.msra.mxu1 %v1143_v31  ;;  %v1137_v33 = vpop.permute.xlu0 %1136  ;;  %1807 = vmatprep.mubr.msk.bf16.mxu0 %vm592_vm0, %v1926_v30 }
  0xd6   : > { %v1144_v34 = vsel %vm1140_vm4, %v1137_v33, %v1139_v32 }
  0xd7   : > { %1805 = vmatprep.subr.bf16.mxu0 %v1144_v34  ;;  %1818 = vmatprep.subr.bf16.mxu1 %v1144_v34 }
  0xd8   : > { %1806 = vmatpush3.bf16.msra.mxu0 %v1144_v34 }
  0xd9   : > { %1822 = vmatpush3.bf16.msra.mxu1 %v1144_v34 }
  0xdb   : > { %1808 = vmatmul.mubr.msk.bf16.vlgmr.msra.gmra.mrb[0].mxu0 %vm592_vm0, %v1928_v35 }
  0xdc   : > { %1812 = vmatmul.mubr.msk.bf16.vlgmr.msra.gmra.mrb[8].mxu1 %vm592_vm0, %v1929_v36 }
  0xe6   : > { %v1269_v39 = vpop.permute.xlu1 %1268  ;;  %v1264_v42 = vpop.permute.xlu0 %1263 }
  0xea   : > { %v1274_v43 = vpop.permute.xlu1 %1273  ;;  %v1279_v49 = vpop.permute.xlu0 %1278 }
  0xee   : > { %v1284_v52 = vpop.permute.xlu1 %1283  ;;  %v1289_v58 = vpop.permute.xlu0 %1288 }
  0xf2   : > { %v1294_v59 = vpop.permute.xlu1 %1293  ;;  %v1299_v17 = vpop.permute.xlu0 %1298 }
 0x19a   : > { %v1761_v37 = vpop.f32.mrb[0].mxu1 }
 0x19b   : > { %v778_v38 = vpop.f32.mrb[1].mxu1 }
 0x19c   : > { %v1762_v40 = vpop.f32.mrb[2].mxu1 }
 0x19d   : > { %v781_v41 = vpop.f32.mrb[3].mxu1 }
 0x1a2   : > { %v1765_v44 = vpop.f32.mrb[4].mxu1 }
 0x1a3   : > { %v794_v45 = vpop.f32.mrb[5].mxu1 }
 0x1a4   : > { %v1766_v46 = vpop.f32.mrb[6].mxu1 }
 0x1a5   : > { %v797_v47 = vpop.f32.mrb[7].mxu1 }
 0x1a6   : > { %v1797_v48 = vpop.f32.mrb[4].mxu0 }
 0x1a7   : > { %v1827_v50 = vadd.f32 %v1797_v48, %v1765_v44  ;;  %v1072_v51 = vpop.f32.mrb[5].mxu0 }
 0x1a8   : > { %v1829_v53 = vadd.f32 %v1072_v51, %v794_v45  ;;  %v1798_v54 = vpop.f32.mrb[6].mxu0 }
 0x1a9   : > { %v1831_v55 = vadd.f32 %v1798_v54, %v1766_v46  ;;  %v1075_v56 = vpop.f32.mrb[7].mxu0 }
 0x1aa   : > { %v1833_v57 = vadd.f32 %v1075_v56, %v797_v47 }
 0x1ae   : > { %v1809_v60 = vpop.f32.mrb[0].mxu0 }
 0x1af   : > { %v1823_v61 = vadd.f32 %v1809_v60, %v1761_v37  ;;  %v1813_v62 = vpop.f32.mrb[8].mxu1  ;;  %v1195_v63 = vpop.f32.mrb[1].mxu0 }
 0x1b0   : > { %v1828_v0 = vadd.f32 %v1827_v50, %v1813_v62  ;;  %v1824_v1 = vadd.f32 %v1195_v63, %v778_v38  ;;  %v1211_v2 = vpop.f32.mrb[9].mxu1  ;;  %v1810_v3 = vpop.f32.mrb[2].mxu0 }
 0x1b1   : > { %v1303_v4 = vadd.f32 %v1823_v61, %v1274_v43  ;;  %v1830_v5 = vadd.f32 %v1829_v53, %v1211_v2  ;;  %v1825_v6 = vadd.f32 %v1810_v3, %v1762_v40  ;;  %v1814_v7 = vpop.f32.mrb[10].mxu1  ;;  %v1198_v8 = vpop.f32.mrb[3].mxu0 }
 0x1b2   : > { %v1307_v9 = vadd.f32 %v1828_v0, %v1294_v59  ;;  %v1301_v10 = vadd.f32 %v1824_v1, %v1264_v42  ;;  %v1832_v11 = vadd.f32 %v1831_v55, %v1814_v7  ;;  %v1826_v12 = vadd.f32 %v1198_v8, %v781_v41  ;;  %v1214_v13 = vpop.f32.mrb[11].mxu1 }
 0x1b3   : > { %v1319_v14 = vmul.f32 0.2, %v1303_v4  ;;  %v1304_v15 = vadd.f32 %v1825_v6, %v1279_v49  ;;  %vm1311_vm5 = vcmp.ge.f32.partialorder %v1303_v4, 0.0  ;;  %v1305_v16 = vadd.f32 %v1830_v5, %v1284_v52 }
 0x1b4   : > { %vm1315_vm6 = vcmp.ge.f32.partialorder %v1307_v9, 0.0  ;;  %v1323_v18 = vmul.f32 0.2, %v1307_v9  ;;  %v1317_v19 = vmul.f32 0.2, %v1301_v10  ;;  %v1308_v21 = vadd.f32 %v1832_v11, %v1299_v17 }
 0x1b5   : > { %vm1312_vm7 = vcmp.ge.f32.partialorder %v1304_v15, 0.0  ;;  %v1320_v20 = vmul.f32 0.2, %v1304_v15  ;;  %v1327_v22 = vsel %vm1311_vm5, %v1303_v4, %v1319_v14  ;;  %vm1309_vm8 = vcmp.ge.f32.partialorder %v1301_v10, 0.0 }
 0x1b6   : > { %v1302_v23 = vadd.f32 %v1826_v12, %v1269_v39  ;;  %v1834_v24 = vadd.f32 %v1833_v57, %v1214_v13  ;;  %v1321_v25 = vmul.f32 0.2, %v1305_v16  ;;  %vm1316_vm9 = vcmp.ge.f32.partialorder %v1308_v21, 0.0 }
 0x1b7   : > { %v1328_v26 = vsel %vm1312_vm7, %v1304_v15, %v1320_v20  ;;  %v1324_v27 = vmul.f32 0.2, %v1308_v21  ;;  %v1331_v31 = vsel %vm1315_vm6, %v1307_v9, %v1323_v18  ;;  %v1325_v32 = vsel %vm1309_vm8, %v1301_v10, %v1317_v19 }
 0x1b8   : > { %v1680_v28 = vpack.c.bf16 %v1328_v26, %v1327_v22  ;;  %vm1310_vm10 = vcmp.ge.f32.partialorder %v1302_v23, 0.0  ;;  %v1318_v29 = vmul.f32 0.2, %v1302_v23  ;;  %v1306_v30 = vadd.f32 %v1834_v24, %v1289_v58 }
 0x1b9   : > { %vm1313_vm11 = vcmp.ge.f32.partialorder %v1305_v16, 0.0  ;;  %v1332_v33 = vsel %vm1316_vm9, %v1308_v21, %v1324_v27 }
 0x1ba   : > { %1692 = vst [vmem:[%s482_s26 + $0x8] sm:$0xff] %v1680_v28   ;;  %v1690_v34 = vpack.c.bf16 %v1332_v33, %v1331_v31  ;;  %v1326_v35 = vsel %vm1310_vm10, %v1302_v23, %v1318_v29  ;;  %vm1314_vm12 = vcmp.ge.f32.partialorder %v1306_v30, 0.0  ;;  %v1322_v36 = vmul.f32 0.2, %v1306_v30 }
 0x1bb   : > { %v1675_v37 = vpack.c.bf16 %v1326_v35, %v1325_v32  ;;  %v1329_v38 = vsel %vm1313_vm11, %v1305_v16, %v1321_v25 }
 0x1bc   : > { %1694 = vst [vmem:[%s482_s26 + $0x18] sm:$0xff] %v1690_v34   ;;  %v1330_v39 = vsel %vm1314_vm12, %v1306_v30, %v1322_v36 }
 0x1bd   : > { %1676 = vst [vmem:[%s482_s26] sm:$0xff] %v1675_v37   ;;  %v1685_v40 = vpack.c.bf16 %v1330_v39, %v1329_v38 }
 0x1bf   : > { %1693 = vst [vmem:[%s482_s26 + $0x10] sm:$0xff] %v1685_v40  }
 0x1c0 PF: > { %s14_s19 = sadd.s32 1, %s1968_s19   ;;  %s2206_s15 = smov %s1956_s16 }
 0x1c1   : > { %p11_p10 = scmp.ge.s32.totalorder %s14_s19, 4   ;;  %s2207_s16 = smov %s2039_s24 }
 0x1c2   : > { %s2208_s17 = smov %s1964_s18  ;;  %s2209_s18 = smov %s2211_s20 }
 0x1c3   :  { %13 = sbr.rel (!%p11_p10) target bundleno = 3 (0x3), region = 179 }

// kernel: melgan_discriminator_forward.9
= control target key start
LH: loop header
LB: loop body
LE: loop exit
PB: predicated region body
PF: predicated region fallthrough
CT: control target
= control target key end

     0   :  { %s1122_s15 = smov 0   ;;  %s1124_s16 = smov 0   ;;  %s1264_s0 = inlined_call_operand.vmem [shape: bf16[2,1,64,256], index: 0, kind: input, shape index: {}, may-alias: {0,1}]   ;;  %s1265_s1 = inlined_call_operand.vmem [shape: bf16[2,1,64,256], index: 1, kind: input, shape index: {}, may-alias: {0,1}]   ;;  %s1266_s2 = inlined_call_operand.vmem [shape: bf16[1,3,8,64], index: 2, kind: input, shape index: {}]   ;;  %s1267_s3 = inlined_call_operand.vmem [shape: f32[1,8,1], index: 3, kind: input, shape index: {}]   ;;  %s1268_s4 = inlined_call_operand.vmem [shape: bf16[2,1,8,128], index: 4, kind: output, shape index: {}]  }
   0x1   :  { %s1126_s17 = smov 0   ;;  %s1128_s18 = smov 0  }
   0x2   :  { %s1130_s19 = smov 0  }
   0x3 LB: > { %s40_s20 = sadd.s32 1, %s1086_s18  ;;  %p60_p1 = scmp.ne.s32.totalorder %s1078_s16, %s1074_s15  ;;  %s1090_s19 = sphi %s1130_s19, %s14_s19   ;;  %s1086_s18 = sphi %s1128_s18, %s1273_s18   ;;  %s1082_s17 = sphi %s1126_s17, %s1272_s17   ;;  %s1078_s16 = sphi %s1124_s16, %s1271_s16   ;;  %s1074_s15 = sphi %s1122_s15, %s1270_s15  }
   0x4   : > { %p42_p0 = scmp.ge.s32.totalorder %s40_s20, 2  ;;  %p61_p2 = scmp.eq.s32.totalorder %s1090_s19, 0 }
   0x5   : > { %s53_s23 = sadd.s32 1, %s1078_s16  ;;  %p911_p5 = scmp.ge.s32.totalorder %s1090_s19, 2 }
   0x6   : > { %s1275_s20 = smov (%p42_p0, %s40_s20), 0  ;;  %p1153_p3 = por %p61_p2, %p60_p1 }
   0x7   : > { %s44_s22 = ssub.s32 %s1086_s18, %s1275_s20  ;;  %222 = sbr.rel (%p911_p5) target bundleno = 32 (0x20), region = 24 }
   0x8   : > { %p51_p4 = scmp.eq.s32.totalorder %s44_s22, 0 }
   0xa   : > { %s1161_s24 = scalar_select %p51_p4, %s1078_s16, %s53_s23  }
   0xe   : > { %225 = sbr.rel (!%p1153_p3) target bundleno = 23 (0x17), region = 28  ;;  %s227_s25 = sand.u32 (%p1153_p3), 1, %s1078_s16  }
   0xf   : > { %s945_s26 = sshll.u32 (%p1153_p3), %s1086_s18, 6  ;;  %s912_s27 = sshll.u32 (%p1153_p3), %s227_s25, 5 }
  0x10   : > { %s238_s30 = scalar_lea.vmem (%p1153_p3), %s1264_s0, %s945_s26  ;;  %s229_s5 = scalar_lea.vmem (%p1153_p3), [#allocation3], %s912_s27 }
  0x11   : > { %v254_v0 = vld [vmem:[%s238_s30] sm:$0xf] (%p1153_p3)  ;;  %v256_v1 = vld [vmem:[%s238_s30 + $0x8] sm:$0xf] (%p1153_p3)  ;;  %v258_v2 = vld [vmem:[%s238_s30 + $0x10] sm:$0xf] (%p1153_p3) }
  0x12   : > { %255 = vst [vmem:[%s229_s5] sm:$0xf] (%p1153_p3), %v254_v0  ;;  %257 = vst [vmem:[%s229_s5 + $0x4] sm:$0xf] (%p1153_p3), %v256_v1  ;;  %v260_v3 = vld [vmem:[%s238_s30 + $0x18] sm:$0xf] (%p1153_p3) }
  0x13   : > { %v262_v4 = vld [vmem:[%s238_s30 + $0x20] sm:$0xf] (%p1153_p3)  ;;  %259 = vst [vmem:[%s229_s5 + $0x8] sm:$0xf] (%p1153_p3), %v258_v2  ;;  %261 = vst [vmem:[%s229_s5 + $0xc] sm:$0xf] (%p1153_p3), %v260_v3 }
  0x14   : > { %263 = vst [vmem:[%s229_s5 + $0x10] sm:$0xf] (%p1153_p3), %v262_v4  ;;  %v264_v5 = vld [vmem:[%s238_s30 + $0x28] sm:$0xf] (%p1153_p3)  ;;  %v266_v6 = vld [vmem:[%s238_s30 + $0x30] sm:$0xf] (%p1153_p3) }
  0x15   : > { %v268_v7 = vld [vmem:[%s238_s30 + $0x38] sm:$0xf]  ;;  %265 = vst [vmem:[%s229_s5 + $0x14] sm:$0xf] %v264_v5  ;;  %267 = vst [vmem:[%s229_s5 + $0x18] sm:$0xf] %v266_v6 }
  0x16   : > { %269 = vst [vmem:[%s229_s5 + $0x1c] sm:$0xf] %v268_v7 }
  0x17 PF: > { %308 = sbr.rel (!%p1153_p3) target bundleno = 32 (0x20), region = 69  ;;  %s310_s6 = sand.u32 (%p1153_p3), 1, %s1078_s16  }
  0x18   : > { %s946_s7 = sshll.u32 (%p1153_p3), %s1086_s18, 6  ;;  %s915_s8 = sshll.u32 (%p1153_p3), %s310_s6, 5 }
  0x19   : > { %s801_s11 = scalar_lea.vmem (%p1153_p3), %s1265_s1, %s946_s7  ;;  %s312_s12 = scalar_lea.vmem (%p1153_p3), [#allocation4], %s915_s8 }
  0x1a   : > { %v918_v8 = vld [vmem:[%s801_s11 + $0x4] sm:$0xf] (%p1153_p3)  ;;  %v919_v9 = vld [vmem:[%s801_s11 + $0xc] sm:$0xf] (%p1153_p3)  ;;  %v920_v10 = vld [vmem:[%s801_s11 + $0x14] sm:$0xf] (%p1153_p3) }
  0x1b   : > { %339 = vst [vmem:[%s312_s12] sm:$0xf] (%p1153_p3), %v918_v8  ;;  %341 = vst [vmem:[%s312_s12 + $0x4] sm:$0xf] (%p1153_p3), %v919_v9  ;;  %v921_v11 = vld [vmem:[%s801_s11 + $0x1c] sm:$0xf] (%p1153_p3) }
  0x1c   : > { %v922_v12 = vld [vmem:[%s801_s11 + $0x24] sm:$0xf] (%p1153_p3)  ;;  %343 = vst [vmem:[%s312_s12 + $0x8] sm:$0xf] (%p1153_p3), %v920_v10  ;;  %345 = vst [vmem:[%s312_s12 + $0xc] sm:$0xf] (%p1153_p3), %v921_v11 }
  0x1d   : > { %347 = vst [vmem:[%s312_s12 + $0x10] sm:$0xf] (%p1153_p3), %v922_v12  ;;  %v923_v13 = vld [vmem:[%s801_s11 + $0x2c] sm:$0xf] (%p1153_p3)  ;;  %v924_v14 = vld [vmem:[%s801_s11 + $0x34] sm:$0xf] (%p1153_p3) }
  0x1e   : > { %v925_v15 = vld [vmem:[%s801_s11 + $0x3c] sm:$0xf]  ;;  %349 = vst [vmem:[%s312_s12 + $0x14] sm:$0xf] %v923_v13  ;;  %351 = vst [vmem:[%s312_s12 + $0x18] sm:$0xf] %v924_v14 }
  0x1f   : > { %353 = vst [vmem:[%s312_s12 + $0x1c] sm:$0xf] %v925_v15 }
  0x20 PF: > { %p926_p6 = scmp.ge.s32.totalorder %s1090_s19, 1  ;;  %p391_p7 = scmp.lt.s32.totalorder %s1090_s19, 3 }
  0x22   : > { %p392_p8 = pnand %p926_p6, %p391_p7 }
  0x23   : > { %s398_s13 = sand.u32 (!%p392_p8), 1, %s1074_s15   ;;  %v1092_v16 = vmov (!%p392_p8), 0.0   ;;  %vm1093_vm0 = vmmov (!%p392_p8), 0   ;;  %s1094_s15 = smov (!%p392_p8), 126   ;;  %v543_v24 = vld [vmem:[%s1266_s2] sm:$0xf] (!%p392_p8) }
  0x24   : > { %395 = sbr.rel (%p392_p8) target bundleno = 405 (0x195), region = 110  ;;  %s927_s14 = sshll.u32 (!%p392_p8), %s398_s13, 5  ;;  %962 = vmatprep.subr.bf16.mxu0 (!%p392_p8), %v1092_v16  ;;  %970 = vmatprep.mubr.msk.bf16.mxu0 (!%p392_p8), %vm1093_vm0, %v1092_v16  ;;  %vm544_vm1 = vcmask (!%p392_p8), 523264   ;;  %v1096_v26 = vmov (!%p392_p8), 0   ;;  %v736_v27 = vld [vmem:[%s1267_s3] sm:$0xff] (!%p392_p8)  ;;  %vm678_vm2 = vcmask (!%p392_p8), 1031168  }
  0x25   : > { %974 = vmatprep.subr.bf16.mxu1 (!%p392_p8), %v1092_v16  ;;  %982 = vmatprep.mubr.msk.bf16.mxu1 (!%p392_p8), %vm1093_vm0, %v1092_v16  ;;  %s400_s21 = scalar_lea.vmem (!%p392_p8), [#allocation3], %s927_s14  ;;  %s1187_s22 = scalar_lea.vmem (!%p392_p8), [#allocation4], %s927_s14  ;;  %vm607_vm3 = vcmask (!%p392_p8), 1039360   ;;  %v939_v49 = vld [vmem:[%s1266_s2 + $0x4] sm:$0xf] (!%p392_p8) }
  0x26   : > { %v1044_v17 = vld [vmem:[%s400_s21] sm:$0xff] (!%p392_p8)   ;;  %s1095_s23 = smov (!%p392_p8), 127   ;;  %v1047_v19 = vld [vmem:[%s400_s21 + $0x8] sm:$0xff] (!%p392_p8)   ;;  %v1049_v21 = vld [vmem:[%s400_s21 + $0x10] sm:$0xff] (!%p392_p8)   ;;  %1043 = vset.pattern.permute.xlu0 (!%p392_p8), %v1096_v26  ;;  %p466_p9 = scmp.lt.s32.totalorder (!%p392_p8), %s1082_s17, 1 }
  0x27   : > { %v1045_v18 = vld [vmem:[%s1187_s22] sm:$0xff] (!%p392_p8)   ;;  %662 = vrot.lane.b32.xlu1 (!%p392_p8), %v1044_v17, %s1094_s15  ;;  %591 = vrot.lane.b32.xlu0 (!%p392_p8), %v1044_v17, %s1095_s23  ;;  %v1046_v20 = vld [vmem:[%s1187_s22 + $0x8] sm:$0xff] (!%p392_p8)  }
  0x28   : > { %963 = vmatpush3.bf16.msra.mxu0 (!%p392_p8), %v1044_v17  ;;  %v1051_v22 = vld [vmem:[%s400_s21 + $0x18] sm:$0xff] (!%p392_p8)   ;;  %v1048_v23 = vld [vmem:[%s1187_s22 + $0x10] sm:$0xff] (!%p392_p8)   ;;  %v941_v53 = vld [vmem:[%s1266_s2 + $0x8] sm:$0xf] (!%p392_p8) }
  0x29   : > { %964 = vmatprep.subr.bf16.mxu0 (!%p392_p8), %v1092_v16  ;;  %v1050_v25 = vld [vmem:[%s1187_s22 + $0x18] sm:$0xff] (!%p392_p8)  }
  0x2b   : > { %664 = vrot.lane.b32.xlu1 %v1045_v18, %s1094_s15  ;;  %593 = vrot.lane.b32.xlu0 %v1045_v18, %s1095_s23  ;;  %s1277_s17 = smov (!%p466_p9, %s1082_s17), 1 }
  0x2c   : > { %965 = vmatpush3.bf16.msra.mxu0 %v1047_v19  ;;  %s929_s7 = sshll.u32 %s1277_s17, 2 }
  0x2d   : > { %966 = vmatprep.subr.bf16.mxu0 %v1092_v16  ;;  %s475_s10 = scalar_lea.vmem %s1268_s4, %s929_s7 }
  0x2f   : > { %597 = vrot.lane.b32.xlu1 %v1046_v20, %s1095_s23  ;;  %595 = vrot.lane.b32.xlu0 %v1047_v19, %s1095_s23 }
  0x30   : > { %967 = vmatpush3.bf16.msra.mxu0 %v1049_v21 }
  0x31   : > { %968 = vmatprep.subr.bf16.mxu0 %v1092_v16 }
  0x33   : > { %668 = vrot.lane.b32.xlu1 %v1046_v20, %s1094_s15  ;;  %666 = vrot.lane.b32.xlu0 %v1047_v19, %s1094_s15 }
  0x34   : > { %969 = vmatpush3.bf16.msra.mxu0 %v1051_v22 }
  0x35   : > { %986 = vmatprep.subr.bf16.mxu0 %v1092_v16 }
  0x37   : > { %601 = vrot.lane.b32.xlu1 %v1048_v23, %s1095_s23  ;;  %599 = vrot.lane.b32.xlu0 %v1049_v21, %s1095_s23 }
  0x38   : > { %971 = vmatmul.mubr.msk.bf16.vlgmr.msra.gmra.mrb[0].mxu0 %vm544_vm1, %v543_v24 }
  0x39   : > { %994 = vmatprep.mubr.msk.bf16.mxu0 %vm1093_vm0, %v1092_v16 }
  0x3b   : > { %672 = vrot.lane.b32.xlu1 %v1048_v23, %s1094_s15  ;;  %670 = vrot.lane.b32.xlu0 %v1049_v21, %s1094_s15 }
  0x3f   : > { %605 = vrot.lane.b32.xlu1 %v1050_v25, %s1095_s23  ;;  %603 = vrot.lane.b32.xlu0 %v1051_v22, %s1095_s23 }
  0x43   : > { %676 = vrot.lane.b32.xlu1 %v1050_v25, %s1094_s15  ;;  %674 = vrot.lane.b32.xlu0 %v1051_v22, %s1094_s15 }
  0x47   : > { %739 = vperm.xlu0 %1043, %v736_v27  }
  0x99   : > { %v663_v28 = vpop.permute.xlu1 %662  ;;  %v592_v29 = vpop.permute.xlu0 %591 }
  0x9d   : > { %v665_v30 = vpop.permute.xlu1 %664  ;;  %v594_v31 = vpop.permute.xlu0 %593 }
  0x9e   : > { %v679_v32 = vsel %vm678_vm2, %v663_v28, %v665_v30  ;;  %v608_v33 = vsel %vm607_vm3, %v592_v29, %v594_v31 }
  0x9f   : > { %975 = vmatpush3.bf16.msra.mxu1 %v608_v33  ;;  %987 = vmatpush3.bf16.msra.mxu0 %v679_v32 }
  0xa0   : > { %976 = vmatprep.subr.bf16.mxu1 %v1092_v16  ;;  %988 = vmatprep.subr.bf16.mxu0 %v1092_v16 }
  0xa1   : > { %v598_v34 = vpop.permute.xlu1 %597  ;;  %v596_v35 = vpop.permute.xlu0 %595 }
  0xa2   : > { %v609_v36 = vsel %vm607_vm3, %v596_v35, %v598_v34 }
  0xa3   : > { %977 = vmatpush3.bf16.msra.mxu1 %v609_v36 }
  0xa4   : > { %978 = vmatprep.subr.bf16.mxu1 %v1092_v16 }
  0xa5   : > { %v669_v37 = vpop.permute.xlu1 %668  ;;  %v667_v38 = vpop.permute.xlu0 %666 }
  0xa6   : > { %v680_v39 = vsel %vm678_vm2, %v667_v38, %v669_v37 }
  0xa7   : > { %989 = vmatpush3.bf16.msra.mxu0 %v680_v39 }
  0xa8   : > { %990 = vmatprep.subr.bf16.mxu0 %v1092_v16 }
  0xa9   : > { %v602_v40 = vpop.permute.xlu1 %601  ;;  %v600_v41 = vpop.permute.xlu0 %599 }
  0xaa   : > { %v610_v42 = vsel %vm607_vm3, %v600_v41, %v602_v40 }
  0xab   : > { %979 = vmatpush3.bf16.msra.mxu1 %v610_v42 }
  0xac   : > { %980 = vmatprep.subr.bf16.mxu1 %v1092_v16 }
  0xad   : > { %v673_v43 = vpop.permute.xlu1 %672  ;;  %v671_v44 = vpop.permute.xlu0 %670 }
  0xae   : > { %v681_v45 = vsel %vm678_vm2, %v671_v44, %v673_v43 }
  0xaf   : > { %991 = vmatpush3.bf16.msra.mxu0 %v681_v45 }
  0xb0   : > { %992 = vmatprep.subr.bf16.mxu0 %v1092_v16 }
  0xb1   : > { %v606_v46 = vpop.permute.xlu1 %605  ;;  %v604_v47 = vpop.permute.xlu0 %603 }
  0xb2   : > { %v611_v48 = vsel %vm607_vm3, %v604_v47, %v606_v46 }
  0xb3   : > { %981 = vmatpush3.bf16.msra.mxu1 %v611_v48 }
  0xb5   : > { %v677_v50 = vpop.permute.xlu1 %676  ;;  %v675_v51 = vpop.permute.xlu0 %674 }
  0xb6   : > { %v682_v52 = vsel %vm678_vm2, %v675_v51, %v677_v50  ;;  %983 = vmatmul.mubr.msk.bf16.vlgmr.msra.gmra.mrb[0].mxu1 %vm544_vm1, %v939_v49 }
  0xb7   : > { %993 = vmatpush3.bf16.msra.mxu0 %v682_v52 }
  0xba   : > { %995 = vmatmul.mubr.msk.bf16.vlgmr.msra.gmra.mrb[4].mxu0 %vm544_vm1, %v941_v53 }
  0xc6   : > { %v740_v0 = vpop.permute.xlu0 %739 }
 0x10b   : > { %v582_v54 = vpop.f32.mrb[0].mxu0 }
 0x10c   : > { %v972_v55 = vpop.f32.mrb[1].mxu0 }
 0x10d   : > { %v585_v56 = vpop.f32.mrb[2].mxu0 }
 0x10e   : > { %v973_v57 = vpop.f32.mrb[3].mxu0 }
 0x189   : > { %v653_v58 = vpop.f32.mrb[0].mxu1 }
 0x18a   : > { %v659_v59 = vadd.f32 %v653_v58, %v582_v54  ;;  %v984_v60 = vpop.f32.mrb[1].mxu1 }
 0x18b   : > { %v656_v61 = vpop.f32.mrb[2].mxu1 }
 0x18c   : > { %v985_v62 = vpop.f32.mrb[3].mxu1 }
 0x18d   : > { %v724_v63 = vpop.f32.mrb[4].mxu0 }
 0x18e   : > { %v730_v1 = vadd.f32 %v724_v63, %v659_v59  ;;  %v996_v2 = vpop.f32.mrb[5].mxu0 }
 0x18f   : > { %v727_v3 = vpop.f32.mrb[6].mxu0 }
 0x190   : > { %v742_v4 = vadd.f32 %v740_v0, %v730_v1  ;;  %v997_v5 = vpop.f32.mrb[7].mxu0 }
 0x192   : > { %v743_v6 = vpack.c.bf16 %v742_v4, %v742_v4 }
 0x194   : > { %744 = vst [vmem:[%s475_s10] sm:$0xf] %v743_v6 }
 0x195 PF: > { %s14_s19 = sadd.s32 1, %s1090_s19   ;;  %s1270_s15 = smov %s1078_s16 }
 0x196   : > { %p11_p10 = scmp.ge.s32.totalorder %s14_s19, 4   ;;  %s1271_s16 = smov %s1161_s24 }
 0x197   : > { %s1272_s17 = smov %s1086_s18  ;;  %s1273_s18 = smov %s1275_s20 }
 0x198   :  { %13 = sbr.rel (!%p11_p10) target bundleno = 3 (0x3), region = 177 }

</bundles_post_ra>
